<compile_context>
chip_gen: v7x
topology: tpu7x:2x2x1
jax: 0.10.0
libtpu: 0.0.40
codegen_flags: <defaults>
</compile_context>

<pallas_src>
import functools
import math

import jax
import jax.numpy as jnp
from jax.experimental import pallas as pl
from jax.experimental.pallas import tpu as pltpu


# ------------------------------ Fused kernel --------------------------------


def _sstcn_fused_kernel(
    x_ref, w_in_ref, b_in_ref,
    wd_m_ref, wd_c_ref, wd_p_ref, bd_ref, w1_ref, b1_ref,
    wqkv_ref, bqkv_ref, wo_ref, bo_ref,
    ln_g_ref, ln_b_ref,
    w_out_t_ref, b_out_ref,
    o_ref,
    xpad_ref,
    *, num_layers, num_heads, head_dim, T, pad, key_block, eps):
    P = pad
    C = num_heads * head_dim
    bf16 = jnp.bfloat16

    # ---- zero ONLY the halo rows, ONLY on the first grid step ---------------
    # (scratch persists across grid iterations; halo is never overwritten and
    #  the center is fully rewritten by h0 for every batch.)
    @pl.when(pl.program_id(0) == 0)
    def _():
        xpad_ref[0:P, :] = jnp.zeros((P, C), jnp.float32)
        xpad_ref[P + T:P + T + P, :] = jnp.zeros((P, C), jnp.float32)

    # ---- conv_in (1x1) folded in; write center -------------------------------
    x_in = x_ref[0].astype(bf16)                                       # (T, Cin)
    h0 = jnp.dot(x_in, w_in_ref[...],
                 preferred_element_type=jnp.float32) + b_in_ref[...]
    xpad_ref[P:P + T, :] = h0

    # ---- dilated residual layers, activation resident in VMEM (f32) ---------
    for l in range(num_layers):
        d = 2 ** l
        x0 = xpad_ref[P:P + T, :]                                      # f32 (T, C)
        xm = xpad_ref[P - d:P - d + T, :].astype(bf16)
        xp_ = xpad_ref[P + d:P + d + T, :].astype(bf16)
        # three accumulating K=C matmuls (no (T, 3C) concat temporary)
        h = (jnp.dot(xm, wd_m_ref[l], preferred_element_type=jnp.float32)
             + jnp.dot(x0.astype(bf16), wd_c_ref[l],
                       preferred_element_type=jnp.float32)
             + jnp.dot(xp_, wd_p_ref[l], preferred_element_type=jnp.float32)
             + bd_ref[l])
        h = jnp.maximum(h, 0.0)                                        # ReLU
        # TODO(synk): dropout omitted (eval-mode forward).
        y = jnp.dot(h.astype(bf16), w1_ref[l],
                    preferred_element_type=jnp.float32) + b1_ref[l]
        xpad_ref[P:P + T, :] = x0 + y                                  # residual (f32)

    out = xpad_ref[P:P + T, :]                                         # (T, C) f32
    out_b = out.astype(bf16)

    # ---- MHA: fused QKV projection, per-head online-softmax over key blocks --
    # (1/sqrt(head_dim) is already folded into the Q columns of wqkv/bqkv)
    qkv = jnp.dot(out_b, wqkv_ref[...],
                  preferred_element_type=jnp.float32) + bqkv_ref[...]  # (T, 3C)
    qkv_b = qkv.astype(bf16)

    n_kb = T // key_block
    ctx_heads = []
    for hi in range(num_heads):
        qs = hi * head_dim
        q_h = qkv_b[:, qs:qs + head_dim]                               # (T, hd)
        m_i = jnp.full((T, 1), -jnp.inf, jnp.float32)
        l_i = jnp.zeros((T, 1), jnp.float32)
        acc = jnp.zeros((T, head_dim), jnp.float32)
        for kb in range(n_kb):
            r0 = kb * key_block
            k_blk = qkv_b[r0:r0 + key_block, C + qs:C + qs + head_dim]
            v_blk = qkv_b[r0:r0 + key_block, 2 * C + qs:2 * C + qs + head_dim]
            s = jax.lax.dot_general(q_h, k_blk, (((1,), (1,)), ((), ())),
                                    preferred_element_type=jnp.float32)  # (T, KB)
            m_new = jnp.maximum(m_i, jnp.max(s, axis=-1, keepdims=True))
            alpha = jnp.exp(m_i - m_new)
            p = jnp.exp(s - m_new)
            l_i = alpha * l_i + jnp.sum(p, axis=-1, keepdims=True)
            acc = alpha * acc + jnp.dot(p.astype(bf16), v_blk,
                                        preferred_element_type=jnp.float32)
            m_i = m_new
        ctx_h = acc * pl.reciprocal(l_i, approx=True)                  # (T, hd)
        ctx_heads.append(ctx_h.astype(bf16))
    ctx = jnp.concatenate(ctx_heads, axis=-1)                          # (T, C) bf16
    att = jnp.dot(ctx, wo_ref[...],
                  preferred_element_type=jnp.float32) + bo_ref[...]    # (T, C) f32

    # ---- LayerNorm(attended) + residual --------------------------------------
    mu = jnp.mean(att, axis=-1, keepdims=True)
    dev = att - mu
    var = jnp.mean(dev * dev, axis=-1, keepdims=True)
    normed = dev * jax.lax.rsqrt(var + eps) * ln_g_ref[...] + ln_b_ref[...]
    final = normed + out                                               # (T, C)

    # ---- conv_out (1x1), written directly as (num_classes, T) ----------------
    logits = jax.lax.dot_general(w_out_t_ref[...], final.astype(bf16),
                                 (((1,), (1,)), ((), ())),
                                 preferred_element_type=jnp.float32)   # (nc, T)
    o_ref[0] = (logits + b_out_ref[...]).astype(o_ref.dtype)


# --------------------------- Parameter preparation ---------------------------


def init_sstcn_params(key, num_layers, in_channels, num_classes, num_filters):
    ks = jax.random.split(key, 8 + 4 * num_layers)
    s = 0.02
    p = {}
    p["w_in"] = s * jax.random.normal(ks[0], (in_channels, num_filters), jnp.float32)
    p["b_in"] = s * jax.random.normal(ks[1], (num_filters,), jnp.float32)
    p["layers"] = []
    for l in range(num_layers):
        k0, k1, k2, k3 = ks[2 + 4 * l: 6 + 4 * l]
        p["layers"].append(dict(
            wd=s * jax.random.normal(k0, (3, num_filters, num_filters), jnp.float32),
            bd=s * jax.random.normal(k1, (num_filters,), jnp.float32),
            w1=s * jax.random.normal(k2, (num_filters, num_filters), jnp.float32),
            b1=s * jax.random.normal(k3, (num_filters,), jnp.float32),
        ))
    base = 2 + 4 * num_layers
    p["wqkv"] = s * jax.random.normal(ks[base + 0], (num_filters, 3 * num_filters), jnp.float32)
    p["bqkv"] = s * jax.random.normal(ks[base + 1], (3 * num_filters,), jnp.float32)
    p["wo"] = s * jax.random.normal(ks[base + 2], (num_filters, num_filters), jnp.float32)
    p["bo"] = s * jax.random.normal(ks[base + 3], (num_filters,), jnp.float32)
    p["ln_g"] = jnp.ones((num_filters,), jnp.float32)
    p["ln_b"] = jnp.zeros((num_filters,), jnp.float32)
    p["w_out"] = s * jax.random.normal(ks[base + 4], (num_filters, num_classes), jnp.float32)
    p["b_out"] = s * jax.random.normal(ks[base + 5], (num_classes,), jnp.float32)
    return p


def _prepare_params(params, num_heads):
    """One-time host-side weight prep: per-tap conv weights, fused QKV with the
    attention scale folded into the Q columns, bf16 casts for matmul operands."""
    C = params["w_in"].shape[1]
    hd = C // num_heads
    nc = params["w_out"].shape[1]
    bf = jnp.bfloat16
    scale = 1.0 / math.sqrt(hd)

    wd = jnp.stack([lp["wd"] for lp in params["layers"]])              # (L,3,C,C)
    bd = jnp.stack([lp["bd"] for lp in params["layers"]]).reshape(-1, 1, C)
    w1 = jnp.stack([lp["w1"] for lp in params["layers"]]).astype(bf)
    b1 = jnp.stack([lp["b1"] for lp in params["layers"]]).reshape(-1, 1, C)

    wqkv = params["wqkv"].at[:, 0:C].multiply(scale)
    bqkv = params["bqkv"].at[0:C].multiply(scale)

    return dict(
        w_in=params["w_in"].astype(bf), b_in=params["b_in"].reshape(1, C),
        wd_m=wd[:, 0].astype(bf), wd_c=wd[:, 1].astype(bf), wd_p=wd[:, 2].astype(bf),
        bd=bd, w1=w1, b1=b1,
        wqkv=wqkv.astype(bf), bqkv=bqkv.reshape(1, 3 * C),
        wo=params["wo"].astype(bf), bo=params["bo"].reshape(1, C),
        ln_g=params["ln_g"].reshape(1, C), ln_b=params["ln_b"].reshape(1, C),
        w_out_t=params["w_out"].T.astype(bf),       # (num_classes, C)
        b_out=params["b_out"].reshape(nc, 1),
    )


def _const_map(ndim):
    def im(b):
        return (0,) * ndim
    return im


# --------------------------------- Forward -----------------------------------


def sstcn_forward(params, x_nct, num_heads):
    """x_nct: (B, in_channels, T) -> (B, num_classes, T), matching PyTorch."""
    B, Cin, T = x_nct.shape
    C = params["w_in"].shape[1]
    L = len(params["layers"])
    nc = params["w_out"].shape[1]
    hd = C // num_heads

    # halo rounded up to the f32 sublane tile (8) -> aligned center slice
    pad = max(2 ** (L - 1), 1)
    pad = ((pad + 7) // 8) * 8
    Tp = T + 2 * pad

    # key-block size for the online-softmax attention loop
    key_block = T
    for cand in (512, 256, 128):
        if T > cand and T % cand == 0:
            key_block = cand
            break

    pp = _prepare_params(params, num_heads)
    x_btc = jnp.transpose(x_nct, (0, 2, 1)).astype(jnp.float32)        # tiny (B,T,Cin)

    kernel = functools.partial(
        _sstcn_fused_kernel, num_layers=L, num_heads=num_heads,
        head_dim=hd, T=T, pad=pad, key_block=key_block, eps=1e-5)

    operands = (x_btc, pp["w_in"], pp["b_in"],
                pp["wd_m"], pp["wd_c"], pp["wd_p"], pp["bd"], pp["w1"], pp["b1"],
                pp["wqkv"], pp["bqkv"], pp["wo"], pp["bo"],
                pp["ln_g"], pp["ln_b"], pp["w_out_t"], pp["b_out"])

    in_specs = [pl.BlockSpec((1, T, Cin), lambda b: (b, 0, 0))]
    for a in operands[1:]:
        in_specs.append(pl.BlockSpec(a.shape, _const_map(a.ndim)))

    # VMEM budget derived from actual buffer sizes (double-buffered I/O blocks
    # + resident scratch), with headroom for in-kernel temporaries.
    blk_in_bytes = T * Cin * 4 + sum(int(a.size) * a.dtype.itemsize
                                     for a in operands[1:])
    out_blk_bytes = nc * T * 4
    scratch_bytes = Tp * C * 4
    vmem_needed = 2 * (blk_in_bytes + out_blk_bytes) + scratch_bytes
    vmem_limit = min(32 * 1024 * 1024, max(4 * vmem_needed, 8 * 1024 * 1024))

    return pl.pallas_call(
        kernel,
        out_shape=jax.ShapeDtypeStruct((B, nc, T), jnp.float32),
        grid_spec=pltpu.PrefetchScalarGridSpec(
            num_scalar_prefetch=0,
            grid=(B,),
            in_specs=in_specs,
            out_specs=pl.BlockSpec((1, nc, T), lambda b: (b, 0, 0)),
            scratch_shapes=[pltpu.VMEM((Tp, C), jnp.float32)],
        ),
        compiler_params=pltpu.CompilerParams(
            dimension_semantics=("parallel",),
            vmem_limit_bytes=vmem_limit,
        ),
    )(*operands)


# ---------------------------------- Driver -----------------------------------


if __name__ == "__main__":
    B, in_channels, T = 2, 4, 16
    num_layers, num_classes, num_filters, num_heads = 3, 8, 128, 8

    key = jax.random.PRNGKey(0)
    k_param, k_input = jax.random.split(key)
    params = init_sstcn_params(k_param, num_layers, in_channels, num_classes, num_filters)
    x = jax.random.normal(k_input, (B, in_channels, T), jnp.float32)

    y = sstcn_forward(params, x, num_heads)
    jax.block_until_ready(y)
    assert y.shape == (B, num_classes, T), y.shape
    print("KERNEL_OK")
</pallas_src>

<mosaic_0001>
module attributes {stable_mosaic.version = 11 : i64} {
  func.func @_sstcn_fused_kernel(%arg0: i32, %arg1: memref<1x16x4xf32, #tpu.memory_space<vmem>>, %arg2: memref<4x128xbf16, #tpu.memory_space<vmem>>, %arg3: memref<1x128xf32, #tpu.memory_space<vmem>>, %arg4: memref<3x128x128xbf16, #tpu.memory_space<vmem>>, %arg5: memref<3x128x128xbf16, #tpu.memory_space<vmem>>, %arg6: memref<3x128x128xbf16, #tpu.memory_space<vmem>>, %arg7: memref<3x1x128xf32, #tpu.memory_space<vmem>>, %arg8: memref<3x128x128xbf16, #tpu.memory_space<vmem>>, %arg9: memref<3x1x128xf32, #tpu.memory_space<vmem>>, %arg10: memref<128x384xbf16, #tpu.memory_space<vmem>>, %arg11: memref<1x384xf32, #tpu.memory_space<vmem>>, %arg12: memref<128x128xbf16, #tpu.memory_space<vmem>>, %arg13: memref<1x128xf32, #tpu.memory_space<vmem>>, %arg14: memref<1x128xf32, #tpu.memory_space<vmem>>, %arg15: memref<1x128xf32, #tpu.memory_space<vmem>>, %arg16: memref<8x128xbf16, #tpu.memory_space<vmem>>, %arg17: memref<8x1xf32, #tpu.memory_space<vmem>>, %arg18: memref<1x8x16xf32, #tpu.memory_space<vmem>>, %arg19: memref<32x128xf32, #tpu.memory_space<vmem>>) attributes {dimension_semantics = [#tpu.dimension_semantics<parallel>], iteration_bounds = array<i64: 2>, scalar_prefetch = 0 : i64, scratch_operands = 1 : i64, tpu.core_type = #tpu.core_type<tc>, window_params = [{transform_indices = @transform_0, window_bounds = array<i64: 1, 16, 4>}, {pipeline_mode = #tpu.pipeline_mode<synchronous>, transform_indices = @transform_1, window_bounds = array<i64: 4, 128>}, {pipeline_mode = #tpu.pipeline_mode<synchronous>, transform_indices = @transform_2, window_bounds = array<i64: 1, 128>}, {pipeline_mode = #tpu.pipeline_mode<synchronous>, transform_indices = @transform_3, window_bounds = array<i64: 3, 128, 128>}, {pipeline_mode = #tpu.pipeline_mode<synchronous>, transform_indices = @transform_4, window_bounds = array<i64: 3, 128, 128>}, {pipeline_mode = #tpu.pipeline_mode<synchronous>, transform_indices = @transform_5, window_bounds = array<i64: 3, 128, 128>}, {pipeline_mode = #tpu.pipeline_mode<synchronous>, transform_indices = @transform_6, window_bounds = array<i64: 3, 1, 128>}, {pipeline_mode = #tpu.pipeline_mode<synchronous>, transform_indices = @transform_7, window_bounds = array<i64: 3, 128, 128>}, {pipeline_mode = #tpu.pipeline_mode<synchronous>, transform_indices = @transform_8, window_bounds = array<i64: 3, 1, 128>}, {pipeline_mode = #tpu.pipeline_mode<synchronous>, transform_indices = @transform_9, window_bounds = array<i64: 128, 384>}, {pipeline_mode = #tpu.pipeline_mode<synchronous>, transform_indices = @transform_10, window_bounds = array<i64: 1, 384>}, {pipeline_mode = #tpu.pipeline_mode<synchronous>, transform_indices = @transform_11, window_bounds = array<i64: 128, 128>}, {pipeline_mode = #tpu.pipeline_mode<synchronous>, transform_indices = @transform_12, window_bounds = array<i64: 1, 128>}, {pipeline_mode = #tpu.pipeline_mode<synchronous>, transform_indices = @transform_13, window_bounds = array<i64: 1, 128>}, {pipeline_mode = #tpu.pipeline_mode<synchronous>, transform_indices = @transform_14, window_bounds = array<i64: 1, 128>}, {pipeline_mode = #tpu.pipeline_mode<synchronous>, transform_indices = @transform_15, window_bounds = array<i64: 8, 128>}, {pipeline_mode = #tpu.pipeline_mode<synchronous>, transform_indices = @transform_16, window_bounds = array<i64: 8, 1>}, {transform_indices = @transform_17, window_bounds = array<i64: 1, 8, 16>}]} {
    %c0_i32 = arith.constant 0 : i32
    %0 = arith.cmpi eq, %arg0, %c0_i32 : i32
    %1 = arith.extui %0 : i1 to i32
    %c0_i32_0 = arith.constant 0 : i32
    %2 = arith.cmpi ne, %1, %c0_i32_0 : i32
    scf.if %2 {
      %cst_178 = arith.constant 0.000000e+00 : f32
      %381 = vector.broadcast %cst_178 : f32 to vector<8x128xf32>
      %c0_179 = arith.constant 0 : index
      %c0_180 = arith.constant 0 : index
      %382 = vector.load %arg19[%c0_179, %c0_180] : memref<32x128xf32, #tpu.memory_space<vmem>>, vector<8x128xf32>
      tpu.vector_store %arg19[%c0_179, %c0_180], %381 {strides = array<i32>} : memref<32x128xf32, #tpu.memory_space<vmem>>, vector<8x128xf32>,
      %cst_181 = arith.constant 0.000000e+00 : f32
      %383 = vector.broadcast %cst_181 : f32 to vector<8x128xf32>
      %c24 = arith.constant 24 : index
      %c0_182 = arith.constant 0 : index
      %384 = vector.load %arg19[%c24, %c0_182] : memref<32x128xf32, #tpu.memory_space<vmem>>, vector<8x128xf32>
      tpu.vector_store %arg19[%c24, %c0_182], %383 {strides = array<i32>} : memref<32x128xf32, #tpu.memory_space<vmem>>, vector<8x128xf32>,
    } else {
    }
    %c0 = arith.constant 0 : index
    %c0_1 = arith.constant 0 : index
    %c0_2 = arith.constant 0 : index
    %3 = vector.load %arg1[%c0, %c0_1, %c0_2] : memref<1x16x4xf32, #tpu.memory_space<vmem>>, vector<1x16x4xf32>
    %4 = vector.shape_cast %3 : vector<1x16x4xf32> to vector<16x4xf32>
    %5 = arith.truncf %4 : vector<16x4xf32> to vector<16x4xbf16>
    %c0_3 = arith.constant 0 : index
    %c0_4 = arith.constant 0 : index
    %6 = vector.load %arg2[%c0_3, %c0_4] : memref<4x128xbf16, #tpu.memory_space<vmem>>, vector<4x128xbf16>
    %cst = arith.constant dense<0.000000e+00> : vector<16x128xf32>
    %7 = tpu.matmul %5, %6, %cst {dimension_numbers = #tpu.dot_dimension_numbers<[1], [0], [0], [1], [0, 0, 1, 1], [], []>} : vector<16x4xbf16>, vector<4x128xbf16>, vector<16x128xf32> -> vector<16x128xf32>
    %c0_5 = arith.constant 0 : index
    %c0_6 = arith.constant 0 : index
    %8 = vector.load %arg3[%c0_5, %c0_6] : memref<1x128xf32, #tpu.memory_space<vmem>>, vector<1x128xf32>
    %9 = vector.broadcast %8 : vector<1x128xf32> to vector<16x128xf32>
    %10 = arith.addf %7, %9 : vector<16x128xf32>
    %c8 = arith.constant 8 : index
    %c0_7 = arith.constant 0 : index
    %11 = vector.load %arg19[%c8, %c0_7] : memref<32x128xf32, #tpu.memory_space<vmem>>, vector<16x128xf32>
    tpu.vector_store %arg19[%c8, %c0_7], %10 {strides = array<i32>} : memref<32x128xf32, #tpu.memory_space<vmem>>, vector<16x128xf32>,
    %c8_8 = arith.constant 8 : index
    %c0_9 = arith.constant 0 : index
    %12 = vector.load %arg19[%c8_8, %c0_9] : memref<32x128xf32, #tpu.memory_space<vmem>>, vector<16x128xf32>
    %c7 = arith.constant 7 : index
    %c0_10 = arith.constant 0 : index
    %13 = vector.load %arg19[%c7, %c0_10] : memref<32x128xf32, #tpu.memory_space<vmem>>, vector<16x128xf32>
    %14 = arith.truncf %13 : vector<16x128xf32> to vector<16x128xbf16>
    %c9 = arith.constant 9 : index
    %c0_11 = arith.constant 0 : index
    %15 = vector.load %arg19[%c9, %c0_11] : memref<32x128xf32, #tpu.memory_space<vmem>>, vector<16x128xf32>
    %16 = arith.truncf %15 : vector<16x128xf32> to vector<16x128xbf16>
    %c0_12 = arith.constant 0 : index
    %c0_13 = arith.constant 0 : index
    %c0_14 = arith.constant 0 : index
    %17 = vector.load %arg4[%c0_12, %c0_13, %c0_14] : memref<3x128x128xbf16, #tpu.memory_space<vmem>>, vector<1x128x128xbf16>
    %18 = vector.shape_cast %17 : vector<1x128x128xbf16> to vector<128x128xbf16>
    %cst_15 = arith.constant dense<0.000000e+00> : vector<16x128xf32>
    %19 = tpu.matmul %14, %18, %cst_15 {dimension_numbers = #tpu.dot_dimension_numbers<[1], [0], [0], [1], [0, 0, 1, 1], [], []>} : vector<16x128xbf16>, vector<128x128xbf16>, vector<16x128xf32> -> vector<16x128xf32>
    %20 = arith.truncf %12 : vector<16x128xf32> to vector<16x128xbf16>
    %c0_16 = arith.constant 0 : index
    %c0_17 = arith.constant 0 : index
    %c0_18 = arith.constant 0 : index
    %21 = vector.load %arg5[%c0_16, %c0_17, %c0_18] : memref<3x128x128xbf16, #tpu.memory_space<vmem>>, vector<1x128x128xbf16>
    %22 = vector.shape_cast %21 : vector<1x128x128xbf16> to vector<128x128xbf16>
    %cst_19 = arith.constant dense<0.000000e+00> : vector<16x128xf32>
    %23 = tpu.matmul %20, %22, %cst_19 {dimension_numbers = #tpu.dot_dimension_numbers<[1], [0], [0], [1], [0, 0, 1, 1], [], []>} : vector<16x128xbf16>, vector<128x128xbf16>, vector<16x128xf32> -> vector<16x128xf32>
    %24 = arith.addf %19, %23 : vector<16x128xf32>
    %c0_20 = arith.constant 0 : index
    %c0_21 = arith.constant 0 : index
    %c0_22 = arith.constant 0 : index
    %25 = vector.load %arg6[%c0_20, %c0_21, %c0_22] : memref<3x128x128xbf16, #tpu.memory_space<vmem>>, vector<1x128x128xbf16>
    %26 = vector.shape_cast %25 : vector<1x128x128xbf16> to vector<128x128xbf16>
    %cst_23 = arith.constant dense<0.000000e+00> : vector<16x128xf32>
    %27 = tpu.matmul %16, %26, %cst_23 {dimension_numbers = #tpu.dot_dimension_numbers<[1], [0], [0], [1], [0, 0, 1, 1], [], []>} : vector<16x128xbf16>, vector<128x128xbf16>, vector<16x128xf32> -> vector<16x128xf32>
    %28 = arith.addf %24, %27 : vector<16x128xf32>
    %c0_24 = arith.constant 0 : index
    %c0_25 = arith.constant 0 : index
    %c0_26 = arith.constant 0 : index
    %29 = vector.load %arg7[%c0_24, %c0_25, %c0_26] : memref<3x1x128xf32, #tpu.memory_space<vmem>>, vector<1x1x128xf32>
    %30 = vector.shape_cast %29 : vector<1x1x128xf32> to vector<1x128xf32>
    %31 = vector.broadcast %30 : vector<1x128xf32> to vector<16x128xf32>
    %32 = arith.addf %28, %31 : vector<16x128xf32>
    %cst_27 = arith.constant 0.000000e+00 : f32
    %33 = vector.broadcast %cst_27 : f32 to vector<16x128xf32>
    %34 = arith.maximumf %32, %33 : vector<16x128xf32>
    %35 = arith.truncf %34 : vector<16x128xf32> to vector<16x128xbf16>
    %c0_28 = arith.constant 0 : index
    %c0_29 = arith.constant 0 : index
    %c0_30 = arith.constant 0 : index
    %36 = vector.load %arg8[%c0_28, %c0_29, %c0_30] : memref<3x128x128xbf16, #tpu.memory_space<vmem>>, vector<1x128x128xbf16>
    %37 = vector.shape_cast %36 : vector<1x128x128xbf16> to vector<128x128xbf16>
    %cst_31 = arith.constant dense<0.000000e+00> : vector<16x128xf32>
    %38 = tpu.matmul %35, %37, %cst_31 {dimension_numbers = #tpu.dot_dimension_numbers<[1], [0], [0], [1], [0, 0, 1, 1], [], []>} : vector<16x128xbf16>, vector<128x128xbf16>, vector<16x128xf32> -> vector<16x128xf32>
    %c0_32 = arith.constant 0 : index
    %c0_33 = arith.constant 0 : index
    %c0_34 = arith.constant 0 : index
    %39 = vector.load %arg9[%c0_32, %c0_33, %c0_34] : memref<3x1x128xf32, #tpu.memory_space<vmem>>, vector<1x1x128xf32>
    %40 = vector.shape_cast %39 : vector<1x1x128xf32> to vector<1x128xf32>
    %41 = vector.broadcast %40 : vector<1x128xf32> to vector<16x128xf32>
    %42 = arith.addf %38, %41 : vector<16x128xf32>
    %43 = arith.addf %12, %42 : vector<16x128xf32>
    %c8_35 = arith.constant 8 : index
    %c0_36 = arith.constant 0 : index
    %44 = vector.load %arg19[%c8_35, %c0_36] : memref<32x128xf32, #tpu.memory_space<vmem>>, vector<16x128xf32>
    tpu.vector_store %arg19[%c8_35, %c0_36], %43 {strides = array<i32>} : memref<32x128xf32, #tpu.memory_space<vmem>>, vector<16x128xf32>,
    %c8_37 = arith.constant 8 : index
    %c0_38 = arith.constant 0 : index
    %45 = vector.load %arg19[%c8_37, %c0_38] : memref<32x128xf32, #tpu.memory_space<vmem>>, vector<16x128xf32>
    %c6 = arith.constant 6 : index
    %c0_39 = arith.constant 0 : index
    %46 = vector.load %arg19[%c6, %c0_39] : memref<32x128xf32, #tpu.memory_space<vmem>>, vector<16x128xf32>
    %47 = arith.truncf %46 : vector<16x128xf32> to vector<16x128xbf16>
    %c10 = arith.constant 10 : index
    %c0_40 = arith.constant 0 : index
    %48 = vector.load %arg19[%c10, %c0_40] : memref<32x128xf32, #tpu.memory_space<vmem>>, vector<16x128xf32>
    %49 = arith.truncf %48 : vector<16x128xf32> to vector<16x128xbf16>
    %c1 = arith.constant 1 : index
    %c0_41 = arith.constant 0 : index
    %c0_42 = arith.constant 0 : index
    %50 = vector.load %arg4[%c1, %c0_41, %c0_42] : memref<3x128x128xbf16, #tpu.memory_space<vmem>>, vector<1x128x128xbf16>
    %51 = vector.shape_cast %50 : vector<1x128x128xbf16> to vector<128x128xbf16>
    %cst_43 = arith.constant dense<0.000000e+00> : vector<16x128xf32>
    %52 = tpu.matmul %47, %51, %cst_43 {dimension_numbers = #tpu.dot_dimension_numbers<[1], [0], [0], [1], [0, 0, 1, 1], [], []>} : vector<16x128xbf16>, vector<128x128xbf16>, vector<16x128xf32> -> vector<16x128xf32>
    %53 = arith.truncf %45 : vector<16x128xf32> to vector<16x128xbf16>
    %c1_44 = arith.constant 1 : index
    %c0_45 = arith.constant 0 : index
    %c0_46 = arith.constant 0 : index
    %54 = vector.load %arg5[%c1_44, %c0_45, %c0_46] : memref<3x128x128xbf16, #tpu.memory_space<vmem>>, vector<1x128x128xbf16>
    %55 = vector.shape_cast %54 : vector<1x128x128xbf16> to vector<128x128xbf16>
    %cst_47 = arith.constant dense<0.000000e+00> : vector<16x128xf32>
    %56 = tpu.matmul %53, %55, %cst_47 {dimension_numbers = #tpu.dot_dimension_numbers<[1], [0], [0], [1], [0, 0, 1, 1], [], []>} : vector<16x128xbf16>, vector<128x128xbf16>, vector<16x128xf32> -> vector<16x128xf32>
    %57 = arith.addf %52, %56 : vector<16x128xf32>
    %c1_48 = arith.constant 1 : index
    %c0_49 = arith.constant 0 : index
    %c0_50 = arith.constant 0 : index
    %58 = vector.load %arg6[%c1_48, %c0_49, %c0_50] : memref<3x128x128xbf16, #tpu.memory_space<vmem>>, vector<1x128x128xbf16>
    %59 = vector.shape_cast %58 : vector<1x128x128xbf16> to vector<128x128xbf16>
    %cst_51 = arith.constant dense<0.000000e+00> : vector<16x128xf32>
    %60 = tpu.matmul %49, %59, %cst_51 {dimension_numbers = #tpu.dot_dimension_numbers<[1], [0], [0], [1], [0, 0, 1, 1], [], []>} : vector<16x128xbf16>, vector<128x128xbf16>, vector<16x128xf32> -> vector<16x128xf32>
    %61 = arith.addf %57, %60 : vector<16x128xf32>
    %c1_52 = arith.constant 1 : index
    %c0_53 = arith.constant 0 : index
    %c0_54 = arith.constant 0 : index
    %62 = vector.load %arg7[%c1_52, %c0_53, %c0_54] : memref<3x1x128xf32, #tpu.memory_space<vmem>>, vector<1x1x128xf32>
    %63 = vector.shape_cast %62 : vector<1x1x128xf32> to vector<1x128xf32>
    %64 = vector.broadcast %63 : vector<1x128xf32> to vector<16x128xf32>
    %65 = arith.addf %61, %64 : vector<16x128xf32>
    %cst_55 = arith.constant 0.000000e+00 : f32
    %66 = vector.broadcast %cst_55 : f32 to vector<16x128xf32>
    %67 = arith.maximumf %65, %66 : vector<16x128xf32>
    %68 = arith.truncf %67 : vector<16x128xf32> to vector<16x128xbf16>
    %c1_56 = arith.constant 1 : index
    %c0_57 = arith.constant 0 : index
    %c0_58 = arith.constant 0 : index
    %69 = vector.load %arg8[%c1_56, %c0_57, %c0_58] : memref<3x128x128xbf16, #tpu.memory_space<vmem>>, vector<1x128x128xbf16>
    %70 = vector.shape_cast %69 : vector<1x128x128xbf16> to vector<128x128xbf16>
    %cst_59 = arith.constant dense<0.000000e+00> : vector<16x128xf32>
    %71 = tpu.matmul %68, %70, %cst_59 {dimension_numbers = #tpu.dot_dimension_numbers<[1], [0], [0], [1], [0, 0, 1, 1], [], []>} : vector<16x128xbf16>, vector<128x128xbf16>, vector<16x128xf32> -> vector<16x128xf32>
    %c1_60 = arith.constant 1 : index
    %c0_61 = arith.constant 0 : index
    %c0_62 = arith.constant 0 : index
    %72 = vector.load %arg9[%c1_60, %c0_61, %c0_62] : memref<3x1x128xf32, #tpu.memory_space<vmem>>, vector<1x1x128xf32>
    %73 = vector.shape_cast %72 : vector<1x1x128xf32> to vector<1x128xf32>
    %74 = vector.broadcast %73 : vector<1x128xf32> to vector<16x128xf32>
    %75 = arith.addf %71, %74 : vector<16x128xf32>
    %76 = arith.addf %45, %75 : vector<16x128xf32>
    %c8_63 = arith.constant 8 : index
    %c0_64 = arith.constant 0 : index
    %77 = vector.load %arg19[%c8_63, %c0_64] : memref<32x128xf32, #tpu.memory_space<vmem>>, vector<16x128xf32>
    tpu.vector_store %arg19[%c8_63, %c0_64], %76 {strides = array<i32>} : memref<32x128xf32, #tpu.memory_space<vmem>>, vector<16x128xf32>,
    %c8_65 = arith.constant 8 : index
    %c0_66 = arith.constant 0 : index
    %78 = vector.load %arg19[%c8_65, %c0_66] : memref<32x128xf32, #tpu.memory_space<vmem>>, vector<16x128xf32>
    %c4 = arith.constant 4 : index
    %c0_67 = arith.constant 0 : index
    %79 = vector.load %arg19[%c4, %c0_67] : memref<32x128xf32, #tpu.memory_space<vmem>>, vector<16x128xf32>
    %80 = arith.truncf %79 : vector<16x128xf32> to vector<16x128xbf16>
    %c12 = arith.constant 12 : index
    %c0_68 = arith.constant 0 : index
    %81 = vector.load %arg19[%c12, %c0_68] : memref<32x128xf32, #tpu.memory_space<vmem>>, vector<16x128xf32>
    %82 = arith.truncf %81 : vector<16x128xf32> to vector<16x128xbf16>
    %c2 = arith.constant 2 : index
    %c0_69 = arith.constant 0 : index
    %c0_70 = arith.constant 0 : index
    %83 = vector.load %arg4[%c2, %c0_69, %c0_70] : memref<3x128x128xbf16, #tpu.memory_space<vmem>>, vector<1x128x128xbf16>
    %84 = vector.shape_cast %83 : vector<1x128x128xbf16> to vector<128x128xbf16>
    %cst_71 = arith.constant dense<0.000000e+00> : vector<16x128xf32>
    %85 = tpu.matmul %80, %84, %cst_71 {dimension_numbers = #tpu.dot_dimension_numbers<[1], [0], [0], [1], [0, 0, 1, 1], [], []>} : vector<16x128xbf16>, vector<128x128xbf16>, vector<16x128xf32> -> vector<16x128xf32>
    %86 = arith.truncf %78 : vector<16x128xf32> to vector<16x128xbf16>
    %c2_72 = arith.constant 2 : index
    %c0_73 = arith.constant 0 : index
    %c0_74 = arith.constant 0 : index
    %87 = vector.load %arg5[%c2_72, %c0_73, %c0_74] : memref<3x128x128xbf16, #tpu.memory_space<vmem>>, vector<1x128x128xbf16>
    %88 = vector.shape_cast %87 : vector<1x128x128xbf16> to vector<128x128xbf16>
    %cst_75 = arith.constant dense<0.000000e+00> : vector<16x128xf32>
    %89 = tpu.matmul %86, %88, %cst_75 {dimension_numbers = #tpu.dot_dimension_numbers<[1], [0], [0], [1], [0, 0, 1, 1], [], []>} : vector<16x128xbf16>, vector<128x128xbf16>, vector<16x128xf32> -> vector<16x128xf32>
    %90 = arith.addf %85, %89 : vector<16x128xf32>
    %c2_76 = arith.constant 2 : index
    %c0_77 = arith.constant 0 : index
    %c0_78 = arith.constant 0 : index
    %91 = vector.load %arg6[%c2_76, %c0_77, %c0_78] : memref<3x128x128xbf16, #tpu.memory_space<vmem>>, vector<1x128x128xbf16>
    %92 = vector.shape_cast %91 : vector<1x128x128xbf16> to vector<128x128xbf16>
    %cst_79 = arith.constant dense<0.000000e+00> : vector<16x128xf32>
    %93 = tpu.matmul %82, %92, %cst_79 {dimension_numbers = #tpu.dot_dimension_numbers<[1], [0], [0], [1], [0, 0, 1, 1], [], []>} : vector<16x128xbf16>, vector<128x128xbf16>, vector<16x128xf32> -> vector<16x128xf32>
    %94 = arith.addf %90, %93 : vector<16x128xf32>
    %c2_80 = arith.constant 2 : index
    %c0_81 = arith.constant 0 : index
    %c0_82 = arith.constant 0 : index
    %95 = vector.load %arg7[%c2_80, %c0_81, %c0_82] : memref<3x1x128xf32, #tpu.memory_space<vmem>>, vector<1x1x128xf32>
    %96 = vector.shape_cast %95 : vector<1x1x128xf32> to vector<1x128xf32>
    %97 = vector.broadcast %96 : vector<1x128xf32> to vector<16x128xf32>
    %98 = arith.addf %94, %97 : vector<16x128xf32>
    %cst_83 = arith.constant 0.000000e+00 : f32
    %99 = vector.broadcast %cst_83 : f32 to vector<16x128xf32>
    %100 = arith.maximumf %98, %99 : vector<16x128xf32>
    %101 = arith.truncf %100 : vector<16x128xf32> to vector<16x128xbf16>
    %c2_84 = arith.constant 2 : index
    %c0_85 = arith.constant 0 : index
    %c0_86 = arith.constant 0 : index
    %102 = vector.load %arg8[%c2_84, %c0_85, %c0_86] : memref<3x128x128xbf16, #tpu.memory_space<vmem>>, vector<1x128x128xbf16>
    %103 = vector.shape_cast %102 : vector<1x128x128xbf16> to vector<128x128xbf16>
    %cst_87 = arith.constant dense<0.000000e+00> : vector<16x128xf32>
    %104 = tpu.matmul %101, %103, %cst_87 {dimension_numbers = #tpu.dot_dimension_numbers<[1], [0], [0], [1], [0, 0, 1, 1], [], []>} : vector<16x128xbf16>, vector<128x128xbf16>, vector<16x128xf32> -> vector<16x128xf32>
    %c2_88 = arith.constant 2 : index
    %c0_89 = arith.constant 0 : index
    %c0_90 = arith.constant 0 : index
    %105 = vector.load %arg9[%c2_88, %c0_89, %c0_90] : memref<3x1x128xf32, #tpu.memory_space<vmem>>, vector<1x1x128xf32>
    %106 = vector.shape_cast %105 : vector<1x1x128xf32> to vector<1x128xf32>
    %107 = vector.broadcast %106 : vector<1x128xf32> to vector<16x128xf32>
    %108 = arith.addf %104, %107 : vector<16x128xf32>
    %109 = arith.addf %78, %108 : vector<16x128xf32>
    %c8_91 = arith.constant 8 : index
    %c0_92 = arith.constant 0 : index
    %110 = vector.load %arg19[%c8_91, %c0_92] : memref<32x128xf32, #tpu.memory_space<vmem>>, vector<16x128xf32>
    tpu.vector_store %arg19[%c8_91, %c0_92], %109 {strides = array<i32>} : memref<32x128xf32, #tpu.memory_space<vmem>>, vector<16x128xf32>,
    %c8_93 = arith.constant 8 : index
    %c0_94 = arith.constant 0 : index
    %111 = vector.load %arg19[%c8_93, %c0_94] : memref<32x128xf32, #tpu.memory_space<vmem>>, vector<16x128xf32>
    %112 = arith.truncf %111 : vector<16x128xf32> to vector<16x128xbf16>
    %c0_95 = arith.constant 0 : index
    %c0_96 = arith.constant 0 : index
    %113 = vector.load %arg10[%c0_95, %c0_96] : memref<128x384xbf16, #tpu.memory_space<vmem>>, vector<128x384xbf16>
    %cst_97 = arith.constant dense<0.000000e+00> : vector<16x384xf32>
    %114 = tpu.matmul %112, %113, %cst_97 {dimension_numbers = #tpu.dot_dimension_numbers<[1], [0], [0], [1], [0, 0, 1, 1], [], []>} : vector<16x128xbf16>, vector<128x384xbf16>, vector<16x384xf32> -> vector<16x384xf32>
    %c0_98 = arith.constant 0 : index
    %c0_99 = arith.constant 0 : index
    %115 = vector.load %arg11[%c0_98, %c0_99] : memref<1x384xf32, #tpu.memory_space<vmem>>, vector<1x384xf32>
    %116 = vector.broadcast %115 : vector<1x384xf32> to vector<16x384xf32>
    %117 = arith.addf %114, %116 : vector<16x384xf32>
    %118 = arith.truncf %117 : vector<16x384xf32> to vector<16x384xbf16>
    %119 = vector.extract_strided_slice %118 {offsets = [0, 0], sizes = [16, 16], strides = [1, 1]} : vector<16x384xbf16> to vector<16x16xbf16>
    %cst_100 = arith.constant 0xFF800000 : f32
    %120 = vector.broadcast %cst_100 : f32 to vector<16x1xf32>
    %cst_101 = arith.constant 0.000000e+00 : f32
    %121 = vector.broadcast %cst_101 : f32 to vector<16x1xf32>
    %cst_102 = arith.constant 0.000000e+00 : f32
    %122 = vector.broadcast %cst_102 : f32 to vector<16x16xf32>
    %123 = vector.extract_strided_slice %118 {offsets = [0, 128], sizes = [16, 16], strides = [1, 1]} : vector<16x384xbf16> to vector<16x16xbf16>
    %124 = vector.extract_strided_slice %118 {offsets = [0, 256], sizes = [16, 16], strides = [1, 1]} : vector<16x384xbf16> to vector<16x16xbf16>
    %cst_103 = arith.constant dense<0.000000e+00> : vector<16x16xf32>
    %125 = tpu.matmul %119, %123, %cst_103 {dimension_numbers = #tpu.dot_dimension_numbers<[1], [1], [0], [0], [0, 0, 1, 0], [], []>} : vector<16x16xbf16>, vector<16x16xbf16>, vector<16x16xf32> -> vector<16x16xf32>
    %cst_104 = arith.constant dense<0xFF800000> : vector<16xf32>
    %126 = vector.multi_reduction <maximumf>, %125, %cst_104 [1] : vector<16x16xf32> to vector<16xf32>
    %127 = vector.shape_cast %126 : vector<16xf32> to vector<16x1xf32>
    %128 = arith.maximumf %120, %127 : vector<16x1xf32>
    %129 = arith.subf %120, %128 : vector<16x1xf32>
    %130 = math.exp %129 : vector<16x1xf32>
    %131 = vector.broadcast %128 : vector<16x1xf32> to vector<16x16xf32>
    %132 = arith.subf %125, %131 : vector<16x16xf32>
    %133 = math.exp %132 : vector<16x16xf32>
    %134 = arith.mulf %130, %121 : vector<16x1xf32>
    %cst_105 = arith.constant dense<0.000000e+00> : vector<16xf32>
    %135 = vector.multi_reduction <add>, %133, %cst_105 [1] : vector<16x16xf32> to vector<16xf32>
    %136 = vector.shape_cast %135 : vector<16xf32> to vector<16x1xf32>
    %137 = arith.addf %134, %136 : vector<16x1xf32>
    %138 = vector.broadcast %130 : vector<16x1xf32> to vector<16x16xf32>
    %139 = arith.mulf %138, %122 : vector<16x16xf32>
    %140 = arith.truncf %133 : vector<16x16xf32> to vector<16x16xbf16>
    %cst_106 = arith.constant dense<0.000000e+00> : vector<16x16xf32>
    %141 = tpu.matmul %140, %124, %cst_106 {dimension_numbers = #tpu.dot_dimension_numbers<[1], [0], [0], [1], [0, 0, 1, 1], [], []>} : vector<16x16xbf16>, vector<16x16xbf16>, vector<16x16xf32> -> vector<16x16xf32>
    %142 = arith.addf %139, %141 : vector<16x16xf32>
    %143 = tpu.reciprocal %137 {approx = true} : vector<16x1xf32> -> vector<16x1xf32>
    %144 = vector.broadcast %143 : vector<16x1xf32> to vector<16x16xf32>
    %145 = arith.mulf %142, %144 : vector<16x16xf32>
    %146 = arith.truncf %145 : vector<16x16xf32> to vector<16x16xbf16>
    %147 = vector.extract_strided_slice %118 {offsets = [0, 16], sizes = [16, 16], strides = [1, 1]} : vector<16x384xbf16> to vector<16x16xbf16>
    %cst_107 = arith.constant 0xFF800000 : f32
    %148 = vector.broadcast %cst_107 : f32 to vector<16x1xf32>
    %cst_108 = arith.constant 0.000000e+00 : f32
    %149 = vector.broadcast %cst_108 : f32 to vector<16x1xf32>
    %cst_109 = arith.constant 0.000000e+00 : f32
    %150 = vector.broadcast %cst_109 : f32 to vector<16x16xf32>
    %151 = vector.extract_strided_slice %118 {offsets = [0, 144], sizes = [16, 16], strides = [1, 1]} : vector<16x384xbf16> to vector<16x16xbf16>
    %152 = vector.extract_strided_slice %118 {offsets = [0, 272], sizes = [16, 16], strides = [1, 1]} : vector<16x384xbf16> to vector<16x16xbf16>
    %cst_110 = arith.constant dense<0.000000e+00> : vector<16x16xf32>
    %153 = tpu.matmul %147, %151, %cst_110 {dimension_numbers = #tpu.dot_dimension_numbers<[1], [1], [0], [0], [0, 0, 1, 0], [], []>} : vector<16x16xbf16>, vector<16x16xbf16>, vector<16x16xf32> -> vector<16x16xf32>
    %cst_111 = arith.constant dense<0xFF800000> : vector<16xf32>
    %154 = vector.multi_reduction <maximumf>, %153, %cst_111 [1] : vector<16x16xf32> to vector<16xf32>
    %155 = vector.shape_cast %154 : vector<16xf32> to vector<16x1xf32>
    %156 = arith.maximumf %148, %155 : vector<16x1xf32>
    %157 = arith.subf %148, %156 : vector<16x1xf32>
    %158 = math.exp %157 : vector<16x1xf32>
    %159 = vector.broadcast %156 : vector<16x1xf32> to vector<16x16xf32>
    %160 = arith.subf %153, %159 : vector<16x16xf32>
    %161 = math.exp %160 : vector<16x16xf32>
    %162 = arith.mulf %158, %149 : vector<16x1xf32>
    %cst_112 = arith.constant dense<0.000000e+00> : vector<16xf32>
    %163 = vector.multi_reduction <add>, %161, %cst_112 [1] : vector<16x16xf32> to vector<16xf32>
    %164 = vector.shape_cast %163 : vector<16xf32> to vector<16x1xf32>
    %165 = arith.addf %162, %164 : vector<16x1xf32>
    %166 = vector.broadcast %158 : vector<16x1xf32> to vector<16x16xf32>
    %167 = arith.mulf %166, %150 : vector<16x16xf32>
    %168 = arith.truncf %161 : vector<16x16xf32> to vector<16x16xbf16>
    %cst_113 = arith.constant dense<0.000000e+00> : vector<16x16xf32>
    %169 = tpu.matmul %168, %152, %cst_113 {dimension_numbers = #tpu.dot_dimension_numbers<[1], [0], [0], [1], [0, 0, 1, 1], [], []>} : vector<16x16xbf16>, vector<16x16xbf16>, vector<16x16xf32> -> vector<16x16xf32>
    %170 = arith.addf %167, %169 : vector<16x16xf32>
    %171 = tpu.reciprocal %165 {approx = true} : vector<16x1xf32> -> vector<16x1xf32>
    %172 = vector.broadcast %171 : vector<16x1xf32> to vector<16x16xf32>
    %173 = arith.mulf %170, %172 : vector<16x16xf32>
    %174 = arith.truncf %173 : vector<16x16xf32> to vector<16x16xbf16>
    %175 = vector.extract_strided_slice %118 {offsets = [0, 32], sizes = [16, 16], strides = [1, 1]} : vector<16x384xbf16> to vector<16x16xbf16>
    %cst_114 = arith.constant 0xFF800000 : f32
    %176 = vector.broadcast %cst_114 : f32 to vector<16x1xf32>
    %cst_115 = arith.constant 0.000000e+00 : f32
    %177 = vector.broadcast %cst_115 : f32 to vector<16x1xf32>
    %cst_116 = arith.constant 0.000000e+00 : f32
    %178 = vector.broadcast %cst_116 : f32 to vector<16x16xf32>
    %179 = vector.extract_strided_slice %118 {offsets = [0, 160], sizes = [16, 16], strides = [1, 1]} : vector<16x384xbf16> to vector<16x16xbf16>
    %180 = vector.extract_strided_slice %118 {offsets = [0, 288], sizes = [16, 16], strides = [1, 1]} : vector<16x384xbf16> to vector<16x16xbf16>
    %cst_117 = arith.constant dense<0.000000e+00> : vector<16x16xf32>
    %181 = tpu.matmul %175, %179, %cst_117 {dimension_numbers = #tpu.dot_dimension_numbers<[1], [1], [0], [0], [0, 0, 1, 0], [], []>} : vector<16x16xbf16>, vector<16x16xbf16>, vector<16x16xf32> -> vector<16x16xf32>
    %cst_118 = arith.constant dense<0xFF800000> : vector<16xf32>
    %182 = vector.multi_reduction <maximumf>, %181, %cst_118 [1] : vector<16x16xf32> to vector<16xf32>
    %183 = vector.shape_cast %182 : vector<16xf32> to vector<16x1xf32>
    %184 = arith.maximumf %176, %183 : vector<16x1xf32>
    %185 = arith.subf %176, %184 : vector<16x1xf32>
    %186 = math.exp %185 : vector<16x1xf32>
    %187 = vector.broadcast %184 : vector<16x1xf32> to vector<16x16xf32>
    %188 = arith.subf %181, %187 : vector<16x16xf32>
    %189 = math.exp %188 : vector<16x16xf32>
    %190 = arith.mulf %186, %177 : vector<16x1xf32>
    %cst_119 = arith.constant dense<0.000000e+00> : vector<16xf32>
    %191 = vector.multi_reduction <add>, %189, %cst_119 [1] : vector<16x16xf32> to vector<16xf32>
    %192 = vector.shape_cast %191 : vector<16xf32> to vector<16x1xf32>
    %193 = arith.addf %190, %192 : vector<16x1xf32>
    %194 = vector.broadcast %186 : vector<16x1xf32> to vector<16x16xf32>
    %195 = arith.mulf %194, %178 : vector<16x16xf32>
    %196 = arith.truncf %189 : vector<16x16xf32> to vector<16x16xbf16>
    %cst_120 = arith.constant dense<0.000000e+00> : vector<16x16xf32>
    %197 = tpu.matmul %196, %180, %cst_120 {dimension_numbers = #tpu.dot_dimension_numbers<[1], [0], [0], [1], [0, 0, 1, 1], [], []>} : vector<16x16xbf16>, vector<16x16xbf16>, vector<16x16xf32> -> vector<16x16xf32>
    %198 = arith.addf %195, %197 : vector<16x16xf32>
    %199 = tpu.reciprocal %193 {approx = true} : vector<16x1xf32> -> vector<16x1xf32>
    %200 = vector.broadcast %199 : vector<16x1xf32> to vector<16x16xf32>
    %201 = arith.mulf %198, %200 : vector<16x16xf32>
    %202 = arith.truncf %201 : vector<16x16xf32> to vector<16x16xbf16>
    %203 = vector.extract_strided_slice %118 {offsets = [0, 48], sizes = [16, 16], strides = [1, 1]} : vector<16x384xbf16> to vector<16x16xbf16>
    %cst_121 = arith.constant 0xFF800000 : f32
    %204 = vector.broadcast %cst_121 : f32 to vector<16x1xf32>
    %cst_122 = arith.constant 0.000000e+00 : f32
    %205 = vector.broadcast %cst_122 : f32 to vector<16x1xf32>
    %cst_123 = arith.constant 0.000000e+00 : f32
    %206 = vector.broadcast %cst_123 : f32 to vector<16x16xf32>
    %207 = vector.extract_strided_slice %118 {offsets = [0, 176], sizes = [16, 16], strides = [1, 1]} : vector<16x384xbf16> to vector<16x16xbf16>
    %208 = vector.extract_strided_slice %118 {offsets = [0, 304], sizes = [16, 16], strides = [1, 1]} : vector<16x384xbf16> to vector<16x16xbf16>
    %cst_124 = arith.constant dense<0.000000e+00> : vector<16x16xf32>
    %209 = tpu.matmul %203, %207, %cst_124 {dimension_numbers = #tpu.dot_dimension_numbers<[1], [1], [0], [0], [0, 0, 1, 0], [], []>} : vector<16x16xbf16>, vector<16x16xbf16>, vector<16x16xf32> -> vector<16x16xf32>
    %cst_125 = arith.constant dense<0xFF800000> : vector<16xf32>
    %210 = vector.multi_reduction <maximumf>, %209, %cst_125 [1] : vector<16x16xf32> to vector<16xf32>
    %211 = vector.shape_cast %210 : vector<16xf32> to vector<16x1xf32>
    %212 = arith.maximumf %204, %211 : vector<16x1xf32>
    %213 = arith.subf %204, %212 : vector<16x1xf32>
    %214 = math.exp %213 : vector<16x1xf32>
    %215 = vector.broadcast %212 : vector<16x1xf32> to vector<16x16xf32>
    %216 = arith.subf %209, %215 : vector<16x16xf32>
    %217 = math.exp %216 : vector<16x16xf32>
    %218 = arith.mulf %214, %205 : vector<16x1xf32>
    %cst_126 = arith.constant dense<0.000000e+00> : vector<16xf32>
    %219 = vector.multi_reduction <add>, %217, %cst_126 [1] : vector<16x16xf32> to vector<16xf32>
    %220 = vector.shape_cast %219 : vector<16xf32> to vector<16x1xf32>
    %221 = arith.addf %218, %220 : vector<16x1xf32>
    %222 = vector.broadcast %214 : vector<16x1xf32> to vector<16x16xf32>
    %223 = arith.mulf %222, %206 : vector<16x16xf32>
    %224 = arith.truncf %217 : vector<16x16xf32> to vector<16x16xbf16>
    %cst_127 = arith.constant dense<0.000000e+00> : vector<16x16xf32>
    %225 = tpu.matmul %224, %208, %cst_127 {dimension_numbers = #tpu.dot_dimension_numbers<[1], [0], [0], [1], [0, 0, 1, 1], [], []>} : vector<16x16xbf16>, vector<16x16xbf16>, vector<16x16xf32> -> vector<16x16xf32>
    %226 = arith.addf %223, %225 : vector<16x16xf32>
    %227 = tpu.reciprocal %221 {approx = true} : vector<16x1xf32> -> vector<16x1xf32>
    %228 = vector.broadcast %227 : vector<16x1xf32> to vector<16x16xf32>
    %229 = arith.mulf %226, %228 : vector<16x16xf32>
    %230 = arith.truncf %229 : vector<16x16xf32> to vector<16x16xbf16>
    %231 = vector.extract_strided_slice %118 {offsets = [0, 64], sizes = [16, 16], strides = [1, 1]} : vector<16x384xbf16> to vector<16x16xbf16>
    %cst_128 = arith.constant 0xFF800000 : f32
    %232 = vector.broadcast %cst_128 : f32 to vector<16x1xf32>
    %cst_129 = arith.constant 0.000000e+00 : f32
    %233 = vector.broadcast %cst_129 : f32 to vector<16x1xf32>
    %cst_130 = arith.constant 0.000000e+00 : f32
    %234 = vector.broadcast %cst_130 : f32 to vector<16x16xf32>
    %235 = vector.extract_strided_slice %118 {offsets = [0, 192], sizes = [16, 16], strides = [1, 1]} : vector<16x384xbf16> to vector<16x16xbf16>
    %236 = vector.extract_strided_slice %118 {offsets = [0, 320], sizes = [16, 16], strides = [1, 1]} : vector<16x384xbf16> to vector<16x16xbf16>
    %cst_131 = arith.constant dense<0.000000e+00> : vector<16x16xf32>
    %237 = tpu.matmul %231, %235, %cst_131 {dimension_numbers = #tpu.dot_dimension_numbers<[1], [1], [0], [0], [0, 0, 1, 0], [], []>} : vector<16x16xbf16>, vector<16x16xbf16>, vector<16x16xf32> -> vector<16x16xf32>
    %cst_132 = arith.constant dense<0xFF800000> : vector<16xf32>
    %238 = vector.multi_reduction <maximumf>, %237, %cst_132 [1] : vector<16x16xf32> to vector<16xf32>
    %239 = vector.shape_cast %238 : vector<16xf32> to vector<16x1xf32>
    %240 = arith.maximumf %232, %239 : vector<16x1xf32>
    %241 = arith.subf %232, %240 : vector<16x1xf32>
    %242 = math.exp %241 : vector<16x1xf32>
    %243 = vector.broadcast %240 : vector<16x1xf32> to vector<16x16xf32>
    %244 = arith.subf %237, %243 : vector<16x16xf32>
    %245 = math.exp %244 : vector<16x16xf32>
    %246 = arith.mulf %242, %233 : vector<16x1xf32>
    %cst_133 = arith.constant dense<0.000000e+00> : vector<16xf32>
    %247 = vector.multi_reduction <add>, %245, %cst_133 [1] : vector<16x16xf32> to vector<16xf32>
    %248 = vector.shape_cast %247 : vector<16xf32> to vector<16x1xf32>
    %249 = arith.addf %246, %248 : vector<16x1xf32>
    %250 = vector.broadcast %242 : vector<16x1xf32> to vector<16x16xf32>
    %251 = arith.mulf %250, %234 : vector<16x16xf32>
    %252 = arith.truncf %245 : vector<16x16xf32> to vector<16x16xbf16>
    %cst_134 = arith.constant dense<0.000000e+00> : vector<16x16xf32>
    %253 = tpu.matmul %252, %236, %cst_134 {dimension_numbers = #tpu.dot_dimension_numbers<[1], [0], [0], [1], [0, 0, 1, 1], [], []>} : vector<16x16xbf16>, vector<16x16xbf16>, vector<16x16xf32> -> vector<16x16xf32>
    %254 = arith.addf %251, %253 : vector<16x16xf32>
    %255 = tpu.reciprocal %249 {approx = true} : vector<16x1xf32> -> vector<16x1xf32>
    %256 = vector.broadcast %255 : vector<16x1xf32> to vector<16x16xf32>
    %257 = arith.mulf %254, %256 : vector<16x16xf32>
    %258 = arith.truncf %257 : vector<16x16xf32> to vector<16x16xbf16>
    %259 = vector.extract_strided_slice %118 {offsets = [0, 80], sizes = [16, 16], strides = [1, 1]} : vector<16x384xbf16> to vector<16x16xbf16>
    %cst_135 = arith.constant 0xFF800000 : f32
    %260 = vector.broadcast %cst_135 : f32 to vector<16x1xf32>
    %cst_136 = arith.constant 0.000000e+00 : f32
    %261 = vector.broadcast %cst_136 : f32 to vector<16x1xf32>
    %cst_137 = arith.constant 0.000000e+00 : f32
    %262 = vector.broadcast %cst_137 : f32 to vector<16x16xf32>
    %263 = vector.extract_strided_slice %118 {offsets = [0, 208], sizes = [16, 16], strides = [1, 1]} : vector<16x384xbf16> to vector<16x16xbf16>
    %264 = vector.extract_strided_slice %118 {offsets = [0, 336], sizes = [16, 16], strides = [1, 1]} : vector<16x384xbf16> to vector<16x16xbf16>
    %cst_138 = arith.constant dense<0.000000e+00> : vector<16x16xf32>
    %265 = tpu.matmul %259, %263, %cst_138 {dimension_numbers = #tpu.dot_dimension_numbers<[1], [1], [0], [0], [0, 0, 1, 0], [], []>} : vector<16x16xbf16>, vector<16x16xbf16>, vector<16x16xf32> -> vector<16x16xf32>
    %cst_139 = arith.constant dense<0xFF800000> : vector<16xf32>
    %266 = vector.multi_reduction <maximumf>, %265, %cst_139 [1] : vector<16x16xf32> to vector<16xf32>
    %267 = vector.shape_cast %266 : vector<16xf32> to vector<16x1xf32>
    %268 = arith.maximumf %260, %267 : vector<16x1xf32>
    %269 = arith.subf %260, %268 : vector<16x1xf32>
    %270 = math.exp %269 : vector<16x1xf32>
    %271 = vector.broadcast %268 : vector<16x1xf32> to vector<16x16xf32>
    %272 = arith.subf %265, %271 : vector<16x16xf32>
    %273 = math.exp %272 : vector<16x16xf32>
    %274 = arith.mulf %270, %261 : vector<16x1xf32>
    %cst_140 = arith.constant dense<0.000000e+00> : vector<16xf32>
    %275 = vector.multi_reduction <add>, %273, %cst_140 [1] : vector<16x16xf32> to vector<16xf32>
    %276 = vector.shape_cast %275 : vector<16xf32> to vector<16x1xf32>
    %277 = arith.addf %274, %276 : vector<16x1xf32>
    %278 = vector.broadcast %270 : vector<16x1xf32> to vector<16x16xf32>
    %279 = arith.mulf %278, %262 : vector<16x16xf32>
    %280 = arith.truncf %273 : vector<16x16xf32> to vector<16x16xbf16>
    %cst_141 = arith.constant dense<0.000000e+00> : vector<16x16xf32>
    %281 = tpu.matmul %280, %264, %cst_141 {dimension_numbers = #tpu.dot_dimension_numbers<[1], [0], [0], [1], [0, 0, 1, 1], [], []>} : vector<16x16xbf16>, vector<16x16xbf16>, vector<16x16xf32> -> vector<16x16xf32>
    %282 = arith.addf %279, %281 : vector<16x16xf32>
    %283 = tpu.reciprocal %277 {approx = true} : vector<16x1xf32> -> vector<16x1xf32>
    %284 = vector.broadcast %283 : vector<16x1xf32> to vector<16x16xf32>
    %285 = arith.mulf %282, %284 : vector<16x16xf32>
    %286 = arith.truncf %285 : vector<16x16xf32> to vector<16x16xbf16>
    %287 = vector.extract_strided_slice %118 {offsets = [0, 96], sizes = [16, 16], strides = [1, 1]} : vector<16x384xbf16> to vector<16x16xbf16>
    %cst_142 = arith.constant 0xFF800000 : f32
    %288 = vector.broadcast %cst_142 : f32 to vector<16x1xf32>
    %cst_143 = arith.constant 0.000000e+00 : f32
    %289 = vector.broadcast %cst_143 : f32 to vector<16x1xf32>
    %cst_144 = arith.constant 0.000000e+00 : f32
    %290 = vector.broadcast %cst_144 : f32 to vector<16x16xf32>
    %291 = vector.extract_strided_slice %118 {offsets = [0, 224], sizes = [16, 16], strides = [1, 1]} : vector<16x384xbf16> to vector<16x16xbf16>
    %292 = vector.extract_strided_slice %118 {offsets = [0, 352], sizes = [16, 16], strides = [1, 1]} : vector<16x384xbf16> to vector<16x16xbf16>
    %cst_145 = arith.constant dense<0.000000e+00> : vector<16x16xf32>
    %293 = tpu.matmul %287, %291, %cst_145 {dimension_numbers = #tpu.dot_dimension_numbers<[1], [1], [0], [0], [0, 0, 1, 0], [], []>} : vector<16x16xbf16>, vector<16x16xbf16>, vector<16x16xf32> -> vector<16x16xf32>
    %cst_146 = arith.constant dense<0xFF800000> : vector<16xf32>
    %294 = vector.multi_reduction <maximumf>, %293, %cst_146 [1] : vector<16x16xf32> to vector<16xf32>
    %295 = vector.shape_cast %294 : vector<16xf32> to vector<16x1xf32>
    %296 = arith.maximumf %288, %295 : vector<16x1xf32>
    %297 = arith.subf %288, %296 : vector<16x1xf32>
    %298 = math.exp %297 : vector<16x1xf32>
    %299 = vector.broadcast %296 : vector<16x1xf32> to vector<16x16xf32>
    %300 = arith.subf %293, %299 : vector<16x16xf32>
    %301 = math.exp %300 : vector<16x16xf32>
    %302 = arith.mulf %298, %289 : vector<16x1xf32>
    %cst_147 = arith.constant dense<0.000000e+00> : vector<16xf32>
    %303 = vector.multi_reduction <add>, %301, %cst_147 [1] : vector<16x16xf32> to vector<16xf32>
    %304 = vector.shape_cast %303 : vector<16xf32> to vector<16x1xf32>
    %305 = arith.addf %302, %304 : vector<16x1xf32>
    %306 = vector.broadcast %298 : vector<16x1xf32> to vector<16x16xf32>
    %307 = arith.mulf %306, %290 : vector<16x16xf32>
    %308 = arith.truncf %301 : vector<16x16xf32> to vector<16x16xbf16>
    %cst_148 = arith.constant dense<0.000000e+00> : vector<16x16xf32>
    %309 = tpu.matmul %308, %292, %cst_148 {dimension_numbers = #tpu.dot_dimension_numbers<[1], [0], [0], [1], [0, 0, 1, 1], [], []>} : vector<16x16xbf16>, vector<16x16xbf16>, vector<16x16xf32> -> vector<16x16xf32>
    %310 = arith.addf %307, %309 : vector<16x16xf32>
    %311 = tpu.reciprocal %305 {approx = true} : vector<16x1xf32> -> vector<16x1xf32>
    %312 = vector.broadcast %311 : vector<16x1xf32> to vector<16x16xf32>
    %313 = arith.mulf %310, %312 : vector<16x16xf32>
    %314 = arith.truncf %313 : vector<16x16xf32> to vector<16x16xbf16>
    %315 = vector.extract_strided_slice %118 {offsets = [0, 112], sizes = [16, 16], strides = [1, 1]} : vector<16x384xbf16> to vector<16x16xbf16>
    %cst_149 = arith.constant 0xFF800000 : f32
    %316 = vector.broadcast %cst_149 : f32 to vector<16x1xf32>
    %cst_150 = arith.constant 0.000000e+00 : f32
    %317 = vector.broadcast %cst_150 : f32 to vector<16x1xf32>
    %cst_151 = arith.constant 0.000000e+00 : f32
    %318 = vector.broadcast %cst_151 : f32 to vector<16x16xf32>
    %319 = vector.extract_strided_slice %118 {offsets = [0, 240], sizes = [16, 16], strides = [1, 1]} : vector<16x384xbf16> to vector<16x16xbf16>
    %320 = vector.extract_strided_slice %118 {offsets = [0, 368], sizes = [16, 16], strides = [1, 1]} : vector<16x384xbf16> to vector<16x16xbf16>
    %cst_152 = arith.constant dense<0.000000e+00> : vector<16x16xf32>
    %321 = tpu.matmul %315, %319, %cst_152 {dimension_numbers = #tpu.dot_dimension_numbers<[1], [1], [0], [0], [0, 0, 1, 0], [], []>} : vector<16x16xbf16>, vector<16x16xbf16>, vector<16x16xf32> -> vector<16x16xf32>
    %cst_153 = arith.constant dense<0xFF800000> : vector<16xf32>
    %322 = vector.multi_reduction <maximumf>, %321, %cst_153 [1] : vector<16x16xf32> to vector<16xf32>
    %323 = vector.shape_cast %322 : vector<16xf32> to vector<16x1xf32>
    %324 = arith.maximumf %316, %323 : vector<16x1xf32>
    %325 = arith.subf %316, %324 : vector<16x1xf32>
    %326 = math.exp %325 : vector<16x1xf32>
    %327 = vector.broadcast %324 : vector<16x1xf32> to vector<16x16xf32>
    %328 = arith.subf %321, %327 : vector<16x16xf32>
    %329 = math.exp %328 : vector<16x16xf32>
    %330 = arith.mulf %326, %317 : vector<16x1xf32>
    %cst_154 = arith.constant dense<0.000000e+00> : vector<16xf32>
    %331 = vector.multi_reduction <add>, %329, %cst_154 [1] : vector<16x16xf32> to vector<16xf32>
    %332 = vector.shape_cast %331 : vector<16xf32> to vector<16x1xf32>
    %333 = arith.addf %330, %332 : vector<16x1xf32>
    %334 = vector.broadcast %326 : vector<16x1xf32> to vector<16x16xf32>
    %335 = arith.mulf %334, %318 : vector<16x16xf32>
    %336 = arith.truncf %329 : vector<16x16xf32> to vector<16x16xbf16>
    %cst_155 = arith.constant dense<0.000000e+00> : vector<16x16xf32>
    %337 = tpu.matmul %336, %320, %cst_155 {dimension_numbers = #tpu.dot_dimension_numbers<[1], [0], [0], [1], [0, 0, 1, 1], [], []>} : vector<16x16xbf16>, vector<16x16xbf16>, vector<16x16xf32> -> vector<16x16xf32>
    %338 = arith.addf %335, %337 : vector<16x16xf32>
    %339 = tpu.reciprocal %333 {approx = true} : vector<16x1xf32> -> vector<16x1xf32>
    %340 = vector.broadcast %339 : vector<16x1xf32> to vector<16x16xf32>
    %341 = arith.mulf %338, %340 : vector<16x16xf32>
    %342 = arith.truncf %341 : vector<16x16xf32> to vector<16x16xbf16>
    %343 = tpu.concatenate %146, %174, %202, %230, %258, %286, %314, %342 in 1 : vector<16x16xbf16>, vector<16x16xbf16>, vector<16x16xbf16>, vector<16x16xbf16>, vector<16x16xbf16>, vector<16x16xbf16>, vector<16x16xbf16>, vector<16x16xbf16> -> vector<16x128xbf16>
    %c0_156 = arith.constant 0 : index
    %c0_157 = arith.constant 0 : index
    %344 = vector.load %arg12[%c0_156, %c0_157] : memref<128x128xbf16, #tpu.memory_space<vmem>>, vector<128x128xbf16>
    %cst_158 = arith.constant dense<0.000000e+00> : vector<16x128xf32>
    %345 = tpu.matmul %343, %344, %cst_158 {dimension_numbers = #tpu.dot_dimension_numbers<[1], [0], [0], [1], [0, 0, 1, 1], [], []>} : vector<16x128xbf16>, vector<128x128xbf16>, vector<16x128xf32> -> vector<16x128xf32>
    %c0_159 = arith.constant 0 : index
    %c0_160 = arith.constant 0 : index
    %346 = vector.load %arg13[%c0_159, %c0_160] : memref<1x128xf32, #tpu.memory_space<vmem>>, vector<1x128xf32>
    %347 = vector.broadcast %346 : vector<1x128xf32> to vector<16x128xf32>
    %348 = arith.addf %345, %347 : vector<16x128xf32>
    %cst_161 = arith.constant dense<0.000000e+00> : vector<16xf32>
    %349 = vector.multi_reduction <add>, %348, %cst_161 [1] : vector<16x128xf32> to vector<16xf32>
    %350 = vector.shape_cast %349 : vector<16xf32> to vector<16x1xf32>
    %cst_162 = arith.constant 1.280000e+02 : f32
    %351 = vector.broadcast %cst_162 : f32 to vector<16x1xf32>
    %352 = arith.divf %350, %351 : vector<16x1xf32>
    %353 = vector.broadcast %352 : vector<16x1xf32> to vector<16x128xf32>
    %354 = arith.subf %348, %353 : vector<16x128xf32>
    %355 = arith.mulf %354, %354 : vector<16x128xf32>
    %cst_163 = arith.constant dense<0.000000e+00> : vector<16xf32>
    %356 = vector.multi_reduction <add>, %355, %cst_163 [1] : vector<16x128xf32> to vector<16xf32>
    %357 = vector.shape_cast %356 : vector<16xf32> to vector<16x1xf32>
    %cst_164 = arith.constant 1.280000e+02 : f32
    %358 = vector.broadcast %cst_164 : f32 to vector<16x1xf32>
    %359 = arith.divf %357, %358 : vector<16x1xf32>
    %cst_165 = arith.constant 9.99999974E-6 : f32
    %360 = vector.broadcast %cst_165 : f32 to vector<16x1xf32>
    %361 = arith.addf %359, %360 : vector<16x1xf32>
    %362 = math.rsqrt %361 : vector<16x1xf32>
    %363 = vector.broadcast %362 : vector<16x1xf32> to vector<16x128xf32>
    %364 = arith.mulf %354, %363 : vector<16x128xf32>
    %c0_166 = arith.constant 0 : index
    %c0_167 = arith.constant 0 : index
    %365 = vector.load %arg14[%c0_166, %c0_167] : memref<1x128xf32, #tpu.memory_space<vmem>>, vector<1x128xf32>
    %366 = vector.broadcast %365 : vector<1x128xf32> to vector<16x128xf32>
    %367 = arith.mulf %364, %366 : vector<16x128xf32>
    %c0_168 = arith.constant 0 : index
    %c0_169 = arith.constant 0 : index
    %368 = vector.load %arg15[%c0_168, %c0_169] : memref<1x128xf32, #tpu.memory_space<vmem>>, vector<1x128xf32>
    %369 = vector.broadcast %368 : vector<1x128xf32> to vector<16x128xf32>
    %370 = arith.addf %367, %369 : vector<16x128xf32>
    %371 = arith.addf %370, %111 : vector<16x128xf32>
    %c0_170 = arith.constant 0 : index
    %c0_171 = arith.constant 0 : index
    %372 = vector.load %arg16[%c0_170, %c0_171] : memref<8x128xbf16, #tpu.memory_space<vmem>>, vector<8x128xbf16>
    %373 = arith.truncf %371 : vector<16x128xf32> to vector<16x128xbf16>
    %cst_172 = arith.constant dense<0.000000e+00> : vector<8x16xf32>
    %374 = tpu.matmul %372, %373, %cst_172 {dimension_numbers = #tpu.dot_dimension_numbers<[1], [1], [0], [0], [0, 0, 1, 0], [], []>} : vector<8x128xbf16>, vector<16x128xbf16>, vector<8x16xf32> -> vector<8x16xf32>
    %c0_173 = arith.constant 0 : index
    %c0_174 = arith.constant 0 : index
    %375 = vector.load %arg17[%c0_173, %c0_174] : memref<8x1xf32, #tpu.memory_space<vmem>>, vector<8x1xf32>
    %376 = vector.broadcast %375 : vector<8x1xf32> to vector<8x16xf32>
    %377 = arith.addf %374, %376 : vector<8x16xf32>
    %c0_175 = arith.constant 0 : index
    %c0_176 = arith.constant 0 : index
    %c0_177 = arith.constant 0 : index
    %378 = vector.load %arg18[%c0_175, %c0_176, %c0_177] : memref<1x8x16xf32, #tpu.memory_space<vmem>>, vector<1x8x16xf32>
    %379 = vector.shape_cast %378 : vector<1x8x16xf32> to vector<8x16xf32>
    %380 = vector.shape_cast %377 : vector<8x16xf32> to vector<1x8x16xf32>
    tpu.vector_store %arg18[%c0_175, %c0_176, %c0_177], %380 {strides = array<i32>} : memref<1x8x16xf32, #tpu.memory_space<vmem>>, vector<1x8x16xf32>,
    return
  }
  func.func @transform_0(%arg0: i32) -> (i32, i32, i32) {
    %c0_i32 = arith.constant 0 : i32
    %c0_i32_0 = arith.constant 0 : i32
    %c0_i32_1 = arith.constant 0 : i32
    return %arg0, %c0_i32, %c0_i32_0 : i32, i32, i32
  }
  func.func @transform_1(%arg0: i32) -> (i32, i32) {
    %c0_i32 = arith.constant 0 : i32
    %c0_i32_0 = arith.constant 0 : i32
    %c0_i32_1 = arith.constant 0 : i32
    return %c0_i32, %c0_i32_0 : i32, i32
  }
  func.func @transform_2(%arg0: i32) -> (i32, i32) {
    %c0_i32 = arith.constant 0 : i32
    %c0_i32_0 = arith.constant 0 : i32
    %c0_i32_1 = arith.constant 0 : i32
    return %c0_i32, %c0_i32_0 : i32, i32
  }
  func.func @transform_3(%arg0: i32) -> (i32, i32, i32) {
    %c0_i32 = arith.constant 0 : i32
    %c0_i32_0 = arith.constant 0 : i32
    %c0_i32_1 = arith.constant 0 : i32
    %c0_i32_2 = arith.constant 0 : i32
    return %c0_i32, %c0_i32_0, %c0_i32_1 : i32, i32, i32
  }
  func.func @transform_4(%arg0: i32) -> (i32, i32, i32) {
    %c0_i32 = arith.constant 0 : i32
    %c0_i32_0 = arith.constant 0 : i32
    %c0_i32_1 = arith.constant 0 : i32
    %c0_i32_2 = arith.constant 0 : i32
    return %c0_i32, %c0_i32_0, %c0_i32_1 : i32, i32, i32
  }
  func.func @transform_5(%arg0: i32) -> (i32, i32, i32) {
    %c0_i32 = arith.constant 0 : i32
    %c0_i32_0 = arith.constant 0 : i32
    %c0_i32_1 = arith.constant 0 : i32
    %c0_i32_2 = arith.constant 0 : i32
    return %c0_i32, %c0_i32_0, %c0_i32_1 : i32, i32, i32
  }
  func.func @transform_6(%arg0: i32) -> (i32, i32, i32) {
    %c0_i32 = arith.constant 0 : i32
    %c0_i32_0 = arith.constant 0 : i32
    %c0_i32_1 = arith.constant 0 : i32
    %c0_i32_2 = arith.constant 0 : i32
    return %c0_i32, %c0_i32_0, %c0_i32_1 : i32, i32, i32
  }
  func.func @transform_7(%arg0: i32) -> (i32, i32, i32) {
    %c0_i32 = arith.constant 0 : i32
    %c0_i32_0 = arith.constant 0 : i32
    %c0_i32_1 = arith.constant 0 : i32
    %c0_i32_2 = arith.constant 0 : i32
    return %c0_i32, %c0_i32_0, %c0_i32_1 : i32, i32, i32
  }
  func.func @transform_8(%arg0: i32) -> (i32, i32, i32) {
    %c0_i32 = arith.constant 0 : i32
    %c0_i32_0 = arith.constant 0 : i32
    %c0_i32_1 = arith.constant 0 : i32
    %c0_i32_2 = arith.constant 0 : i32
    return %c0_i32, %c0_i32_0, %c0_i32_1 : i32, i32, i32
  }
  func.func @transform_9(%arg0: i32) -> (i32, i32) {
    %c0_i32 = arith.constant 0 : i32
    %c0_i32_0 = arith.constant 0 : i32
    %c0_i32_1 = arith.constant 0 : i32
    return %c0_i32, %c0_i32_0 : i32, i32
  }
  func.func @transform_10(%arg0: i32) -> (i32, i32) {
    %c0_i32 = arith.constant 0 : i32
    %c0_i32_0 = arith.constant 0 : i32
    %c0_i32_1 = arith.constant 0 : i32
    return %c0_i32, %c0_i32_0 : i32, i32
  }
  func.func @transform_11(%arg0: i32) -> (i32, i32) {
    %c0_i32 = arith.constant 0 : i32
    %c0_i32_0 = arith.constant 0 : i32
    %c0_i32_1 = arith.constant 0 : i32
    return %c0_i32, %c0_i32_0 : i32, i32
  }
  func.func @transform_12(%arg0: i32) -> (i32, i32) {
    %c0_i32 = arith.constant 0 : i32
    %c0_i32_0 = arith.constant 0 : i32
    %c0_i32_1 = arith.constant 0 : i32
    return %c0_i32, %c0_i32_0 : i32, i32
  }
  func.func @transform_13(%arg0: i32) -> (i32, i32) {
    %c0_i32 = arith.constant 0 : i32
    %c0_i32_0 = arith.constant 0 : i32
    %c0_i32_1 = arith.constant 0 : i32
    return %c0_i32, %c0_i32_0 : i32, i32
  }
  func.func @transform_14(%arg0: i32) -> (i32, i32) {
    %c0_i32 = arith.constant 0 : i32
    %c0_i32_0 = arith.constant 0 : i32
    %c0_i32_1 = arith.constant 0 : i32
    return %c0_i32, %c0_i32_0 : i32, i32
  }
  func.func @transform_15(%arg0: i32) -> (i32, i32) {
    %c0_i32 = arith.constant 0 : i32
    %c0_i32_0 = arith.constant 0 : i32
    %c0_i32_1 = arith.constant 0 : i32
    return %c0_i32, %c0_i32_0 : i32, i32
  }
  func.func @transform_16(%arg0: i32) -> (i32, i32) {
    %c0_i32 = arith.constant 0 : i32
    %c0_i32_0 = arith.constant 0 : i32
    %c0_i32_1 = arith.constant 0 : i32
    return %c0_i32, %c0_i32_0 : i32, i32
  }
  func.func @transform_17(%arg0: i32) -> (i32, i32, i32) {
    %c0_i32 = arith.constant 0 : i32
    %c0_i32_0 = arith.constant 0 : i32
    %c0_i32_1 = arith.constant 0 : i32
    return %arg0, %c0_i32, %c0_i32_0 : i32, i32, i32
  }
}

</mosaic_0001>

<bundles_post_ra>
// kernel: tpu_custom_call.1
= control target key start
LH: loop header
LB: loop body
LE: loop exit
PB: predicated region body
PF: predicated region fallthrough
CT: control target
= control target key end

     0   :  { %s6000_s0 = inlined_call_operand.vmem [shape: f32[2,16,4], index: 0, kind: input, shape index: {}]   ;;  %s6001_s1 = inlined_call_operand.vmem [shape: bf16[4,128], index: 1, kind: input, shape index: {}]   ;;  %s6002_s2 = inlined_call_operand.vmem [shape: f32[1,128], index: 2, kind: input, shape index: {}]   ;;  %s6003_s3 = inlined_call_operand.hbm [shape: bf16[3,128,128], index: 3, kind: input, shape index: {}]   ;;  %s6004_s4 = inlined_call_operand.hbm [shape: bf16[3,128,128], index: 4, kind: input, shape index: {}]   ;;  %s6005_s5 = inlined_call_operand.hbm [shape: bf16[3,128,128], index: 5, kind: input, shape index: {}]   ;;  %s6006_s6 = inlined_call_operand.vmem [shape: f32[3,1,128], index: 6, kind: input, shape index: {}]   ;;  %s6007_s7 = inlined_call_operand.hbm [shape: bf16[3,128,128], index: 7, kind: input, shape index: {}]   ;;  %s6008_s8 = inlined_call_operand.vmem [shape: f32[3,1,128], index: 8, kind: input, shape index: {}]   ;;  %s6009_s9 = inlined_call_operand.hbm [shape: bf16[128,384], index: 9, kind: input, shape index: {}]   ;;  %s6010_s10 = inlined_call_operand.vmem [shape: f32[1,384], index: 10, kind: input, shape index: {}]   ;;  %s6011_s11 = inlined_call_operand.vmem [shape: bf16[128,128], index: 11, kind: input, shape index: {}]   ;;  %s6012_s12 = inlined_call_operand.vmem [shape: f32[1,128], index: 12, kind: input, shape index: {}]   ;;  %s6013_s13 = inlined_call_operand.vmem [shape: f32[1,128], index: 13, kind: input, shape index: {}]   ;;  %s6014_s14 = inlined_call_operand.vmem [shape: f32[1,128], index: 14, kind: input, shape index: {}]   ;;  %s6015_s15 = inlined_call_operand.vmem [shape: bf16[8,128], index: 15, kind: input, shape index: {}]   ;;  %s6016_s16 = inlined_call_operand.vmem [shape: f32[8,1], index: 16, kind: input, shape index: {}]   ;;  %s6017_s17 = inlined_call_operand.hbm [shape: f32[2,8,16], index: 17, kind: output, shape index: {}]  }
   0x1   :  { %6030 = sst [smem:[#allocation24_spill]] %s6000_s0 }
   0x2   :  { %6031 = sst [smem:[#allocation25_spill]] %s6001_s1 }
   0x3   :  { %6032 = sst [smem:[#allocation26_spill]] %s6004_s4 }
   0x4   :  { %6033 = sst [smem:[#allocation27_spill]] %s6013_s13 }
   0x5   :  { %6034 = sst [smem:[#allocation28_spill]] %s6014_s14 }
   0x6   :  { %6035 = sst [smem:[#allocation29_spill]] %s6015_s15 }
   0x7   :  { %6036 = sst [smem:[#allocation30_spill]] %s6017_s17 }
   0x8   :  { %22 = vsyncpa [#allocation4], 0 }
   0x9   :  { %23 = vsyncpa [#allocation7], 0 }
   0xa   :  { %24 = vsyncpa [#allocation10], 0 }
   0xb   :  { %25 = vsyncpa [#allocation5], 0 }
   0xc   :  { %27 = vsyncpa [#allocation5 + $0x1], 0  ;;  %s5172_s24 = smov 0   ;;  %s5174_s25 = smov 0  }
   0xd   :  { %s5176_s26 = smov 0   ;;  %s5178_s27 = smov 0  }
   0xe LB: > { %6037 = sst [smem:[#allocation17_spill]] %s5047_s24  ;;  %s5193_s28 = sadd.s32 4294967295, %s5059_s27   ;;  %s5059_s27 = sphi %s5178_s27, %s6070_s27   ;;  %s5055_s26 = sphi %s5176_s26, %s6072_s26   ;;  %s5051_s25 = sphi %s5174_s25, %s6074_s25   ;;  %s5047_s24 = sphi %s5172_s24, %s6073_s24  }
   0xf   : > { %6038 = sst [smem:[#allocation18_spill]] %s5055_s26  ;;  %s3768_s29 = sadd.s32 4294967294, %s5059_s27  }
  0x10   : > { %6039 = sst [smem:[#allocation19_spill]] %s5059_s27  ;;  %s5197_s0 = sadd.s32 1, %s5059_s27  }
  0x11   : > { %6040 = sst [smem:[#allocation20_spill]] %s5197_s0  ;;  %s402_s30 = sadd.s32 1, %s5055_s26 }
  0x12   : > { %s399_s18 = ssub.s32 %s5059_s27, %s5197_s0  ;;  %p412_p0 = scmp.ne.s32.totalorder %s5055_s26, %s5051_s25 }
  0x13   : > { %p400_p1 = scmp.eq.s32.totalorder %s399_s18, 0  ;;  %p413_p2 = scmp.eq.s32.totalorder %s5193_s28, 1 }
  0x14   : > { %p418_p3 = scmp.ne.s32.totalorder %s5051_s25, %s5047_s24  ;;  %p419_p4 = scmp.eq.s32.totalorder %s3768_s29, 1 }
  0x15   : > { %s5208_s19 = scalar_select %p400_p1, %s5055_s26, %s402_s30  }
  0x16   : > { %p5210_p5 = por %p413_p2, %p412_p0  ;;  %p5214_p6 = por %p419_p4, %p418_p3 }
  0x17   : > { %6041 = sst [smem:[#allocation21_spill]] %s5208_s19  ;;  %p3769_p7 = scmp.ge.s32.totalorder %s5059_s27, 1 }
  0x18   : > { %s6042_s1 = scalar_select %p5210_p5, 1, 0 }
  0x19   : > { %s6044_s20 = scalar_select %p5214_p6, 1, 0 }
  0x1a   : > { %6043 = sst [smem:[#allocation22_spill]] %s6042_s1  ;;  %p426_p8 = scmp.lt.s32.totalorder %s5059_s27, 3 }
  0x1b   : > { %6045 = sst [smem:[#allocation23_spill]] %s6044_s20  ;;  %p6025_p10 = scmp.eq.s32.totalorder %s5193_s28, 0 }
  0x1c   : > { %p5222_p11 = pnand %p3769_p7, %p426_p8  ;;  %s5061_s22 = smov [#allocation6]  }
  0x1d   : > { %s457_s23 = sshll.u32 %s5061_s22, 4  ;;  %s5062_s30 = smov [#allocation9]   ;;  %s5228_s23 = int_to_ptr.vmem [resolvable:$true] %s457_s23 }
  0x1e   : > { %s6046_s21 = scalar_select %p5222_p11, 1, 0 }
  0x1f   : > { %p4522_p12 = pneg %p5222_p11  ;;  %s486_s18 = sshll.u32 %s5062_s30, 4  ;;  %s5236_s18 = int_to_ptr.vmem [resolvable:$true] %s486_s18 }
  0x20   : > { %s5063_s19 = smov [#allocation3]   ;;  %s6048_s4 = sld [smem:[#allocation26_spill]] }
  0x21   : > { %p5232_p13 = pnand %p6025_p10, %p4522_p12  ;;  %s5238_s26 = sshll.u32 %s5063_s19, 4  ;;  %s445_s26 = int_to_ptr.vmem [resolvable:$true] %s5238_s26 }
  0x23   : > { %p5248_p1 = pneg %p5232_p13 }
  0x26   : > { %s4845_s24 = scalar_lea.hbm %s6048_s4, 3072 }
  0x27   : > { %p4846_p0 = scmp.ne.s32.totalorder %s6048_s4, %s4845_s24  ;;  %p4852_p4 = scmp.lt.u32.totalorder %s4845_s24, %s6048_s4 }
  0x29   : > { %p4848_p2 = pnand %p5248_p1, %p4846_p0 }
  0x2b   : > { %p4849_p3 = pneg %p4848_p2 }
  0x2d   : > { %p4854_p7 = pnand %p4852_p4, %p4849_p3 }
  0x2f   : > { %4857 = shalt.err (!%p4854_p7)
}
  0x30   : > { %s4858_s27 = scalar_lea.vmem %s5228_s23, 3072  ;;  %p4866_p10 = scmp.lt.s32.totalorder %s5228_s23, %s5228_s23 }
  0x31   : > { %p4859_p8 = scmp.ne.s32.totalorder %s5228_s23, %s4858_s27  ;;  %p4867_p6 = scmp.lt.s32.totalorder %s4858_s27, %s4858_s27 }
  0x33   : > { %p4861_p12 = pnand %p4859_p8, %p5248_p1  ;;  %p4868_p0 = por %p4867_p6, %p4866_p10 }
  0x35   : > { %p4862_p9 = pneg %p4861_p12 }
  0x37   : > { %p4869_p2 = pnand %p4868_p0, %p4862_p9 }
  0x39   : > { %4872 = shalt.err (!%p4869_p2)
}
  0x3a   : > { %s5064_s0 = smov 64   ;;  %s5065_s24 = smov 4  }
  0x3b   : > { %4528 = dma.hbm_to_vmem [thread:$0]  (!%p5232_p13), %s6048_s4, 3072, %s5228_s23, [#allocation7], %s5064_s0, %s5064_s0, %s5065_s24  }
  0x3c   : > { %s4873_s27 = scalar_lea.hbm %s6007_s7, 3072 }
  0x3d   : > { %p4874_p6 = scmp.ne.s32.totalorder %s6007_s7, %s4873_s27  ;;  %p4880_p3 = scmp.lt.u32.totalorder %s4873_s27, %s6007_s7 }
  0x3f   : > { %p4876_p9 = pnand %p4874_p6, %p5248_p1 }
  0x41   : > { %p4877_p10 = pneg %p4876_p9 }
  0x43   : > { %p4882_p4 = pnand %p4880_p3, %p4877_p10 }
  0x45   : > { %4885 = shalt.err (!%p4882_p4)
}
  0x46   : > { %s4886_s23 = scalar_lea.vmem %s5236_s18, 3072  ;;  %p4894_p0 = scmp.lt.s32.totalorder %s5236_s18, %s5236_s18 }
  0x47   : > { %p4887_p7 = scmp.ne.s32.totalorder %s5236_s18, %s4886_s23  ;;  %p4895_p2 = scmp.lt.s32.totalorder %s4886_s23, %s4886_s23 }
  0x49   : > { %p4889_p8 = pnand %p4887_p7, %p5248_p1  ;;  %p4896_p6 = por %p4895_p2, %p4894_p0 }
  0x4b   : > { %p4890_p12 = pneg %p4889_p8 }
  0x4d   : > { %p4897_p9 = pnand %p4896_p6, %p4890_p12 }
  0x4f   : > { %4900 = shalt.err (!%p4897_p9)
}
  0x50   : > { %4534 = dma.hbm_to_vmem [thread:$0]  (!%p5232_p13), %s6007_s7, 3072, %s5236_s18, [#allocation10], %s5064_s0, %s5064_s0, %s5065_s24  }
  0x51   : > { %s4901_s20 = scalar_lea.hbm %s6003_s3, 3072 }
  0x52   : > { %p4902_p10 = scmp.ne.s32.totalorder %s6003_s3, %s4901_s20  ;;  %p4908_p7 = scmp.lt.u32.totalorder %s4901_s20, %s6003_s3 }
  0x54   : > { %p4904_p3 = pnand %p4902_p10, %p5248_p1 }
  0x56   : > { %p4905_p4 = pneg %p4904_p3 }
  0x58   : > { %p4910_p8 = pnand %p4908_p7, %p4905_p4 }
  0x5a   : > { %4913 = shalt.err (!%p4910_p8)
}
  0x5b   : > { %s4914_s23 = scalar_lea.vmem %s445_s26, 3072  ;;  %p4922_p6 = scmp.lt.s32.totalorder %s445_s26, %s445_s26 }
  0x5c   : > { %p4915_p12 = scmp.ne.s32.totalorder %s445_s26, %s4914_s23  ;;  %p4923_p9 = scmp.lt.s32.totalorder %s4914_s23, %s4914_s23 }
  0x5e   : > { %p4917_p0 = pnand %p4915_p12, %p5248_p1  ;;  %p4924_p5 = por %p4923_p9, %p4922_p6 }
  0x60   : > { %p4918_p2 = pneg %p4917_p0 }
  0x62   : > { %p4925_p11 = pnand %p4924_p5, %p4918_p2 }
  0x64   : > { %4928 = shalt.err (!%p4925_p11)
}
  0x65   : > { %4525 = dma.hbm_to_vmem [thread:$0]  (!%p5232_p13), %s6003_s3, 3072, %s445_s26, [#allocation4], %s5064_s0, %s5064_s0, %s5065_s24  }
  0x66   : > { %s5066_s14 = smov [#allocation8]   ;;  %s5067_s1 = smov [#allocation11]  }
  0x67   : > { %s470_s15 = sshll.u32 %s5066_s14, 4  ;;  %s502_s20 = sshll.u32 %s5067_s1, 4  ;;  %s471_s15 = int_to_ptr.vmem [resolvable:$true] %s470_s15  ;;  %s503_s20 = int_to_ptr.vmem [resolvable:$true] %s502_s20 }
  0x68   : > { %s4929_s19 = scalar_lea.hbm %s6005_s5, 3072 }
  0x69   : > { %p4930_p5 = scmp.ne.s32.totalorder %s6005_s5, %s4929_s19  ;;  %p4936_p3 = scmp.lt.u32.totalorder %s4929_s19, %s6005_s5 }
  0x6b   : > { %p4932_p11 = pnand %p4930_p5, %p5248_p1 }
  0x6d   : > { %p4933_p10 = pneg %p4932_p11 }
  0x6f   : > { %p4938_p4 = pnand %p4936_p3, %p4933_p10 }
  0x71   : > { %4941 = shalt.err (!%p4938_p4)
}
  0x72   : > { %s4942_s26 = scalar_lea.vmem %s471_s15, 3072  ;;  %p4950_p0 = scmp.lt.s32.totalorder %s471_s15, %s471_s15 }
  0x73   : > { %p4943_p7 = scmp.ne.s32.totalorder %s471_s15, %s4942_s26  ;;  %p4951_p2 = scmp.lt.s32.totalorder %s4942_s26, %s4942_s26 }
  0x75   : > { %p4945_p8 = pnand %p4943_p7, %p5248_p1  ;;  %p4952_p6 = por %p4951_p2, %p4950_p0 }
  0x77   : > { %p4946_p12 = pneg %p4945_p8 }
  0x79   : > { %p4953_p9 = pnand %p4952_p6, %p4946_p12 }
  0x7b   : > { %4956 = shalt.err (!%p4953_p9)
}
  0x7c   : > { %4531 = dma.hbm_to_vmem [thread:$0]  (!%p5232_p13), %s6005_s5, 3072, %s471_s15, [#allocation7], %s5064_s0, %s5064_s0, %s5065_s24  }
  0x7d   : > { %s4957_s22 = scalar_lea.hbm %s6009_s9, 3072 }
  0x7e   : > { %p4958_p5 = scmp.ne.s32.totalorder %s6009_s9, %s4957_s22  ;;  %p4964_p3 = scmp.lt.u32.totalorder %s4957_s22, %s6009_s9 }
  0x80   : > { %p4960_p11 = pnand %p4958_p5, %p5248_p1 }
  0x82   : > { %p4961_p10 = pneg %p4960_p11 }
  0x84   : > { %p4966_p4 = pnand %p4964_p3, %p4961_p10 }
  0x86   : > { %4969 = shalt.err (!%p4966_p4)
}
  0x87   : > { %s4970_s18 = scalar_lea.vmem %s503_s20, 3072  ;;  %p4978_p0 = scmp.lt.s32.totalorder %s503_s20, %s503_s20 }
  0x88   : > { %p4971_p7 = scmp.ne.s32.totalorder %s503_s20, %s4970_s18  ;;  %p4979_p2 = scmp.lt.s32.totalorder %s4970_s18, %s4970_s18 }
  0x8a   : > { %p4973_p8 = pnand %p4971_p7, %p5248_p1  ;;  %p4980_p6 = por %p4979_p2, %p4978_p0 }
  0x8c   : > { %p4974_p12 = pneg %p4973_p8 }
  0x8e   : > { %p4981_p9 = pnand %p4980_p6, %p4974_p12 }
  0x90   : > { %4984 = shalt.err (!%p4981_p9)
}
  0x91   : > { %s5068_s0 = smov 192   ;;  %s5069_s24 = smov 12  }
  0x92   : > { %4537 = dma.hbm_to_vmem [thread:$0]  (!%p5232_p13), %s6009_s9, 3072, %s503_s20, [#allocation10], %s5068_s0, %s5068_s0, %s5069_s24  }
  0x93   : > { %p6050_p5 = scmp.ne.s32.totalorder %s6046_s21, 0 }
  0x94   : > { %p6051_p11 = scmp.eq.s32.totalorder (!%p6050_p5), %s5193_s28, 0 }
  0x95   : > { %547 = sbr.rel (%p6050_p5) target bundleno = 3730 (0xe92), region = 88 }
  0x9c   : > { %5030 = dma.done.wait (%p6051_p11), [#allocation4], 3072   ;;  %p6052_p1 = pmov %p6051_p11 }
  0x9e   : > { %5032 = vsyncadd (%p6052_p1), [#allocation4], 4294964224  ;;  %p6053_p10 = pmov %p6052_p1 }
  0x9f   : > { %p6054_p3 = pmov %p6052_p1 }
  0xa0   : > { %5034 = dma.done.wait (%p6053_p10), [#allocation7], 6144  }
  0xa1   : > { %5036 = vsyncadd (%p6054_p3), [#allocation7], 4294961152  ;;  %p6055_p4 = pmov %p6052_p1 }
  0xa2   : > { %p6056_p13 = pmov %p6052_p1 }
  0xa3   : > { %5038 = dma.done.wait (%p6055_p4), [#allocation10], 6144  }
  0xa4   : > { %5040 = vsyncadd (%p6056_p13), [#allocation10], 4294961152  ;;  %s612_s17 = sand.u32 1, %s5051_s25   ;;  %p615_p7 = scmp.lt.s32.totalorder %s5193_s28, 1 }
  0xa5   : > { %s5377_s21 = sshll.u32 %s612_s17, 3  ;;  %s6057_s14 = sld [smem:[#allocation24_spill]] }
  0xa6   : > { %s616_s29 = scalar_select %p615_p7, %s5193_s28, 1 }
  0xa7   : > { %s614_s22 = scalar_lea.vmem [#allocation12], %s5377_s21  ;;  %p6058_p8 = scmp.ne.s32.totalorder %s5193_s28, 0 }
  0xa8   : > { %s3949_s20 = sshll.u32 %s616_s29, 4  ;;  %v5070_v0 = vmov (!%p6058_p8), 0.0  }
  0xa9   : > { %624 = sbr.rel (%p6058_p8) target bundleno = 176 (0xb0), region = 112  ;;  %625 = vst [vmem:[#allocation2] sm:$0xff] (!%p6058_p8), %v5070_v0  ;;  %626 = vst [vmem:[#allocation2 + $0x18] sm:$0xff] (!%p6058_p8), %v5070_v0 }
  0xab   : > { %s619_s1 = scalar_lea.vmem %s6057_s14, %s3949_s20 }
  0xb0 PF: > { %s6059_s27 = sld [smem:[#allocation25_spill]]  ;;  %vm642_vm0 = vcmask 1041408   ;;  %v627_v2 = vld [vmem:[%s619_s1] sm:$0xff]  ;;  %v5071_v3 = vmov 0.0   ;;  %vm5072_vm1 = vmmov 0   ;;  %v628_v5 = vld [vmem:[%s619_s1 + $0x8] sm:$0xff] }
  0xb1   : > { %4112 = vmatprep.subr.bf16.mxu0 %v5071_v3  ;;  %4114 = vmatprep.mubr.msk.bf16.mxu0 %vm5072_vm1, %v5071_v3  ;;  %vm638_vm2 = vcmask 31744   ;;  %v4607_v6 = vld [vmem:[#allocation6] sm:$0xff]   ;;  %v629_v7 = vpack.c.bf16 %v628_v5, %v627_v2  ;;  %v4609_v9 = vld [vmem:[#allocation6 + $0x8] sm:$0xff]   ;;  %v4611_v11 = vld [vmem:[#allocation6 + $0x10] sm:$0xff]   ;;  %vm2329_vm3 = vcmask 130048   ;;  %s5074_s18 = smov 96  }
  0xb2   : > { %4118 = vmatprep.subr.bf16.mxu1 %v5071_v3  ;;  %v4608_v8 = vld [vmem:[#allocation3] sm:$0xff]   ;;  %4134 = vmatprep.mubr.msk.bf16.mxu1 %vm5072_vm1, %v5071_v3  ;;  %v4610_v10 = vld [vmem:[#allocation3 + $0x8] sm:$0xff]   ;;  %v4612_v12 = vld [vmem:[#allocation3 + $0x10] sm:$0xff]   ;;  %s5075_s0 = smov 112   ;;  %s5076_s24 = smov 80   ;;  %vm3422_vm4 = vcmask 261120  }
  0xb3   : > { %4119 = vmatpush3.bf16.msra.mxu1 %v4607_v6  ;;  %v4613_v13 = vld [vmem:[#allocation6 + $0x18] sm:$0xff]   ;;  %v4615_v15 = vld [vmem:[#allocation6 + $0x20] sm:$0xff]   ;;  %v4617_v16 = vld [vmem:[#allocation6 + $0x28] sm:$0xff]   ;;  %s5077_s15 = smov 64   ;;  %s5078_s26 = smov 48   ;;  %vm3425_vm5 = vcmask 392192  }
  0xb4   : > { %4120 = vmatprep.subr.bf16.mxu1 %v5071_v3  ;;  %v4614_v14 = vld [vmem:[#allocation3 + $0x18] sm:$0xff]   ;;  %v4619_v17 = vld [vmem:[#allocation6 + $0x30] sm:$0xff]   ;;  %v4616_v18 = vld [vmem:[#allocation3 + $0x20] sm:$0xff]   ;;  %s5079_s29 = smov 32   ;;  %s5080_s20 = smov 16   ;;  %vm3428_vm6 = vcmask 523264  }
  0xb5   : > { %v4621_v19 = vld [vmem:[#allocation6 + $0x38] sm:$0xff]   ;;  %v4618_v20 = vld [vmem:[#allocation3 + $0x28] sm:$0xff]   ;;  %v4620_v21 = vld [vmem:[#allocation3 + $0x30] sm:$0xff]   ;;  %vm3431_vm7 = vcmask 654336   ;;  %vm3434_vm8 = vcmask 785408   ;;  %vm3437_vm9 = vcmask 916480  }
  0xb6   : > { %v630_v1 = vld [vmem:[%s6059_s27] sm:$0x3]  ;;  %v4622_v22 = vld [vmem:[#allocation3 + $0x38] sm:$0xff]   ;;  %v4624_v32 = vld [vmem:[#allocation8 + $0x8] sm:$0xff]   ;;  %s6060_s23 = sld [smem:[#allocation27_spill]]  ;;  %s6062_s4 = sld [smem:[#allocation29_spill]] }
  0xb7   : > { %v644_v4 = vsel %vm642_vm0, %v630_v1, 0  ;;  %4121 = vmatpush3.bf16.msra.mxu1 %v4609_v9  ;;  %v3786_v23 = vld [vmem:[%s6002_s2] ss:$0 sm:$0xff]  ;;  %v4625_v35 = vld [vmem:[#allocation8 + $0x10] sm:$0xff]   ;;  %v4626_v37 = vld [vmem:[#allocation8 + $0x18] sm:$0xff]   ;;  %s6063_s13 = sld [smem:[#allocation22_spill]] }
  0xb8   : > { %4113 = vmatpush3.bf16.msra.mxu0 %v644_v4  ;;  %4122 = vmatprep.subr.bf16.mxu1 %v5071_v3  ;;  %v4623_v30 = vld [vmem:[#allocation8] sm:$0xff]   ;;  %v4628_v39 = vld [vmem:[#allocation8 + $0x28] sm:$0xff]   ;;  %v4629_v40 = vld [vmem:[#allocation8 + $0x30] sm:$0xff]   ;;  %s3946_s14 = sshll.u32 %s5193_s28, 7  ;;  %s6064_s30 = sld [smem:[#allocation30_spill]] }
  0xb9   : > { %4138 = vmatprep.subr.bf16.mxu0 %v5071_v3  ;;  %v4627_v38 = vld [vmem:[#allocation8 + $0x20] sm:$0xff]   ;;  %v4630_v41 = vld [vmem:[#allocation8 + $0x38] sm:$0xff]   ;;  %v4632_v46 = vld [vmem:[#allocation9 + $0x8] sm:$0xff]   ;;  %s3646_s28 = scalar_lea.sflag [#allocation5], %s612_s17 }
  0xba   : > { %v4631_v45 = vld [vmem:[#allocation9] sm:$0xff]   ;;  %v4633_v47 = vld [vmem:[#allocation9 + $0x10] sm:$0xff]   ;;  %v4634_v48 = vld [vmem:[#allocation9 + $0x18] sm:$0xff]  }
  0xbb   : > { %4115 = vmatmul.mubr.msk.bf16.vlgmr.msra.gmra.mrb[0].mxu0 %vm638_vm2, %v629_v7  ;;  %4123 = vmatpush3.bf16.msra.mxu1 %v4611_v11  ;;  %v4635_v49 = vld [vmem:[#allocation9 + $0x20] sm:$0xff]   ;;  %v4636_v50 = vld [vmem:[#allocation9 + $0x28] sm:$0xff]   ;;  %v4637_v51 = vld [vmem:[#allocation9 + $0x30] sm:$0xff]  }
  0xbc   : > { %4139 = vmatpush3.bf16.msra.mxu0 %v4608_v8  ;;  %4154 = vmatprep.mubr.msk.bf16.mxu0 %vm5072_vm1, %v5071_v3  ;;  %v4638_v52 = vld [vmem:[#allocation9 + $0x38] sm:$0xff]   ;;  %v4639_v53 = vld [vmem:[#allocation6 + $0x40] sm:$0xff]   ;;  %v4641_v54 = vld [vmem:[#allocation6 + $0x48] sm:$0xff]  }
  0xbd   : > { %4140 = vmatprep.subr.bf16.mxu0 %v5071_v3  ;;  %4124 = vmatprep.subr.bf16.mxu1 %v5071_v3  ;;  %v4643_v55 = vld [vmem:[#allocation6 + $0x50] sm:$0xff]   ;;  %v4645_v56 = vld [vmem:[#allocation6 + $0x58] sm:$0xff]   ;;  %v3812_v5 = vld [vmem:[%s6006_s6] ss:$0 sm:$0xff]  ;;  %p6065_p0 = scmp.ne.s32.totalorder %s6063_s13, 0 }
  0xbe   : > { %s5953_s19 = scalar_lea.hbm %s6064_s30, %s3946_s14 }
  0xbf   : > { %4125 = vmatpush3.bf16.msra.mxu1 %v4613_v13 }
  0xc0   : > { %4141 = vmatpush3.bf16.msra.mxu0 %v4610_v10  ;;  %4126 = vmatprep.subr.bf16.mxu1 %v5071_v3 }
  0xc1   : > { %4142 = vmatprep.subr.bf16.mxu0 %v5071_v3 }
  0xc3   : > { %4127 = vmatpush3.bf16.msra.mxu1 %v4615_v15  ;;  %v4640_v15 = vld [vmem:[#allocation3 + $0x40] sm:$0xff]  }
  0xc4   : > { %4143 = vmatpush3.bf16.msra.mxu0 %v4612_v12  ;;  %4128 = vmatprep.subr.bf16.mxu1 %v5071_v3 }
  0xc5   : > { %4144 = vmatprep.subr.bf16.mxu0 %v5071_v3 }
  0xc7   : > { %4129 = vmatpush3.bf16.msra.mxu1 %v4617_v16 }
  0xc8   : > { %4145 = vmatpush3.bf16.msra.mxu0 %v4614_v14  ;;  %4130 = vmatprep.subr.bf16.mxu1 %v5071_v3 }
  0xc9   : > { %4146 = vmatprep.subr.bf16.mxu0 %v5071_v3 }
  0xcb   : > { %4131 = vmatpush3.bf16.msra.mxu1 %v4619_v17  ;;  %v4642_v17 = vld [vmem:[#allocation3 + $0x48] sm:$0xff]  }
  0xcc   : > { %4147 = vmatpush3.bf16.msra.mxu0 %v4616_v18  ;;  %4132 = vmatprep.subr.bf16.mxu1 %v5071_v3  ;;  %v4644_v18 = vld [vmem:[#allocation3 + $0x50] sm:$0xff]  }
  0xcd   : > { %4148 = vmatprep.subr.bf16.mxu0 %v5071_v3 }
  0xcf   : > { %4133 = vmatpush3.bf16.msra.mxu1 %v4621_v19  ;;  %v4646_v19 = vld [vmem:[#allocation3 + $0x58] sm:$0xff]  }
  0xd0   : > { %4149 = vmatpush3.bf16.msra.mxu0 %v4618_v20  ;;  %4158 = vmatprep.subr.bf16.mxu1 %v5071_v3  ;;  %v4647_v20 = vld [vmem:[#allocation6 + $0x60] sm:$0xff]  }
  0xd1   : > { %4150 = vmatprep.subr.bf16.mxu0 %v5071_v3 }
  0xd4   : > { %4151 = vmatpush3.bf16.msra.mxu0 %v4620_v21  ;;  %v4649_v21 = vld [vmem:[#allocation6 + $0x68] sm:$0xff]  }
  0xd5   : > { %4152 = vmatprep.subr.bf16.mxu0 %v5071_v3 }
  0xd8   : > { %4153 = vmatpush3.bf16.msra.mxu0 %v4622_v22  ;;  %v4651_v22 = vld [vmem:[#allocation6 + $0x70] sm:$0xff]  }
  0xd9   : > { %4178 = vmatprep.subr.bf16.mxu0 %v5071_v3 }
 0x18e   : > { %v680_v24 = vpop.f32.mrb[0].mxu0 }
 0x18f   : > { %v5417_v25 = vadd.f32 %v3786_v23, %v680_v24  ;;  %v4116_v26 = vpop.f32.mrb[1].mxu0  ;;  %v4653_v24 = vld [vmem:[#allocation6 + $0x78] sm:$0xff]  }
 0x190   : > { %v683_v27 = vpop.f32.mrb[2].mxu0  ;;  %v4650_v26 = vld [vmem:[#allocation3 + $0x68] sm:$0xff]  }
 0x191   : > { %687 = vst [vmem:[#allocation2 + $0x8] sm:$0xff] %v5417_v25  ;;  %v5420_v28 = vadd.f32 %v3786_v23, %v683_v27  ;;  %v4117_v29 = vpop.f32.mrb[3].mxu0  ;;  %v4648_v23 = vld [vmem:[#allocation3 + $0x60] sm:$0xff]   ;;  %v4652_v27 = vld [vmem:[#allocation3 + $0x70] sm:$0xff]  }
 0x192   : > { %v4654_v29 = vld [vmem:[#allocation3 + $0x78] sm:$0xff]  }
 0x193   : > { %688 = vst [vmem:[#allocation2 + $0x10] sm:$0xff] %v5420_v28  ;;  %v713_v31 = vpack.c.bf16 %v5420_v28, %v5417_v25 }
 0x195   : > { %4135 = vmatmul.mubr.bf16.vlgmr.msra.gmra.mrb[0].mxu1 %v713_v31 }
 0x196   : > { %4159 = vmatpush3.bf16.msra.mxu1 %v4623_v30  ;;  %4174 = vmatprep.mubr.msk.bf16.mxu1 %vm5072_vm1, %v5071_v3  ;;  %v3813_v30 = vld [vmem:[%s6008_s8] ss:$0 sm:$0xff] }
 0x197   : > { %4160 = vmatprep.subr.bf16.mxu1 %v5071_v3 }
 0x198   : > { %v691_v33 = vld [vmem:[#allocation2 + $0x7] sm:$0xff] }
 0x19a   : > { %v692_v34 = vld [vmem:[#allocation2 + $0xf] sm:$0xff]  ;;  %4161 = vmatpush3.bf16.msra.mxu1 %v4624_v32 }
 0x19b   : > { %v693_v36 = vpack.c.bf16 %v692_v34, %v691_v33  ;;  %4162 = vmatprep.subr.bf16.mxu1 %v5071_v3  ;;  %v694_v42 = vld [vmem:[#allocation2 + $0x9] sm:$0xff]  ;;  %v695_v43 = vld [vmem:[#allocation2 + $0x11] sm:$0xff] }
 0x19c   : > { %v696_v44 = vpack.c.bf16 %v695_v43, %v694_v42  ;;  %v4657_v43 = vld [vmem:[#allocation8 + $0x50] sm:$0xff]  }
 0x19d   : > { %4155 = vmatmul.mubr.bf16.vlgmr.msra.gmra.mrb[4].mxu0 %v693_v36 }
 0x19e   : > { %4163 = vmatpush3.bf16.msra.mxu1 %v4625_v35  ;;  %4194 = vmatprep.mubr.msk.bf16.mxu0 %vm5072_vm1, %v5071_v3 }
 0x19f   : > { %4164 = vmatprep.subr.bf16.mxu1 %v5071_v3  ;;  %4179 = vmatpush3.bf16.msra.mxu0 %v4631_v45  ;;  %v4659_v45 = vld [vmem:[#allocation8 + $0x60] sm:$0xff]  }
 0x1a0   : > { %4180 = vmatprep.subr.bf16.mxu0 %v5071_v3 }
 0x1a2   : > { %4165 = vmatpush3.bf16.msra.mxu1 %v4626_v37 }
 0x1a3   : > { %4166 = vmatprep.subr.bf16.mxu1 %v5071_v3  ;;  %4181 = vmatpush3.bf16.msra.mxu0 %v4632_v46  ;;  %v4660_v46 = vld [vmem:[#allocation8 + $0x68] sm:$0xff]  }
 0x1a4   : > { %4182 = vmatprep.subr.bf16.mxu0 %v5071_v3 }
 0x1a6   : > { %4167 = vmatpush3.bf16.msra.mxu1 %v4627_v38 }
 0x1a7   : > { %4168 = vmatprep.subr.bf16.mxu1 %v5071_v3  ;;  %4183 = vmatpush3.bf16.msra.mxu0 %v4633_v47  ;;  %v4661_v47 = vld [vmem:[#allocation8 + $0x70] sm:$0xff]  }
 0x1a8   : > { %4184 = vmatprep.subr.bf16.mxu0 %v5071_v3 }
 0x1aa   : > { %4169 = vmatpush3.bf16.msra.mxu1 %v4628_v39  ;;  %v4655_v39 = vld [vmem:[#allocation8 + $0x40] sm:$0xff]  }
 0x1ab   : > { %4170 = vmatprep.subr.bf16.mxu1 %v5071_v3  ;;  %4185 = vmatpush3.bf16.msra.mxu0 %v4634_v48  ;;  %v4662_v48 = vld [vmem:[#allocation8 + $0x78] sm:$0xff]  }
 0x1ac   : > { %4186 = vmatprep.subr.bf16.mxu0 %v5071_v3 }
 0x1ae   : > { %4171 = vmatpush3.bf16.msra.mxu1 %v4629_v40 }
 0x1af   : > { %4172 = vmatprep.subr.bf16.mxu1 %v5071_v3  ;;  %4187 = vmatpush3.bf16.msra.mxu0 %v4635_v49 }
 0x1b0   : > { %4188 = vmatprep.subr.bf16.mxu0 %v5071_v3 }
 0x1b2   : > { %4173 = vmatpush3.bf16.msra.mxu1 %v4630_v41  ;;  %v4656_v41 = vld [vmem:[#allocation8 + $0x48] sm:$0xff]  }
 0x1b3   : > { %4198 = vmatprep.subr.bf16.mxu1 %v5071_v3  ;;  %4189 = vmatpush3.bf16.msra.mxu0 %v4636_v50 }
 0x1b4   : > { %4190 = vmatprep.subr.bf16.mxu0 %v5071_v3 }
 0x1b5   : > { %4175 = vmatmul.mubr.bf16.vlgmr.msra.gmra.mrb[4].mxu1 %v696_v44  ;;  %v4658_v44 = vld [vmem:[#allocation8 + $0x58] sm:$0xff]  }
 0x1b6   : > { %4214 = vmatprep.mubr.msk.bf16.mxu1 %vm5072_vm1, %v5071_v3  ;;  %4199 = vmatpush3.bf16.msra.mxu1 %v4639_v53  ;;  %v4664_v53 = vld [vmem:[#allocation9 + $0x48] sm:$0xff]  }
 0x1b7   : > { %4191 = vmatpush3.bf16.msra.mxu0 %v4637_v51  ;;  %4200 = vmatprep.subr.bf16.mxu1 %v5071_v3 }
 0x1b8   : > { %4192 = vmatprep.subr.bf16.mxu0 %v5071_v3 }
 0x1ba   : > { %4201 = vmatpush3.bf16.msra.mxu1 %v4641_v54  ;;  %v4665_v54 = vld [vmem:[#allocation9 + $0x50] sm:$0xff]  }
 0x1bb   : > { %4193 = vmatpush3.bf16.msra.mxu0 %v4638_v52  ;;  %4202 = vmatprep.subr.bf16.mxu1 %v5071_v3  ;;  %v4663_v52 = vld [vmem:[#allocation9 + $0x40] sm:$0xff]  }
 0x1bc   : > { %4218 = vmatprep.subr.bf16.mxu0 %v5071_v3 }
 0x1be   : > { %4203 = vmatpush3.bf16.msra.mxu1 %v4643_v55  ;;  %v4666_v55 = vld [vmem:[#allocation9 + $0x58] sm:$0xff]  }
 0x1bf   : > { %4204 = vmatprep.subr.bf16.mxu1 %v5071_v3 }
 0x1c2   : > { %4205 = vmatpush3.bf16.msra.mxu1 %v4645_v56  ;;  %v4667_v56 = vld [vmem:[#allocation9 + $0x60] sm:$0xff]  }
 0x1c3   : > { %4206 = vmatprep.subr.bf16.mxu1 %v5071_v3 }
 0x1c6   : > { %4207 = vmatpush3.bf16.msra.mxu1 %v4647_v20 }
 0x1c7   : > { %4208 = vmatprep.subr.bf16.mxu1 %v5071_v3 }
 0x1ca   : > { %4209 = vmatpush3.bf16.msra.mxu1 %v4649_v21 }
 0x1cb   : > { %4210 = vmatprep.subr.bf16.mxu1 %v5071_v3 }
 0x1ce   : > { %4211 = vmatpush3.bf16.msra.mxu1 %v4651_v22  ;;  %v4672_v22 = vld [vmem:[#allocation3 + $0x80] sm:$0xff]  }
 0x1cf   : > { %4212 = vmatprep.subr.bf16.mxu1 %v5071_v3 }
 0x1d2   : > { %4213 = vmatpush3.bf16.msra.mxu1 %v4653_v24  ;;  %v4674_v24 = vld [vmem:[#allocation3 + $0x88] sm:$0xff]  }
 0x1d3   : > { %4238 = vmatprep.subr.bf16.mxu1 %v5071_v3 }
 0x268   : > { %v812_v57 = vpop.f32.mrb[0].mxu1 }
 0x269   : > { %v4136_v58 = vpop.f32.mrb[1].mxu1 }
 0x26a   : > { %v815_v59 = vpop.f32.mrb[2].mxu1  ;;  %v4669_v58 = vld [vmem:[#allocation9 + $0x70] sm:$0xff]  }
 0x26b   : > { %v4137_v60 = vpop.f32.mrb[3].mxu1 }
 0x26c   : > { %v4671_v60 = vld [vmem:[#allocation6 + $0x80] sm:$0xff]  }
 0x270   : > { %v901_v61 = vpop.f32.mrb[4].mxu0 }
 0x271   : > { %v902_v62 = vadd.f32 %v901_v61, %v812_v57  ;;  %v4156_v63 = vpop.f32.mrb[5].mxu0  ;;  %v4668_v57 = vld [vmem:[#allocation9 + $0x68] sm:$0xff]  }
 0x272   : > { %v904_v0 = vpop.f32.mrb[6].mxu0  ;;  %v4673_v61 = vld [vmem:[#allocation6 + $0x88] sm:$0xff]   ;;  %v4677_v63 = vld [vmem:[#allocation6 + $0x98] sm:$0xff]  }
 0x273   : > { %v905_v1 = vadd.f32 %v904_v0, %v815_v59  ;;  %v4157_v2 = vpop.f32.mrb[7].mxu0  ;;  %v4670_v59 = vld [vmem:[#allocation9 + $0x78] sm:$0xff]  }
 0x288   : > { %v1006_v4 = vpop.f32.mrb[4].mxu1 }
 0x289   : > { %v1013_v6 = vadd.f32 %v1006_v4, %v902_v62  ;;  %v4176_v7 = vpop.f32.mrb[5].mxu1  ;;  %v4675_v62 = vld [vmem:[#allocation6 + $0x90] sm:$0xff]  }
 0x28a   : > { %v1009_v8 = vpop.f32.mrb[6].mxu1 }
 0x28b   : > { %v1022_v9 = vadd.f32 %v3812_v5, %v1013_v6  ;;  %v1014_v10 = vadd.f32 %v1009_v8, %v905_v1  ;;  %v4177_v11 = vpop.f32.mrb[7].mxu1 }
 0x28d   : > { %v1023_v12 = vadd.f32 %v3812_v5, %v1014_v10  ;;  %v1024_v13 = vmax.f32 %v1022_v9, 0.0 }
 0x28f   : > { %v1025_v14 = vmax.f32 %v1023_v12, 0.0  ;;  %v3847_v12 = vld [vmem:[%s6006_s6 + $0x1] ss:$0 sm:$0xff] }
 0x291   : > { %v1026_v16 = vpack.c.bf16 %v1025_v14, %v1024_v13 }
 0x293   : > { %4195 = vmatmul.mubr.bf16.vlgmr.msra.gmra.mrb[8].mxu0 %v1026_v16 }
 0x294   : > { %4219 = vmatpush3.bf16.msra.mxu0 %v4640_v15  ;;  %4234 = vmatprep.mubr.msk.bf16.mxu0 %vm5072_vm1, %v5071_v3 }
 0x295   : > { %4220 = vmatprep.subr.bf16.mxu0 %v5071_v3 }
 0x298   : > { %4221 = vmatpush3.bf16.msra.mxu0 %v4642_v17 }
 0x299   : > { %4222 = vmatprep.subr.bf16.mxu0 %v5071_v3 }
 0x29c   : > { %4223 = vmatpush3.bf16.msra.mxu0 %v4644_v18 }
 0x29d   : > { %4224 = vmatprep.subr.bf16.mxu0 %v5071_v3 }
 0x2a0   : > { %4225 = vmatpush3.bf16.msra.mxu0 %v4646_v19 }
 0x2a1   : > { %4226 = vmatprep.subr.bf16.mxu0 %v5071_v3 }
 0x2a4   : > { %4227 = vmatpush3.bf16.msra.mxu0 %v4648_v23 }
 0x2a5   : > { %4228 = vmatprep.subr.bf16.mxu0 %v5071_v3 }
 0x2a8   : > { %4229 = vmatpush3.bf16.msra.mxu0 %v4650_v26  ;;  %v4676_v26 = vld [vmem:[#allocation3 + $0x90] sm:$0xff]  }
 0x2a9   : > { %4230 = vmatprep.subr.bf16.mxu0 %v5071_v3 }
 0x2ac   : > { %4231 = vmatpush3.bf16.msra.mxu0 %v4652_v27  ;;  %v4678_v27 = vld [vmem:[#allocation3 + $0x98] sm:$0xff]  }
 0x2ad   : > { %4232 = vmatprep.subr.bf16.mxu0 %v5071_v3 }
 0x2b0   : > { %4233 = vmatpush3.bf16.msra.mxu0 %v4654_v29  ;;  %v4679_v29 = vld [vmem:[#allocation6 + $0xa0] sm:$0xff]  }
 0x2b1   : > { %4258 = vmatprep.subr.bf16.mxu0 %v5071_v3 }
 0x366   : > { %v1132_v31 = vpop.f32.mrb[8].mxu0 }
 0x367   : > { %v1133_v32 = vadd.f32 %v3813_v30, %v1132_v31  ;;  %v4196_v33 = vpop.f32.mrb[9].mxu0  ;;  %v4683_v31 = vld [vmem:[#allocation6 + $0xb0] sm:$0xff]  }
 0x368   : > { %v1135_v34 = vpop.f32.mrb[10].mxu0  ;;  %v4685_v33 = vld [vmem:[#allocation6 + $0xb8] sm:$0xff]  }
 0x369   : > { %v5472_v35 = vadd.f32 %v1133_v32, %v5417_v25  ;;  %v1136_v36 = vadd.f32 %v3813_v30, %v1135_v34  ;;  %v4197_v37 = vpop.f32.mrb[11].mxu0  ;;  %v4681_v30 = vld [vmem:[#allocation6 + $0xa8] sm:$0xff]   ;;  %v4680_v32 = vld [vmem:[#allocation3 + $0xa0] sm:$0xff]  }
 0x36a   : > { %v4682_v34 = vld [vmem:[#allocation3 + $0xa8] sm:$0xff]   ;;  %v4686_v37 = vld [vmem:[#allocation3 + $0xb8] sm:$0xff]  }
 0x36b   : > { %1141 = vst [vmem:[#allocation2 + $0x8] sm:$0xff] %v5472_v35  ;;  %v5476_v38 = vadd.f32 %v1136_v36, %v5420_v28  ;;  %v4684_v36 = vld [vmem:[#allocation3 + $0xb0] sm:$0xff]  }
 0x36d   : > { %1142 = vst [vmem:[#allocation2 + $0x10] sm:$0xff] %v5476_v38  ;;  %v1168_v40 = vpack.c.bf16 %v5476_v38, %v5472_v35 }
 0x36f   : > { %4215 = vmatmul.mubr.bf16.vlgmr.msra.gmra.mrb[8].mxu1 %v1168_v40 }
 0x370   : > { %4239 = vmatpush3.bf16.msra.mxu1 %v4655_v39  ;;  %4254 = vmatprep.mubr.msk.bf16.mxu1 %vm5072_vm1, %v5071_v3  ;;  %v3849_v39 = vld [vmem:[%s6008_s8 + $0x1] ss:$0 sm:$0xff] }
 0x371   : > { %4240 = vmatprep.subr.bf16.mxu1 %v5071_v3 }
 0x372   : > { %v1145_v25 = vld [vmem:[#allocation2 + $0x6] sm:$0xff] }
 0x374   : > { %v1146_v42 = vld [vmem:[#allocation2 + $0xe] sm:$0xff]  ;;  %4241 = vmatpush3.bf16.msra.mxu1 %v4656_v41 }
 0x375   : > { %v1147_v28 = vpack.c.bf16 %v1146_v42, %v1145_v25  ;;  %4242 = vmatprep.subr.bf16.mxu1 %v5071_v3  ;;  %v1148_v49 = vld [vmem:[#allocation2 + $0xa] sm:$0xff]  ;;  %v1149_v50 = vld [vmem:[#allocation2 + $0x12] sm:$0xff] }
 0x376   : > { %v1150_v51 = vpack.c.bf16 %v1149_v50, %v1148_v49  ;;  %v4689_v50 = vld [vmem:[#allocation8 + $0x90] sm:$0xff]  }
 0x377   : > { %4235 = vmatmul.mubr.bf16.vlgmr.msra.gmra.mrb[12].mxu0 %v1147_v28 }
 0x378   : > { %4243 = vmatpush3.bf16.msra.mxu1 %v4657_v43  ;;  %4274 = vmatprep.mubr.msk.bf16.mxu0 %vm5072_vm1, %v5071_v3 }
 0x379   : > { %4244 = vmatprep.subr.bf16.mxu1 %v5071_v3  ;;  %4259 = vmatpush3.bf16.msra.mxu0 %v4663_v52  ;;  %v4691_v52 = vld [vmem:[#allocation8 + $0xa0] sm:$0xff]  }
 0x37a   : > { %4260 = vmatprep.subr.bf16.mxu0 %v5071_v3 }
 0x37c   : > { %4245 = vmatpush3.bf16.msra.mxu1 %v4658_v44 }
 0x37d   : > { %4246 = vmatprep.subr.bf16.mxu1 %v5071_v3  ;;  %4261 = vmatpush3.bf16.msra.mxu0 %v4664_v53  ;;  %v4692_v53 = vld [vmem:[#allocation8 + $0xa8] sm:$0xff]  }
 0x37e   : > { %4262 = vmatprep.subr.bf16.mxu0 %v5071_v3 }
 0x380   : > { %4247 = vmatpush3.bf16.msra.mxu1 %v4659_v45 }
 0x381   : > { %4248 = vmatprep.subr.bf16.mxu1 %v5071_v3  ;;  %4263 = vmatpush3.bf16.msra.mxu0 %v4665_v54  ;;  %v4693_v54 = vld [vmem:[#allocation8 + $0xb0] sm:$0xff]  }
 0x382   : > { %4264 = vmatprep.subr.bf16.mxu0 %v5071_v3 }
 0x384   : > { %4249 = vmatpush3.bf16.msra.mxu1 %v4660_v46  ;;  %v4687_v46 = vld [vmem:[#allocation8 + $0x80] sm:$0xff]  }
 0x385   : > { %4250 = vmatprep.subr.bf16.mxu1 %v5071_v3  ;;  %4265 = vmatpush3.bf16.msra.mxu0 %v4666_v55  ;;  %v4694_v55 = vld [vmem:[#allocation8 + $0xb8] sm:$0xff]  }
 0x386   : > { %4266 = vmatprep.subr.bf16.mxu0 %v5071_v3 }
 0x388   : > { %4251 = vmatpush3.bf16.msra.mxu1 %v4661_v47 }
 0x389   : > { %4252 = vmatprep.subr.bf16.mxu1 %v5071_v3  ;;  %4267 = vmatpush3.bf16.msra.mxu0 %v4667_v56 }
 0x38a   : > { %4268 = vmatprep.subr.bf16.mxu0 %v5071_v3 }
 0x38c   : > { %4253 = vmatpush3.bf16.msra.mxu1 %v4662_v48  ;;  %v4688_v48 = vld [vmem:[#allocation8 + $0x88] sm:$0xff]  }
 0x38d   : > { %4278 = vmatprep.subr.bf16.mxu1 %v5071_v3  ;;  %4269 = vmatpush3.bf16.msra.mxu0 %v4668_v57 }
 0x38e   : > { %4270 = vmatprep.subr.bf16.mxu0 %v5071_v3 }
 0x38f   : > { %4255 = vmatmul.mubr.bf16.vlgmr.msra.gmra.mrb[12].mxu1 %v1150_v51  ;;  %v4690_v51 = vld [vmem:[#allocation8 + $0x98] sm:$0xff]  }
 0x390   : > { %4294 = vmatprep.mubr.msk.bf16.mxu1 %vm5072_vm1, %v5071_v3  ;;  %4279 = vmatpush3.bf16.msra.mxu1 %v4671_v60  ;;  %v4697_v60 = vld [vmem:[#allocation9 + $0x90] sm:$0xff]  }
 0x391   : > { %4271 = vmatpush3.bf16.msra.mxu0 %v4669_v58  ;;  %4280 = vmatprep.subr.bf16.mxu1 %v5071_v3  ;;  %v4695_v58 = vld [vmem:[#allocation9 + $0x80] sm:$0xff]  }
 0x392   : > { %4272 = vmatprep.subr.bf16.mxu0 %v5071_v3 }
 0x394   : > { %4281 = vmatpush3.bf16.msra.mxu1 %v4673_v61  ;;  %v4698_v61 = vld [vmem:[#allocation9 + $0x98] sm:$0xff]  }
 0x395   : > { %4273 = vmatpush3.bf16.msra.mxu0 %v4670_v59  ;;  %4282 = vmatprep.subr.bf16.mxu1 %v5071_v3  ;;  %v4696_v59 = vld [vmem:[#allocation9 + $0x88] sm:$0xff]  }
 0x396   : > { %4298 = vmatprep.subr.bf16.mxu0 %v5071_v3 }
 0x398   : > { %4283 = vmatpush3.bf16.msra.mxu1 %v4675_v62  ;;  %v4699_v62 = vld [vmem:[#allocation9 + $0xa0] sm:$0xff]  }
 0x399   : > { %4284 = vmatprep.subr.bf16.mxu1 %v5071_v3 }
 0x39c   : > { %4285 = vmatpush3.bf16.msra.mxu1 %v4677_v63  ;;  %v4700_v63 = vld [vmem:[#allocation9 + $0xa8] sm:$0xff]  }
 0x39d   : > { %4286 = vmatprep.subr.bf16.mxu1 %v5071_v3 }
 0x3a0   : > { %4287 = vmatpush3.bf16.msra.mxu1 %v4679_v29 }
 0x3a1   : > { %4288 = vmatprep.subr.bf16.mxu1 %v5071_v3 }
 0x3a4   : > { %4289 = vmatpush3.bf16.msra.mxu1 %v4681_v30 }
 0x3a5   : > { %4290 = vmatprep.subr.bf16.mxu1 %v5071_v3 }
 0x3a8   : > { %4291 = vmatpush3.bf16.msra.mxu1 %v4683_v31 }
 0x3a9   : > { %4292 = vmatprep.subr.bf16.mxu1 %v5071_v3 }
 0x3ac   : > { %4293 = vmatpush3.bf16.msra.mxu1 %v4685_v33 }
 0x3ad   : > { %4318 = vmatprep.subr.bf16.mxu1 %v5071_v3 }
 0x442   : > { %v1268_v0 = vpop.f32.mrb[8].mxu1 }
 0x443   : > { %v4216_v1 = vpop.f32.mrb[9].mxu1 }
 0x444   : > { %v1271_v2 = vpop.f32.mrb[10].mxu1  ;;  %v4702_v1 = vld [vmem:[#allocation9 + $0xb8] sm:$0xff]  }
 0x445   : > { %v4217_v4 = vpop.f32.mrb[11].mxu1 }
 0x446   : > { %v4705_v4 = vld [vmem:[#allocation11 + $0x4] ss:$12 sps:$4 sm:$0xff]  }
 0x44a   : > { %v1357_v5 = vpop.f32.mrb[12].mxu0 }
 0x44b   : > { %v1358_v6 = vadd.f32 %v1357_v5, %v1268_v0  ;;  %v4236_v7 = vpop.f32.mrb[13].mxu0  ;;  %v4701_v0 = vld [vmem:[#allocation9 + $0xb0] sm:$0xff]   ;;  %v4709_v5 = vld [vmem:[#allocation11 + $0x1c] ss:$12 sps:$4 sm:$0xff]  }
 0x44c   : > { %v1360_v8 = vpop.f32.mrb[14].mxu0  ;;  %v4713_v7 = vld [vmem:[#allocation11 + $0x34] ss:$12 sps:$4 sm:$0xff]  }
 0x44d   : > { %v1361_v9 = vadd.f32 %v1360_v8, %v1271_v2  ;;  %v4237_v10 = vpop.f32.mrb[15].mxu0  ;;  %v4703_v2 = vld [vmem:[#allocation11] ss:$12 sps:$4 sm:$0xff]   ;;  %v4711_v8 = vld [vmem:[#allocation11 + $0x30] ss:$12 sps:$4 sm:$0xff]  }
 0x44e   : > { %v4715_v10 = vld [vmem:[#allocation11 + $0x48] ss:$12 sps:$4 sm:$0xff]  }
 0x462   : > { %v1463_v11 = vpop.f32.mrb[12].mxu1 }
 0x463   : > { %v1470_v13 = vadd.f32 %v1463_v11, %v1358_v6  ;;  %v4256_v14 = vpop.f32.mrb[13].mxu1  ;;  %v4707_v6 = vld [vmem:[#allocation11 + $0x18] ss:$12 sps:$4 sm:$0xff]  }
 0x464   : > { %v1466_v15 = vpop.f32.mrb[14].mxu1 }
 0x465   : > { %v1480_v16 = vadd.f32 %v3847_v12, %v1470_v13  ;;  %v1471_v17 = vadd.f32 %v1466_v15, %v1361_v9  ;;  %v4257_v18 = vpop.f32.mrb[15].mxu1  ;;  %v4717_v9 = vld [vmem:[#allocation11 + $0x4c] ss:$12 sps:$4 sm:$0xff]  }
 0x467   : > { %v1481_v19 = vadd.f32 %v3847_v12, %v1471_v17  ;;  %v1482_v20 = vmax.f32 %v1480_v16, 0.0 }
 0x469   : > { %v1483_v21 = vmax.f32 %v1481_v19, 0.0 }
 0x46b   : > { %v1484_v23 = vpack.c.bf16 %v1483_v21, %v1482_v20 }
 0x46d   : > { %4275 = vmatmul.mubr.bf16.vlgmr.msra.gmra.mrb[16].mxu0 %v1484_v23 }
 0x46e   : > { %4299 = vmatpush3.bf16.msra.mxu0 %v4672_v22  ;;  %4314 = vmatprep.mubr.msk.bf16.mxu0 %vm5072_vm1, %v5071_v3  ;;  %v3883_v22 = vld [vmem:[%s6006_s6 + $0x2] ss:$0 sm:$0xff] }
 0x46f   : > { %4300 = vmatprep.subr.bf16.mxu0 %v5071_v3 }
 0x472   : > { %4301 = vmatpush3.bf16.msra.mxu0 %v4674_v24 }
 0x473   : > { %4302 = vmatprep.subr.bf16.mxu0 %v5071_v3 }
 0x476   : > { %4303 = vmatpush3.bf16.msra.mxu0 %v4676_v26 }
 0x477   : > { %4304 = vmatprep.subr.bf16.mxu0 %v5071_v3 }
 0x47a   : > { %4305 = vmatpush3.bf16.msra.mxu0 %v4678_v27 }
 0x47b   : > { %4306 = vmatprep.subr.bf16.mxu0 %v5071_v3 }
 0x47e   : > { %4307 = vmatpush3.bf16.msra.mxu0 %v4680_v32 }
 0x47f   : > { %4308 = vmatprep.subr.bf16.mxu0 %v5071_v3 }
 0x482   : > { %4309 = vmatpush3.bf16.msra.mxu0 %v4682_v34  ;;  %v4706_v34 = vld [vmem:[#allocation11 + $0x8] ss:$12 sps:$4 sm:$0xff]  }
 0x483   : > { %4310 = vmatprep.subr.bf16.mxu0 %v5071_v3 }
 0x486   : > { %4311 = vmatpush3.bf16.msra.mxu0 %v4684_v36 }
 0x487   : > { %4312 = vmatprep.subr.bf16.mxu0 %v5071_v3 }
 0x48a   : > { %4313 = vmatpush3.bf16.msra.mxu0 %v4686_v37  ;;  %v4710_v37 = vld [vmem:[#allocation11 + $0x20] ss:$12 sps:$4 sm:$0xff]  }
 0x48b   : > { %4338 = vmatprep.subr.bf16.mxu0 %v5071_v3 }
 0x540   : > { %v1592_v40 = vpop.f32.mrb[16].mxu0 }
 0x541   : > { %v1593_v41 = vadd.f32 %v3849_v39, %v1592_v40  ;;  %v4276_v25 = vpop.f32.mrb[17].mxu0  ;;  %v4718_v40 = vld [vmem:[#allocation11 + $0x50] ss:$12 sps:$4 sm:$0xff]  }
 0x542   : > { %v1595_v42 = vpop.f32.mrb[18].mxu0  ;;  %v4719_v25 = vld [vmem:[#allocation11 + $0x60] ss:$12 sps:$4 sm:$0xff]  }
 0x543   : > { %v5528_v43 = vadd.f32 %v1593_v41, %v5472_v35  ;;  %v1596_v28 = vadd.f32 %v3849_v39, %v1595_v42  ;;  %v4277_v44 = vpop.f32.mrb[19].mxu0  ;;  %v4714_v39 = vld [vmem:[#allocation11 + $0x38] ss:$12 sps:$4 sm:$0xff]   ;;  %v4722_v42 = vld [vmem:[#allocation11 + $0x68] ss:$12 sps:$4 sm:$0xff]  }
 0x544   : > { %v4721_v41 = vld [vmem:[#allocation11 + $0x64] ss:$12 sps:$4 sm:$0xff]  }
 0x545   : > { %1601 = vst [vmem:[#allocation2 + $0x8] sm:$0xff] %v5528_v43  ;;  %v5532_v45 = vadd.f32 %v1596_v28, %v5476_v38  ;;  %v4725_v28 = vld [vmem:[#allocation11 + $0x7c] ss:$12 sps:$4 sm:$0xff]   ;;  %v4723_v44 = vld [vmem:[#allocation11 + $0x78] ss:$12 sps:$4 sm:$0xff]  }
 0x547   : > { %1602 = vst [vmem:[#allocation2 + $0x10] sm:$0xff] %v5532_v45  ;;  %v1627_v47 = vpack.c.bf16 %v5532_v45, %v5528_v43 }
 0x549   : > { %4295 = vmatmul.mubr.bf16.vlgmr.msra.gmra.mrb[16].mxu1 %v1627_v47  ;;  %v4729_v47 = vld [vmem:[#allocation11 + $0x94] ss:$12 sps:$4 sm:$0xff]  }
 0x54a   : > { %4319 = vmatpush3.bf16.msra.mxu1 %v4687_v46  ;;  %4334 = vmatprep.mubr.msk.bf16.mxu1 %vm5072_vm1, %v5071_v3  ;;  %v4726_v46 = vld [vmem:[#allocation11 + $0x80] ss:$12 sps:$4 sm:$0xff]  }
 0x54b   : > { %4320 = vmatprep.subr.bf16.mxu1 %v5071_v3 }
 0x54c   : > { %v1605_v35 = vld [vmem:[#allocation2 + $0x4] sm:$0xff] }
 0x54e   : > { %v1606_v49 = vld [vmem:[#allocation2 + $0xc] sm:$0xff]  ;;  %4321 = vmatpush3.bf16.msra.mxu1 %v4688_v48  ;;  %v1608_v56 = vld [vmem:[#allocation2 + $0x14] sm:$0xff] }
 0x54f   : > { %v1607_v38 = vpack.c.bf16 %v1606_v49, %v1605_v35  ;;  %4322 = vmatprep.subr.bf16.mxu1 %v5071_v3  ;;  %v1609_v57 = vpack.c.bf16 %v1608_v56, %v1606_v49  ;;  %v4727_v48 = vld [vmem:[#allocation11 + $0x90] ss:$12 sps:$4 sm:$0xff]   ;;  %v4730_v35 = vld [vmem:[#allocation11 + $0x98] ss:$12 sps:$4 sm:$0xff]  }
 0x550   : > { %v4733_v49 = vld [vmem:[#allocation11 + $0xac] ss:$12 sps:$4 sm:$0xff]  }
 0x551   : > { %4315 = vmatmul.mubr.bf16.vlgmr.msra.gmra.mrb[20].mxu0 %v1607_v38  ;;  %v4734_v38 = vld [vmem:[#allocation11 + $0xb0] ss:$12 sps:$4 sm:$0xff]  }
 0x552   : > { %4323 = vmatpush3.bf16.msra.mxu1 %v4689_v50  ;;  %4354 = vmatprep.mubr.msk.bf16.mxu0 %vm5072_vm1, %v5071_v3  ;;  %v4731_v50 = vld [vmem:[#allocation11 + $0xa8] ss:$12 sps:$4 sm:$0xff]  }
 0x553   : > { %4324 = vmatprep.subr.bf16.mxu1 %v5071_v3  ;;  %4339 = vmatpush3.bf16.msra.mxu0 %v4695_v58 }
 0x554   : > { %4340 = vmatprep.subr.bf16.mxu0 %v5071_v3 }
 0x556   : > { %4325 = vmatpush3.bf16.msra.mxu1 %v4690_v51  ;;  %v5073_v51 = vmov 0  }
 0x557   : > { %4326 = vmatprep.subr.bf16.mxu1 %v5071_v3  ;;  %4341 = vmatpush3.bf16.msra.mxu0 %v4696_v59 }
 0x558   : > { %4342 = vmatprep.subr.bf16.mxu0 %v5071_v3  ;;  %4605 = vset.pattern.permute.xlu1 %v5073_v51 }
 0x559   : > { %4606 = vset.pattern.permute.xlu0 %v5073_v51 }
 0x55a   : > { %4327 = vmatpush3.bf16.msra.mxu1 %v4691_v52  ;;  %v3885_v52 = vld [vmem:[%s6008_s8 + $0x2] ss:$0 sm:$0xff] }
 0x55b   : > { %4328 = vmatprep.subr.bf16.mxu1 %v5071_v3  ;;  %4343 = vmatpush3.bf16.msra.mxu0 %v4697_v60 }
 0x55c   : > { %4344 = vmatprep.subr.bf16.mxu0 %v5071_v3 }
 0x55e   : > { %4329 = vmatpush3.bf16.msra.mxu1 %v4692_v53 }
 0x55f   : > { %4330 = vmatprep.subr.bf16.mxu1 %v5071_v3  ;;  %4345 = vmatpush3.bf16.msra.mxu0 %v4698_v61 }
 0x560   : > { %4346 = vmatprep.subr.bf16.mxu0 %v5071_v3 }
 0x562   : > { %4331 = vmatpush3.bf16.msra.mxu1 %v4693_v54 }
 0x563   : > { %4332 = vmatprep.subr.bf16.mxu1 %v5071_v3  ;;  %4347 = vmatpush3.bf16.msra.mxu0 %v4699_v62  ;;  %v2099_v62 = vlaneseq }
 0x564   : > { %4348 = vmatprep.subr.bf16.mxu0 %v5071_v3 }
 0x566   : > { %4333 = vmatpush3.bf16.msra.mxu1 %v4694_v55 }
 0x567   : > { %4349 = vmatpush3.bf16.msra.mxu0 %v4700_v63  ;;  %2242 = vmatprep.subr.bf16.mxu1 %v4705_v4  ;;  %v2100_v63 = vshrl.u32 %v2099_v62, 7 }
 0x568   : > { %4350 = vmatprep.subr.bf16.mxu0 %v5071_v3 }
 0x569   : > { %4335 = vmatmul.mubr.bf16.vlgmr.msra.gmra.mrb[20].mxu1 %v1609_v57 }
 0x56a   : > { %2243 = vmatpush1.bf16.msra.mxu1 %v4703_v2  ;;  %2274 = vmatprep.mubr.bf16.mxu1 %v5073_v51  ;;  %v2105_v2 = vsub.s32 1, %v2100_v63 }
 0x56b   : > { %4351 = vmatpush3.bf16.msra.mxu0 %v4701_v0  ;;  %2244 = vmatprep.subr.bf16.mxu1 %v4709_v5  ;;  %v2101_v0 = vsub.s32 0, %v2100_v63 }
 0x56c   : > { %4352 = vmatprep.subr.bf16.mxu0 %v5071_v3 }
 0x56e   : > { %2245 = vmatpush1.bf16.msra.mxu1 %v4707_v6 }
 0x56f   : > { %4353 = vmatpush3.bf16.msra.mxu0 %v4702_v1  ;;  %2246 = vmatprep.subr.bf16.mxu1 %v4713_v7  ;;  %v2109_v1 = vsub.s32 2, %v2100_v63 }
 0x570   : > { %4358 = vmatprep.subr.bf16.mxu0 %v5071_v3 }
 0x572   : > { %2247 = vmatpush1.bf16.msra.mxu1 %v4711_v8 }
 0x573   : > { %2248 = vmatprep.subr.bf16.mxu1 %v4717_v9 }
 0x576   : > { %2249 = vmatpush1.bf16.msra.mxu1 %v4715_v10 }
 0x577   : > { %2250 = vmatprep.subr.bf16.mxu1 %v4721_v41 }
 0x57a   : > { %2251 = vmatpush1.bf16.msra.mxu1 %v4719_v25 }
 0x57b   : > { %2252 = vmatprep.subr.bf16.mxu1 %v4725_v28 }
 0x57e   : > { %2253 = vmatpush1.bf16.msra.mxu1 %v4723_v44 }
 0x57f   : > { %2254 = vmatprep.subr.bf16.mxu1 %v4729_v47 }
 0x582   : > { %2255 = vmatpush1.bf16.msra.mxu1 %v4727_v48 }
 0x583   : > { %2256 = vmatprep.subr.bf16.mxu1 %v4733_v49 }
 0x586   : > { %2257 = vmatpush1.bf16.msra.mxu1 %v4731_v50 }
 0x587   : > { %4390 = vmatprep.subr.bf16.mxu1 %v5071_v3 }
 0x61c   : > { %v1727_v11 = vpop.f32.mrb[16].mxu1 }
 0x61d   : > { %v4296_v12 = vpop.f32.mrb[17].mxu1 }
 0x61e   : > { %v1730_v13 = vpop.f32.mrb[18].mxu1 }
 0x61f   : > { %v4297_v14 = vpop.f32.mrb[19].mxu1 }
 0x624   : > { %v1816_v15 = vpop.f32.mrb[20].mxu0 }
 0x625   : > { %v1817_v16 = vadd.f32 %v1816_v15, %v1727_v11  ;;  %v4316_v17 = vpop.f32.mrb[21].mxu0 }
 0x626   : > { %v1819_v18 = vpop.f32.mrb[22].mxu0 }
 0x627   : > { %v1820_v19 = vadd.f32 %v1819_v18, %v1730_v13  ;;  %v4317_v20 = vpop.f32.mrb[23].mxu0 }
 0x63c   : > { %v1922_v21 = vpop.f32.mrb[20].mxu1 }
 0x63d   : > { %v1929_v23 = vadd.f32 %v1922_v21, %v1817_v16  ;;  %v4336_v24 = vpop.f32.mrb[21].mxu1 }
 0x63e   : > { %v1925_v26 = vpop.f32.mrb[22].mxu1 }
 0x63f   : > { %v1939_v27 = vadd.f32 %v3883_v22, %v1929_v23  ;;  %v1930_v29 = vadd.f32 %v1925_v26, %v1820_v19  ;;  %v4337_v30 = vpop.f32.mrb[23].mxu1 }
 0x641   : > { %v1940_v31 = vadd.f32 %v3883_v22, %v1930_v29  ;;  %v1941_v32 = vmax.f32 %v1939_v27, 0.0 }
 0x643   : > { %v1942_v33 = vmax.f32 %v1940_v31, 0.0 }
 0x645   : > { %v1943_v36 = vpack.c.bf16 %v1942_v33, %v1941_v32 }
 0x647   : > { %4355 = vmatmul.mubr.bf16.vlgmr.msra.gmra.mrb[24].mxu0 %v1943_v36 }
 0x648   : > { %4359 = vmatpush3.bf16.msra.mxu0 %v4706_v34  ;;  %4374 = vmatprep.mubr.msk.bf16.mxu0 %vm5072_vm1, %v5071_v3 }
 0x649   : > { %4360 = vmatprep.subr.bf16.mxu0 %v5071_v3 }
 0x64c   : > { %4361 = vmatpush3.bf16.msra.mxu0 %v4710_v37 }
 0x64d   : > { %4362 = vmatprep.subr.bf16.mxu0 %v5071_v3 }
 0x650   : > { %4363 = vmatpush3.bf16.msra.mxu0 %v4714_v39 }
 0x651   : > { %4364 = vmatprep.subr.bf16.mxu0 %v5071_v3 }
 0x654   : > { %4365 = vmatpush3.bf16.msra.mxu0 %v4718_v40 }
 0x655   : > { %4366 = vmatprep.subr.bf16.mxu0 %v5071_v3 }
 0x658   : > { %4367 = vmatpush3.bf16.msra.mxu0 %v4722_v42 }
 0x659   : > { %4368 = vmatprep.subr.bf16.mxu0 %v5071_v3 }
 0x65c   : > { %4369 = vmatpush3.bf16.msra.mxu0 %v4726_v46 }
 0x65d   : > { %4370 = vmatprep.subr.bf16.mxu0 %v5071_v3 }
 0x660   : > { %4371 = vmatpush3.bf16.msra.mxu0 %v4730_v35 }
 0x661   : > { %4372 = vmatprep.subr.bf16.mxu0 %v5071_v3 }
 0x664   : > { %4373 = vmatpush3.bf16.msra.mxu0 %v4734_v38 }
 0x665   : > { %4378 = vmatprep.subr.bf16.mxu0 %v5071_v3 }
 0x71a   : > { %v2051_v53 = vpop.f32.mrb[24].mxu0 }
 0x71b   : > { %v2052_v54 = vadd.f32 %v3885_v52, %v2051_v53  ;;  %v4356_v55 = vpop.f32.mrb[25].mxu0 }
 0x71c   : > { %v2054_v56 = vpop.f32.mrb[26].mxu0 }
 0x71d   : > { %v2058_v57 = vadd.f32 %v2052_v54, %v5528_v43  ;;  %v2055_v58 = vadd.f32 %v3885_v52, %v2054_v56  ;;  %v4357_v59 = vpop.f32.mrb[27].mxu0  ;;  %v2097_v43 = vld [vmem:[%s6010_s10] sm:$0x7] }
 0x71e   : > { %v2110_v4 = vrot.slane %v2097_v43, %v2109_v1  ;;  %v2106_v7 = vrot.slane %v2097_v43, %v2105_v2 }
 0x71f   : > { %2060 = vst [vmem:[#allocation2 + $0x8] sm:$0xff] %v2058_v57  ;;  %v2059_v60 = vadd.f32 %v2055_v58, %v5532_v45  ;;  %v2102_v45 = vrot.slane %v2097_v43, %v2101_v0 }
 0x721   : > { %2061 = vst [vmem:[#allocation2 + $0x10] sm:$0xff] %v2059_v60  ;;  %v2064_v61 = vpack.c.bf16 %v2059_v60, %v2058_v57 }
 0x723   : > { %2275 = vmatmul.mubr.bf16.vlgmr.msra.gmra.mrb[24].mxu1 %v2064_v61  ;;  %4375 = vmatmul.mubr.bf16.vlgmr.msra.gmra.mrb[28].mxu0 %v2064_v61 }
 0x724   : > { %4380 = vmatprep.mubr.msk.bf16.mxu0 %vm5072_vm1, %v5071_v3  ;;  %4392 = vmatprep.mubr.msk.bf16.mxu1 %vm5072_vm1, %v5071_v3 }
 0x7f6   : > { %v2276_v5 = vpop.f32.mrb[24].mxu1  ;;  %v2319_v6 = vpop.f32.mrb[28].mxu0 }
 0x7f7   : > { %v2278_v8 = vpop.f32.mrb[25].mxu1  ;;  %v4376_v9 = vpop.f32.mrb[29].mxu0  ;;  %v2277_v12 = vadd.f32 %v2276_v5, %v2102_v45  ;;  %v2320_v13 = vadd.f32 %v2319_v6, %v2110_v4 }
 0x7f8   : > { %v2280_v10 = vpop.f32.mrb[26].mxu1  ;;  %v2322_v11 = vpop.f32.mrb[30].mxu0  ;;  %v2279_v18 = vadd.f32 %v2278_v8, %v2106_v7 }
 0x7f9   : > { %v2281_v14 = vadd.f32 %v2280_v10, %v2102_v45  ;;  %v2323_v15 = vadd.f32 %v2322_v11, %v2110_v4  ;;  %v2282_v16 = vpop.f32.mrb[27].mxu1  ;;  %v4377_v17 = vpop.f32.mrb[31].mxu0 }
 0x7fa   : > { %v2283_v19 = vadd.f32 %v2282_v16, %v2106_v7 }
 0x7fb   : > { %v2326_v20 = vpack.c.bf16 %v2281_v14, %v2277_v12  ;;  %v5582_v21 = vpack.c.bf16 %v2323_v15, %v2320_v13 }
 0x7fc   : > { %v2327_v22 = vpack.c.bf16 %v2283_v19, %v2279_v18 }
 0x7fe   : > { %2596 = vrot.lane.b32.xlu1 %v2327_v22, %s5074_s18  ;;  %2461 = vrot.lane.b32.xlu0 %v2327_v22, %s5075_s0  ;;  %v2334_v23 = vsel %vm2329_vm3, %v2327_v22, 0 }
 0x7ff   : > { %4379 = vmatpush3.bf16.xpose.msra.mxu0 %v2334_v23 }
 0x800   : > { %4384 = vmatprep.subr.bf16.mxu0 %v5071_v3 }
 0x802   : > { %2594 = vrot.lane.b32.xlu1 %v2326_v20, %s5074_s18  ;;  %2458 = vrot.lane.b32.xlu0 %v2326_v20, %s5075_s0 }
 0x806   : > { %2728 = vrot.lane.b32.xlu1 %v2326_v20, %s5076_s24  ;;  %2730 = vrot.lane.b32.xlu0 %v2327_v22, %s5076_s24 }
 0x807   : > { %4381 = vmatmul.mubr.msk.bf16.vlgmr.msra.gmra.mrb[32].mxu0 %vm2329_vm3, %v2326_v20 }
 0x808   : > { %4385 = vmatpush3.bf16.msra.mxu0 %v5582_v21  ;;  %4386 = vmatprep.mubr.msk.bf16.mxu0 %vm5072_vm1, %v5071_v3 }
 0x809   : > { %4396 = vmatprep.subr.bf16.mxu0 %v5071_v3 }
 0x80a   : > { %2862 = vrot.lane.b32.xlu1 %v2326_v20, %s5077_s15  ;;  %2864 = vrot.lane.b32.xlu0 %v2327_v22, %s5077_s15 }
 0x80e   : > { %2996 = vrot.lane.b32.xlu1 %v2326_v20, %s5078_s26  ;;  %2998 = vrot.lane.b32.xlu0 %v2327_v22, %s5078_s26 }
 0x812   : > { %3130 = vrot.lane.b32.xlu1 %v2326_v20, %s5079_s29  ;;  %3132 = vrot.lane.b32.xlu0 %v2327_v22, %s5079_s29 }
 0x816   : > { %3264 = vrot.lane.b32.xlu1 %v2326_v20, %s5080_s20  ;;  %3266 = vrot.lane.b32.xlu0 %v2327_v22, %s5080_s20 }
 0x81a   : > { %2674 = vrot.lane.b32.xlu0 %v5582_v21, %s5074_s18  ;;  %2540 = vrot.lane.b32.xlu1 %v5582_v21, %s5075_s0 }
 0x81e   : > { %2808 = vrot.lane.b32.xlu1 %v5582_v21, %s5076_s24 }
 0x870   : > { %v2462_v24 = vpop.permute.xlu0 %2461  ;;  %v2597_v27 = vpop.permute.xlu1 %2596 }
 0x871   : > { %v2467_v26 = vsel %vm2329_vm3, %v2462_v24, 0  ;;  %v2602_v30 = vsel %vm2329_vm3, %v2597_v27, 0 }
 0x872   : > { %4391 = vmatpush3.bf16.xpose.msra.mxu1 %v2467_v26 }
 0x873   : > { %4402 = vmatprep.subr.bf16.mxu1 %v5071_v3 }
 0x874   : > { %v2459_v29 = vpop.permute.xlu0 %2458  ;;  %v2595_v32 = vpop.permute.xlu1 %2594 }
 0x878   : > { %v2731_v31 = vpop.permute.xlu0 %2730  ;;  %v2729_v36 = vpop.permute.xlu1 %2728 }
 0x879   : > { %4393 = vmatmul.mubr.msk.bf16.vlgmr.msra.gmra.mrb[28].mxu1 %vm2329_vm3, %v2459_v29  ;;  %v2736_v33 = vsel %vm2329_vm3, %v2731_v31, 0 }
 0x87a   : > { %4403 = vmatpush3.bf16.xpose.msra.mxu1 %v2602_v30  ;;  %4404 = vmatprep.mubr.msk.bf16.mxu1 %vm5072_vm1, %v5071_v3 }
 0x87b   : > { %4414 = vmatprep.subr.bf16.mxu1 %v5071_v3 }
 0x87c   : > { %v2865_v34 = vpop.permute.xlu0 %2864  ;;  %v2863_v40 = vpop.permute.xlu1 %2862 }
 0x87d   : > { %v2870_v37 = vsel %vm2329_vm3, %v2865_v34, 0 }
 0x880   : > { %v2999_v39 = vpop.permute.xlu0 %2998  ;;  %v2997_v42 = vpop.permute.xlu1 %2996 }
 0x881   : > { %4405 = vmatmul.mubr.msk.bf16.vlgmr.msra.gmra.mrb[32].mxu1 %vm2329_vm3, %v2595_v32  ;;  %v3004_v41 = vsel %vm2329_vm3, %v2999_v39, 0 }
 0x882   : > { %4415 = vmatpush3.bf16.xpose.msra.mxu1 %v2736_v33  ;;  %4416 = vmatprep.mubr.msk.bf16.mxu1 %vm5072_vm1, %v5071_v3 }
 0x883   : > { %4426 = vmatprep.subr.bf16.mxu1 %v5071_v3 }
 0x884   : > { %v3133_v25 = vpop.permute.xlu0 %3132  ;;  %v3131_v46 = vpop.permute.xlu1 %3130 }
 0x885   : > { %v3138_v28 = vsel %vm2329_vm3, %v3133_v25, 0 }
 0x888   : > { %v3267_v44 = vpop.permute.xlu0 %3266  ;;  %v3265_v48 = vpop.permute.xlu1 %3264 }
 0x889   : > { %4417 = vmatmul.mubr.msk.bf16.vlgmr.msra.gmra.mrb[36].mxu1 %vm2329_vm3, %v2729_v36  ;;  %v3272_v47 = vsel %vm2329_vm3, %v3267_v44, 0 }
 0x88a   : > { %4427 = vmatpush3.bf16.xpose.msra.mxu1 %v2870_v37  ;;  %4428 = vmatprep.mubr.msk.bf16.mxu1 %vm5072_vm1, %v5071_v3 }
 0x88b   : > { %4438 = vmatprep.subr.bf16.mxu1 %v5071_v3 }
 0x88c   : > { %v2541_v6 = vpop.permute.xlu1 %2540  ;;  %v5674_v8 = vpop.permute.xlu0 %2674 }
 0x890   : > { %v5680_v12 = vpop.permute.xlu1 %2808 }
 0x891   : > { %4429 = vmatmul.mubr.msk.bf16.vlgmr.msra.gmra.mrb[40].mxu1 %vm2329_vm3, %v2863_v40 }
 0x892   : > { %4439 = vmatpush3.bf16.xpose.msra.mxu1 %v3004_v41  ;;  %4440 = vmatprep.mubr.msk.bf16.mxu1 %vm5072_vm1, %v5071_v3 }
 0x893   : > { %4450 = vmatprep.subr.bf16.mxu1 %v5071_v3 }
 0x899   : > { %4441 = vmatmul.mubr.msk.bf16.vlgmr.msra.gmra.mrb[44].mxu1 %vm2329_vm3, %v2997_v42 }
 0x89a   : > { %4451 = vmatpush3.bf16.xpose.msra.mxu1 %v3138_v28  ;;  %4452 = vmatprep.mubr.msk.bf16.mxu1 %vm5072_vm1, %v5071_v3 }
 0x89b   : > { %4462 = vmatprep.subr.bf16.mxu1 %v5071_v3 }
 0x8a1   : > { %4453 = vmatmul.mubr.msk.bf16.vlgmr.msra.gmra.mrb[48].mxu1 %vm2329_vm3, %v3131_v46 }
 0x8a2   : > { %4463 = vmatpush3.bf16.xpose.msra.mxu1 %v3272_v47  ;;  %4464 = vmatprep.mubr.msk.bf16.mxu1 %vm5072_vm1, %v5071_v3 }
 0x8a3   : > { %4474 = vmatprep.subr.bf16.mxu1 %v5071_v3 }
 0x8a9   : > { %4465 = vmatmul.mubr.msk.bf16.vlgmr.msra.gmra.mrb[52].mxu1 %vm2329_vm3, %v3265_v48 }
 0x8aa   : > { %4490 = vmatprep.mubr.msk.bf16.mxu1 %vm5072_vm1, %v5071_v3 }
 0x8da   : > { %v2370_v35 = vpop.f32.mrb[32].mxu0 }
 0x8db   : > { %v4382_v49 = vpop.f32.mrb[33].mxu0  ;;  %v2377_v50 = vsel %vm2329_vm3, %v2370_v35, -inf }
 0x8dc   : > { %2378 = vmax.xlane.f32.xlu0 %v2377_v50  ;;  %v2373_v38 = vpop.f32.mrb[34].mxu0 }
 0x8dd   : > { %v4383_v51 = vpop.f32.mrb[35].mxu0  ;;  %v2380_v52 = vsel %vm2329_vm3, %v2373_v38, -inf }
 0x8de   : > { %2381 = vmax.xlane.f32.xlu1 %v2380_v52 }
 0x94c   : > { %v5648_v53 = vpop.f32.mrb[28].mxu1 }
 0x94d   : > { %v4394_v54 = vpop.f32.mrb[29].mxu1  ;;  %v2510_v55 = vsel %vm2329_vm3, %v5648_v53, -inf }
 0x94e   : > { %v5652_v56 = vpop.f32.mrb[30].mxu1  ;;  %2511 = vmax.xlane.f32.xlu0 %v2510_v55 }
 0x94f   : > { %v4395_v57 = vpop.f32.mrb[31].mxu1  ;;  %v2513_v58 = vsel %vm2329_vm3, %v5652_v56, -inf }
 0x952   : > { %2514 = vmax.xlane.f32.xlu0 %v2513_v58 }
 0x954   : > { %v5656_v59 = vpop.f32.mrb[32].mxu1 }
 0x955   : > { %v4406_v60 = vpop.f32.mrb[33].mxu1  ;;  %v2645_v61 = vsel %vm2329_vm3, %v5656_v59, -inf }
 0x956   : > { %v5660_v62 = vpop.f32.mrb[34].mxu1  ;;  %2646 = vmax.xlane.f32.xlu1 %v2645_v61 }
 0x957   : > { %v4407_v63 = vpop.f32.mrb[35].mxu1  ;;  %v2648_v0 = vsel %vm2329_vm3, %v5660_v62, -inf }
 0x958   : > { %2649 = vmax.xlane.f32.xlu0 %v2648_v0 }
 0x95c   : > { %v5664_v1 = vpop.f32.mrb[36].mxu1 }
 0x95d   : > { %v4418_v43 = vpop.f32.mrb[37].mxu1  ;;  %v2779_v2 = vsel %vm2329_vm3, %v5664_v1, -inf }
 0x95e   : > { %v5668_v45 = vpop.f32.mrb[38].mxu1  ;;  %2780 = vmax.xlane.f32.xlu1 %v2779_v2 }
 0x95f   : > { %v4419_v4 = vpop.f32.mrb[39].mxu1  ;;  %v2782_v5 = vsel %vm2329_vm3, %v5668_v45, -inf }
 0x960   : > { %2783 = vmax.xlane.f32.xlu0 %v2782_v5 }
 0x964   : > { %v5672_v7 = vpop.f32.mrb[40].mxu1 }
 0x965   : > { %v4430_v9 = vpop.f32.mrb[41].mxu1  ;;  %v2913_v10 = vsel %vm2329_vm3, %v5672_v7, -inf }
 0x966   : > { %v5678_v11 = vpop.f32.mrb[42].mxu1  ;;  %2914 = vmax.xlane.f32.xlu1 %v2913_v10 }
 0x967   : > { %v4431_v13 = vpop.f32.mrb[43].mxu1  ;;  %v2916_v14 = vsel %vm2329_vm3, %v5678_v11, -inf }
 0x968   : > { %2917 = vmax.xlane.f32.xlu0 %v2916_v14 }
 0x969   : > { %v5684_v15 = vpop.xlane.xlu0 %2378 }
 0x96a   : > { %v2389_v16 = vsub.f32 %v2370_v35, %v5684_v15 }
 0x96b   : > { %v5687_v17 = vpop.xlane.xlu1 %2381 }
 0x96c   : > { %v2391_v18 = vmul.f32 1.442695, %v2389_v16  ;;  %v2390_v19 = vsub.f32 %v2373_v38, %v5687_v17  ;;  %v5690_v20 = vpop.f32.mrb[44].mxu1 }
 0x96d   : > { %v4442_v22 = vpop.f32.mrb[45].mxu1  ;;  %v3047_v23 = vsel %vm2329_vm3, %v5690_v20, -inf }
 0x96e   : > { %v2393_v24 = vmul.f32 1.442695, %v2390_v19  ;;  %v5694_v26 = vpop.f32.mrb[46].mxu1  ;;  %3048 = vmax.xlane.f32.xlu0 %v3047_v23  ;;  %4743 = vpow2.f32 %v2391_v18 }
 0x96f   : > { %v4443_v27 = vpop.f32.mrb[47].mxu1  ;;  %v3050_v29 = vsel %vm2329_vm3, %v5694_v26, -inf }
 0x970   : > { %4745 = vpow2.f32 %v2393_v24 }
 0x972   : > { %3051 = vmax.xlane.f32.xlu0 %v3050_v29 }
 0x974   : > { %v5698_v30 = vpop.f32.mrb[48].mxu1 }
 0x975   : > { %v4454_v31 = vpop.f32.mrb[49].mxu1  ;;  %v3181_v46 = vsel %vm2329_vm3, %v5698_v30, -inf }
 0x976   : > { %v5700_v32 = vpop.f32.mrb[50].mxu1 }
 0x977   : > { %v4455_v33 = vpop.f32.mrb[51].mxu1  ;;  %2942 = vrot.lane.b32.xlu1 %v5582_v21, %s5077_s15  ;;  %v3184_v34 = vsel %vm2329_vm3, %v5700_v32, -inf }
 0x978   : > { %3185 = vmax.xlane.f32.xlu0 %v3184_v34  ;;  %v5706_v36 = vpop.eup %4743 }
 0x97a   : > { %v5708_v37 = vpop.eup %4745 }
 0x97b   : > { %v2405_v39 = vpack.c.bf16 %v5708_v37, %v5706_v36 }
 0x97c   : > { %v5712_v40 = vpop.f32.mrb[52].mxu1 }
 0x97d   : > { %v4466_v41 = vpop.f32.mrb[53].mxu1  ;;  %v3315_v25 = vsel %vm2329_vm3, %v5712_v40, -inf  ;;  %4387 = vmatmul.mubr.msk.bf16.vlgmr.msra.gmra.mrb[36].mxu0 %vm2329_vm3, %v2405_v39 }
 0x97e   : > { %v5717_v42 = vpop.f32.mrb[54].mxu1  ;;  %3316 = vmax.xlane.f32.xlu0 %v3315_v25  ;;  %4397 = vmatpush3.bf16.msra.mxu0 %v2541_v6 }
 0x97f   : > { %v4467_v28 = vpop.f32.mrb[55].mxu1  ;;  %4398 = vmatprep.mubr.msk.bf16.mxu0 %vm5072_vm1, %v5071_v3  ;;  %4408 = vmatprep.subr.bf16.mxu0 %v5071_v3  ;;  %v3318_v44 = vsel %vm2329_vm3, %v5717_v42, -inf }
 0x982   : > { %3319 = vmax.xlane.f32.xlu0 %v3318_v44 }
 0x998   : > { %3076 = vrot.lane.b32.xlu0 %v5582_v21, %s5078_s26 }
 0x99b   : > { %3182 = vmax.xlane.f32.xlu1 %v3181_v46 }
 0x9ac   : > { %3210 = vrot.lane.b32.xlu1 %v5582_v21, %s5079_s29 }
 0x9b0   : > { %3344 = vrot.lane.b32.xlu1 %v5582_v21, %s5080_s20 }
 0x9db   : > { %v5732_v47 = vpop.xlane.xlu0 %2511 }
 0x9dc   : > { %v2522_v48 = vsub.f32 %v5648_v53, %v5732_v47 }
 0x9de   : > { %v2524_v35 = vmul.f32 1.442695, %v2522_v48 }
 0x9df   : > { %v5736_v49 = vpop.xlane.xlu0 %2514 }
 0x9e0   : > { %v2523_v50 = vsub.f32 %v5652_v56, %v5736_v49  ;;  %4747 = vpow2.f32 %v2524_v35 }
 0x9e2   : > { %v2526_v38 = vmul.f32 1.442695, %v2523_v50 }
 0x9e3   : > { %v5740_v51 = vpop.xlane.xlu1 %2646 }
 0x9e4   : > { %v2657_v52 = vsub.f32 %v5656_v59, %v5740_v51  ;;  %4749 = vpow2.f32 %v2526_v38 }
 0x9e5   : > { %v5744_v21 = vpop.xlane.xlu0 %2649 }
 0x9e6   : > { %v2659_v54 = vmul.f32 1.442695, %v2657_v52  ;;  %v2658_v53 = vsub.f32 %v5660_v62, %v5744_v21 }
 0x9e8   : > { %v2661_v55 = vmul.f32 1.442695, %v2658_v53  ;;  %4751 = vpow2.f32 %v2659_v54 }
 0x9ea   : > { %v4748_v57 = vpop.eup %4747  ;;  %4753 = vpow2.f32 %v2661_v55 }
 0x9eb   : > { %v5748_v58 = vpop.xlane.xlu1 %2780  ;;  %v2530_v60 = vsel %vm2329_vm3, %v4748_v57, 0.0 }
 0x9ec   : > { %v2791_v56 = vsub.f32 %v5664_v1, %v5748_v58  ;;  %2531 = vadd.xlane.f32.xlu1 %v2530_v60 }
 0x9ed   : > { %v5753_v59 = vpop.xlane.xlu0 %2783 }
 0x9ee   : > { %v2793_v61 = vmul.f32 1.442695, %v2791_v56  ;;  %v2792_v63 = vsub.f32 %v5668_v45, %v5753_v59  ;;  %v4750_v0 = vpop.eup %4749 }
 0x9ef   : > { %v2533_v43 = vsel %vm2329_vm3, %v4750_v0, 0.0  ;;  %v2538_v2 = vpack.c.bf16 %v4750_v0, %v4748_v57 }
 0x9f0   : > { %v2795_v62 = vmul.f32 1.442695, %v2792_v63  ;;  %4755 = vpow2.f32 %v2793_v61  ;;  %2534 = vadd.xlane.f32.xlu0 %v2533_v43 }
 0x9f1   : > { %4399 = vmatmul.mubr.msk.bf16.vlgmr.msra.gmra.mrb[40].mxu0 %vm2329_vm3, %v2538_v2 }
 0x9f2   : > { %v4752_v4 = vpop.eup %4751  ;;  %4757 = vpow2.f32 %v2795_v62  ;;  %4409 = vmatpush3.bf16.msra.mxu0 %v5674_v8  ;;  %4410 = vmatprep.mubr.msk.bf16.mxu0 %vm5072_vm1, %v5071_v3  ;;  %v2400_v62 = vsel %vm2329_vm3, %v5708_v37, 0.0  ;;  %v2397_v37 = vsel %vm2329_vm3, %v5706_v36, 0.0 }
 0x9f3   : > { %v5759_v1 = vpop.xlane.xlu1 %2914  ;;  %v2665_v45 = vsel %vm2329_vm3, %v4752_v4, 0.0  ;;  %4420 = vmatprep.subr.bf16.mxu0 %v5071_v3 }
 0x9f4   : > { %v2925_v5 = vsub.f32 %v5672_v7, %v5759_v1  ;;  %v4754_v6 = vpop.eup %4753  ;;  %2666 = vadd.xlane.f32.xlu1 %v2665_v45 }
 0x9f5   : > { %v5767_v9 = vpop.xlane.xlu0 %2917  ;;  %v2673_v14 = vpack.c.bf16 %v4754_v6, %v4752_v4  ;;  %v2668_v16 = vsel %vm2329_vm3, %v4754_v6, 0.0 }
 0x9f6   : > { %v2927_v10 = vmul.f32 1.442695, %v2925_v5  ;;  %v2926_v13 = vsub.f32 %v5678_v11, %v5767_v9 }
 0x9f7   : > { %v2943_v33 = vpop.permute.xlu1 %2942 }
 0x9f8   : > { %v2929_v8 = vmul.f32 1.442695, %v2926_v13  ;;  %4759 = vpow2.f32 %v2927_v10  ;;  %2669 = vadd.xlane.f32.xlu1 %v2668_v16 }
 0x9f9   : > { %4411 = vmatmul.mubr.msk.bf16.vlgmr.msra.gmra.mrb[44].mxu0 %vm2329_vm3, %v2673_v14 }
 0x9fa   : > { %v4756_v7 = vpop.eup %4755  ;;  %4761 = vpow2.f32 %v2929_v8  ;;  %4421 = vmatpush3.bf16.msra.mxu0 %v5680_v12  ;;  %4422 = vmatprep.mubr.msk.bf16.mxu0 %vm5072_vm1, %v5071_v3 }
 0x9fb   : > { %v5774_v18 = vpop.xlane.xlu0 %3048  ;;  %v2799_v22 = vsel %vm2329_vm3, %v4756_v7, 0.0  ;;  %4432 = vmatprep.subr.bf16.mxu0 %v5071_v3 }
 0x9fc   : > { %v3059_v19 = vsub.f32 %v5690_v20, %v5774_v18  ;;  %v4758_v11 = vpop.eup %4757  ;;  %2800 = vadd.xlane.f32.xlu0 %v2799_v22  ;;  %v2517_v22 = vsub.f32 -inf, %v5736_v49 }
 0x9fd   : > { %v2802_v24 = vsel %vm2329_vm3, %v4758_v11, 0.0  ;;  %v2807_v27 = vpack.c.bf16 %v4758_v11, %v4756_v7 }
 0x9fe   : > { %v3061_v23 = vmul.f32 1.442695, %v3059_v19  ;;  %2803 = vadd.xlane.f32.xlu1 %v2802_v24  ;;  %v2516_v19 = vsub.f32 -inf, %v5732_v47  ;;  %v2520_v24 = vmul.f32 1.442695, %v2517_v22  ;;  %v2786_v47 = vsub.f32 -inf, %v5753_v59 }
 0x9ff   : > { %v5784_v29 = vpop.xlane.xlu0 %3051  ;;  %v2919_v59 = vsub.f32 -inf, %v5759_v1 }
 0xa00   : > { %v3060_v12 = vsub.f32 %v5694_v26, %v5784_v29  ;;  %4763 = vpow2.f32 %v3061_v23  ;;  %v2518_v23 = vmul.f32 1.442695, %v2516_v19 }
 0xa01   : > { %4423 = vmatmul.mubr.msk.bf16.vlgmr.msra.gmra.mrb[48].mxu0 %vm2329_vm3, %v2807_v27  ;;  %v2651_v27 = vsub.f32 -inf, %v5740_v51  ;;  %v2789_v51 = vmul.f32 1.442695, %v2786_v47 }
 0xa02   : > { %v3063_v20 = vmul.f32 1.442695, %v3060_v12  ;;  %v4760_v31 = vpop.eup %4759  ;;  %4433 = vmatpush3.bf16.msra.mxu0 %v2943_v33  ;;  %4434 = vmatprep.mubr.msk.bf16.mxu0 %vm5072_vm1, %v5071_v3  ;;  %v2652_v12 = vsub.f32 -inf, %v5744_v21 }
 0xa03   : > { %v2933_v34 = vsel %vm2329_vm3, %v4760_v31, 0.0  ;;  %4444 = vmatprep.subr.bf16.mxu0 %v5071_v3 }
 0xa04   : > { %v4762_v39 = vpop.eup %4761  ;;  %4765 = vpow2.f32 %v3063_v20  ;;  %2934 = vadd.xlane.f32.xlu0 %v2933_v34  ;;  %v2653_v20 = vmul.f32 1.442695, %v2651_v27  ;;  %v2655_v33 = vmul.f32 1.442695, %v2652_v12  ;;  %v2785_v34 = vsub.f32 -inf, %v5748_v58 }
 0xa05   : > { %v5792_v41 = vpop.xlane.xlu0 %3185  ;;  %v2936_v25 = vsel %vm2329_vm3, %v4762_v39, 0.0  ;;  %v2941_v28 = vpack.c.bf16 %v4762_v39, %v4760_v31 }
 0xa06   : > { %v3194_v26 = vsub.f32 %v5700_v32, %v5792_v41  ;;  %2937 = vadd.xlane.f32.xlu1 %v2936_v25  ;;  %v2787_v25 = vmul.f32 1.442695, %v2785_v34 }
 0xa08   : > { %v3197_v44 = vmul.f32 1.442695, %v3194_v26  ;;  %v2384_v26 = vsub.f32 -inf, %v5687_v17 }
 0xa09   : > { %4435 = vmatmul.mubr.msk.bf16.vlgmr.msra.gmra.mrb[52].mxu0 %vm2329_vm3, %v2941_v28 }
 0xa0a   : > { %v4764_v46 = vpop.eup %4763  ;;  %4767 = vpow2.f32 %v3197_v44  ;;  %4446 = vmatprep.mubr.msk.bf16.mxu0 %vm5072_vm1, %v5071_v3 }
 0xa0b   : > { %v5799_v48 = vpop.xlane.xlu0 %3316  ;;  %v3067_v50 = vsel %vm2329_vm3, %v4764_v46, 0.0 }
 0xa0c   : > { %v3327_v35 = vsub.f32 %v5712_v40, %v5799_v48  ;;  %3068 = vadd.xlane.f32.xlu0 %v3067_v50  ;;  %v2387_v50 = vmul.f32 1.442695, %v2384_v26 }
 0xa0e   : > { %v4766_v32 = vpop.eup %4765  ;;  %v3329_v52 = vmul.f32 1.442695, %v3327_v35  ;;  %v2383_v35 = vsub.f32 -inf, %v5684_v15 }
 0xa0f   : > { %v5806_v38 = vpop.xlane.xlu0 %3319  ;;  %v3070_v53 = vsel %vm2329_vm3, %v4766_v32, 0.0  ;;  %v3075_v55 = vpack.c.bf16 %v4766_v32, %v4764_v46 }
 0xa10   : > { %v3328_v54 = vsub.f32 %v5717_v42, %v5806_v38  ;;  %3071 = vadd.xlane.f32.xlu1 %v3070_v53  ;;  %4769 = vpow2.f32 %v3329_v52 }
 0xa12   : > { %v3331_v57 = vmul.f32 1.442695, %v3328_v54 }
 0xa13   : > { %v3077_v56 = vpop.permute.xlu0 %3076 }
 0xa14   : > { %4445 = vmatpush3.bf16.msra.mxu0 %v3077_v56  ;;  %v4768_v40 = vpop.eup %4767  ;;  %4771 = vpow2.f32 %v3331_v57  ;;  %v2920_v57 = vsub.f32 -inf, %v5767_v9 }
 0xa15   : > { %4456 = vmatprep.subr.bf16.mxu0 %v5071_v3  ;;  %v3204_v60 = vsel %vm2329_vm3, %v4768_v40, 0.0 }
 0xa16   : > { %3205 = vadd.xlane.f32.xlu1 %v3204_v60  ;;  %v2923_v1 = vmul.f32 1.442695, %v2920_v57 }
 0xa17   : > { %4447 = vmatmul.mubr.msk.bf16.vlgmr.msra.gmra.mrb[56].mxu0 %vm2329_vm3, %v3075_v55  ;;  %v2385_v55 = vmul.f32 1.442695, %v2383_v35 }
 0xa18   : > { %4458 = vmatprep.mubr.msk.bf16.mxu0 %vm5072_vm1, %v5071_v3 }
 0xa1a   : > { %v4770_v42 = vpop.eup %4769 }
 0xa1e   : > { %v4772_v61 = vpop.eup %4771 }
 0xa1f   : > { %v3338_v63 = vsel %vm2329_vm3, %v4772_v61, 0.0  ;;  %v3343_v0 = vpack.c.bf16 %v4772_v61, %v4770_v42 }
 0xa20   : > { %3339 = vadd.xlane.f32.xlu1 %v3338_v63 }
 0xa24   : > { %2401 = vadd.xlane.f32.xlu1 %v2400_v62 }
 0xa28   : > { %v5819_v43 = vpop.xlane.xlu1 %3182 }
 0xa29   : > { %v3193_v2 = vsub.f32 %v5698_v30, %v5819_v43  ;;  %v3335_v30 = vsel %vm2329_vm3, %v4770_v42, 0.0 }
 0xa2b   : > { %v3195_v4 = vmul.f32 1.442695, %v3193_v2 }
 0xa2c   : > { %v3211_v5 = vpop.permute.xlu1 %3210 }
 0xa2d   : > { %4457 = vmatpush3.bf16.msra.mxu0 %v3211_v5  ;;  %4773 = vpow2.f32 %v3195_v4  ;;  %v3053_v5 = vsub.f32 -inf, %v5774_v18 }
 0xa2e   : > { %4468 = vmatprep.subr.bf16.mxu0 %v5071_v3  ;;  %4775 = vpow2.f32 %v2518_v23 }
 0xa2f   : > { %4777 = vpow2.f32 %v2520_v24  ;;  %v3055_v22 = vmul.f32 1.442695, %v3053_v5 }
 0xa30   : > { %v3345_v13 = vpop.permute.xlu1 %3344  ;;  %4779 = vpow2.f32 %v2653_v20 }
 0xa31   : > { %4781 = vpow2.f32 %v2655_v33 }
 0xa32   : > { %4783 = vpow2.f32 %v2787_v25 }
 0xa33   : > { %4785 = vpow2.f32 %v2789_v51 }
 0xa34   : > { %4787 = vpow2.f32 %v2387_v50 }
 0xa37   : > { %v4774_v45 = vpop.eup %4773 }
 0xa38   : > { %v3201_v6 = vsel %vm2329_vm3, %v4774_v45, 0.0  ;;  %v3209_v10 = vpack.c.bf16 %v4768_v40, %v4774_v45  ;;  %v4776_v49 = vpop.eup %4775  ;;  %v2921_v40 = vmul.f32 1.442695, %v2919_v59 }
 0xa39   : > { %3202 = vadd.xlane.f32.xlu0 %v3201_v6  ;;  %v4778_v28 = vpop.eup %4777  ;;  %v2528_v21 = vmul.f32 0.0, %v4776_v49 }
 0xa3a   : > { %4459 = vmatmul.mubr.msk.bf16.vlgmr.msra.gmra.mrb[60].mxu0 %vm2329_vm3, %v3209_v10  ;;  %v2529_v32 = vmul.f32 0.0, %v4778_v28  ;;  %v4780_v53 = vpop.eup %4779 }
 0xa3b   : > { %4469 = vmatpush3.bf16.msra.mxu0 %v3345_v13  ;;  %4470 = vmatprep.mubr.msk.bf16.mxu0 %vm5072_vm1, %v5071_v3  ;;  %v4782_v56 = vpop.eup %4781  ;;  %v2663_v42 = vmul.f32 0.0, %v4780_v53 }
 0xa3c   : > { %4494 = vmatprep.subr.bf16.mxu0 %v5071_v3  ;;  %v2664_v63 = vmul.f32 0.0, %v4782_v56  ;;  %v4784_v2 = vpop.eup %4783 }
 0xa3d   : > { %3336 = vadd.xlane.f32.xlu0 %v3335_v30  ;;  %v4786_v4 = vpop.eup %4785 }
 0xa3e   : > { %v4788_v6 = vpop.eup %4787 }
 0xa3f   : > { %v2396_v12 = vmul.f32 0.0, %v4788_v6 }
 0xa41   : > { %2398 = vadd.xlane.f32.xlu0 %v2397_v37 }
 0xa42   : > { %4471 = vmatmul.mubr.msk.bf16.vlgmr.msra.gmra.mrb[64].mxu0 %vm2329_vm3, %v3343_v0 }
 0xa43   : > { %4496 = vmatprep.mubr.msk.bf16.mxu0 %vm5072_vm1, %v5071_v3 }
 0xa50   : > { %v5835_v14 = vpop.f32.mrb[36].mxu0 }
 0xa51   : > { %v4388_v8 = vpop.f32.mrb[37].mxu0 }
 0xa52   : > { %v5837_v16 = vpop.f32.mrb[38].mxu0  ;;  %v2797_v8 = vmul.f32 0.0, %v4784_v2 }
 0xa53   : > { %v4389_v7 = vpop.f32.mrb[39].mxu0 }
 0xa54   : > { %v2798_v7 = vmul.f32 0.0, %v4786_v4 }
 0xa79   : > { %v2532_v11 = vpop.xlane.xlu1 %2531 }
 0xa7a   : > { %v2536_v58 = vadd.f32 %v2532_v11, %v2528_v21  ;;  %v3054_v11 = vsub.f32 -inf, %v5784_v29 }
 0xa7c   : > { %4789 = vrcp.f32 %v2536_v58  ;;  %v3057_v25 = vmul.f32 1.442695, %v3054_v11 }
 0xa7d   : > { %v2535_v44 = vpop.xlane.xlu0 %2534 }
 0xa7e   : > { %v2537_v17 = vadd.f32 %v2535_v44, %v2529_v32 }
 0xa80   : > { %4791 = vrcp.f32 %v2537_v17 }
 0xa81   : > { %v2667_v36 = vpop.xlane.xlu1 %2666  ;;  %4793 = vpow2.f32 %v2385_v55 }
 0xa82   : > { %v2671_v61 = vadd.f32 %v2667_v36, %v2663_v42  ;;  %4795 = vpow2.f32 %v2921_v40 }
 0xa83   : > { %4797 = vpow2.f32 %v2923_v1 }
 0xa84   : > { %4799 = vrcp.f32 %v2671_v61 }
 0xa85   : > { %v2670_v31 = vpop.xlane.xlu1 %2669 }
 0xa86   : > { %v2672_v9 = vadd.f32 %v2670_v31, %v2664_v63  ;;  %v4790_v37 = vpop.eup %4789 }
 0xa88   : > { %4801 = vrcp.f32 %v2672_v9 }
 0xa89   : > { %v2801_v52 = vpop.xlane.xlu0 %2800  ;;  %4803 = vpow2.f32 %v3055_v22 }
 0xa8a   : > { %v4792_v18 = vpop.eup %4791  ;;  %v2805_v20 = vadd.f32 %v2801_v52, %v2797_v8 }
 0xa8b   : > { %v5845_v39 = vpop.xlane.xlu1 %2803  ;;  %v4794_v31 = vpop.eup %4793 }
 0xa8c   : > { %v2806_v33 = vadd.f32 %v5845_v39, %v2798_v7  ;;  %v4796_v26 = vpop.eup %4795  ;;  %v2395_v51 = vmul.f32 0.0, %v4794_v31  ;;  %4805 = vrcp.f32 %v2805_v20 }
 0xa8d   : > { %v4798_v44 = vpop.eup %4797  ;;  %v2931_v39 = vmul.f32 0.0, %v4796_v26 }
 0xa8e   : > { %4807 = vrcp.f32 %v2806_v33  ;;  %v4800_v58 = vpop.eup %4799  ;;  %v2932_v56 = vmul.f32 0.0, %v4798_v44  ;;  %v3187_v44 = vsub.f32 -inf, %v5819_v43  ;;  %v4738_v43 = vld [vmem:[%s6011_s11 + $0x18] sm:$0xff]  }
 0xa91   : > { %v5855_v15 = vpop.xlane.xlu0 %2934 }
 0xa92   : > { %v4802_v55 = vpop.eup %4801  ;;  %v2939_v57 = vadd.f32 %v5855_v15, %v2931_v39 }
 0xa93   : > { %v5848_v46 = vpop.xlane.xlu1 %2937  ;;  %v4804_v2 = vpop.eup %4803 }
 0xa96   : > { %v4806_v5 = vpop.eup %4805 }
 0xa99   : > { %v5859_v0 = vpop.xlane.xlu0 %3068 }
 0xa9d   : > { %v5852_v54 = vpop.xlane.xlu1 %3071 }
 0xaa3   : > { %v5857_v60 = vpop.xlane.xlu1 %3205 }
 0xaad   : > { %v5861_v62 = vpop.xlane.xlu1 %3339 }
 0xab1   : > { %v2402_v23 = vpop.xlane.xlu1 %2401 }
 0xab2   : > { %v2404_v49 = vadd.f32 %v2402_v23, %v2396_v12  ;;  %v3065_v23 = vmul.f32 0.0, %v4804_v2  ;;  %v4740_v2 = vld [vmem:[%s6011_s11 + $0x28] sm:$0xff]  }
 0xab4   : > { %4809 = vrcp.f32 %v2404_v49 }
 0xab5   : > { %4811 = vpow2.f32 %v3057_v25 }
 0xac4   : > { %v2580_v45 = vpop.f32.mrb[40].mxu0 }
 0xac5   : > { %v2587_v10 = vadd.f32 %v2580_v45, %v2528_v21  ;;  %v4400_v13 = vpop.f32.mrb[41].mxu0  ;;  %v4808_v45 = vpop.eup %4807 }
 0xac6   : > { %v5864_v30 = vpop.xlane.xlu0 %3202  ;;  %v2583_v19 = vpop.f32.mrb[42].mxu0 }
 0xac7   : > { %v2591_v24 = vmul.f32 %v4790_v37, %v2587_v10  ;;  %v2588_v36 = vadd.f32 %v2583_v19, %v2529_v32  ;;  %v4401_v27 = vpop.f32.mrb[43].mxu0  ;;  %v4810_v13 = vpop.eup %4809  ;;  %v2450_v19 = vadd.f32 %v5835_v14, %v2395_v51 }
 0xac8   : > { %v4812_v37 = vpop.eup %4811  ;;  %v3073_v27 = vadd.f32 %v5859_v0, %v3065_v23 }
 0xac9   : > { %v2592_v34 = vmul.f32 %v4792_v18, %v2588_v36  ;;  %v3066_v18 = vmul.f32 0.0, %v4812_v37 }
 0xaca   : > { %v5868_v47 = vpop.xlane.xlu0 %3336 }
 0xacb   : > { %v2593_v28 = vpack.c.bf16 %v2592_v34, %v2591_v24 }
 0xacc   : > { %v2714_v29 = vpop.f32.mrb[44].mxu0 }
 0xacd   : > { %v2721_v21 = vadd.f32 %v2714_v29, %v2663_v42  ;;  %3399 = vrot.lane.b32.xlu0 %v2593_v28, %s5080_s20  ;;  %v4412_v35 = vpop.f32.mrb[45].mxu0  ;;  %v2940_v42 = vadd.f32 %v5848_v46, %v2932_v56  ;;  %v2451_v46 = vadd.f32 %v5837_v16, %v2396_v12  ;;  %v3074_v12 = vadd.f32 %v5852_v54, %v3066_v18  ;;  %v4736_v54 = vld [vmem:[%s6011_s11 + $0x8] sm:$0xff]  }
 0xace   : > { %v2399_v50 = vpop.xlane.xlu0 %2398  ;;  %v2717_v59 = vpop.f32.mrb[46].mxu0 }
 0xacf   : > { %v2403_v32 = vadd.f32 %v2399_v50, %v2395_v51  ;;  %v2725_v52 = vmul.f32 %v4800_v58, %v2721_v21  ;;  %v2722_v17 = vadd.f32 %v2717_v59, %v2664_v63  ;;  %v4413_v53 = vpop.f32.mrb[47].mxu0  ;;  %v5878_v36 = vmul.f32 %v4810_v13, %v2451_v46  ;;  %v4735_v51 = vld [vmem:[%s6011_s11] sm:$0xff]  }
 0xad0   : > { %4475 = vmatpush3.bf16.msra.mxu1 %v4735_v51 }
 0xad1   : > { %4813 = vrcp.f32 %v2403_v32  ;;  %v2726_v40 = vmul.f32 %v4802_v55, %v2722_v17  ;;  %4476 = vmatprep.subr.bf16.mxu1 %v5071_v3  ;;  %v3188_v32 = vsub.f32 -inf, %v5792_v41  ;;  %v3189_v55 = vmul.f32 1.442695, %v3187_v44  ;;  %v4739_v41 = vld [vmem:[%s6011_s11 + $0x20] sm:$0xff]  }
 0xad2   : > { %4815 = vrcp.f32 %v2939_v57 }
 0xad3   : > { %v2727_v1 = vpack.c.bf16 %v2726_v40, %v2725_v52  ;;  %4817 = vrcp.f32 %v2940_v42  ;;  %v3321_v42 = vsub.f32 -inf, %v5799_v48 }
 0xad4   : > { %v2848_v61 = vpop.f32.mrb[48].mxu0  ;;  %4819 = vrcp.f32 %v3073_v27  ;;  %4477 = vmatpush3.bf16.msra.mxu1 %v4736_v54 }
 0xad5   : > { %v2855_v9 = vadd.f32 %v2848_v61, %v2797_v8  ;;  %3402 = vrot.lane.b32.xlu1 %v2727_v1, %s5079_s29  ;;  %v4424_v4 = vpop.f32.mrb[49].mxu0  ;;  %4821 = vrcp.f32 %v3074_v12  ;;  %4478 = vmatprep.subr.bf16.mxu1 %v5071_v3  ;;  %v3322_v1 = vsub.f32 -inf, %v5806_v38  ;;  %v3323_v61 = vmul.f32 1.442695, %v3321_v42  ;;  %s6061_s29 = sld [smem:[#allocation28_spill]] }
 0xad6   : > { %v2851_v63 = vpop.f32.mrb[50].mxu0  ;;  %4823 = vpow2.f32 %v3189_v55 }
 0xad7   : > { %v2859_v6 = vmul.f32 %v4806_v5, %v2855_v9  ;;  %v2856_v10 = vadd.f32 %v2851_v63, %v2798_v7  ;;  %v4425_v15 = vpop.f32.mrb[51].mxu0  ;;  %v3325_v48 = vmul.f32 1.442695, %v3322_v1 }
 0xad9   : > { %v2860_v22 = vmul.f32 %v4808_v45, %v2856_v10 }
 0xadb   : > { %v4814_v11 = vpop.eup %4813  ;;  %v2861_v8 = vpack.c.bf16 %v2860_v22, %v2859_v6 }
 0xadc   : > { %v5876_v24 = vmul.f32 %v4814_v11, %v2450_v19  ;;  %v2982_v20 = vpop.f32.mrb[52].mxu0  ;;  %v4816_v16 = vpop.eup %4815  ;;  %v4741_v19 = vld [vmem:[%s6011_s11 + $0x30] sm:$0xff]  }
 0xadd   : > { %v2989_v7 = vadd.f32 %v2982_v20, %v2931_v39  ;;  %3405 = vrot.lane.b32.xlu1 %v2861_v8, %s5078_s26  ;;  %v4436_v31 = vpop.f32.mrb[53].mxu0  ;;  %v4818_v25 = vpop.eup %4817  ;;  %v4737_v39 = vld [vmem:[%s6011_s11 + $0x10] sm:$0xff]  }
 0xade   : > { %v2456_v14 = vpack.c.bf16 %v5878_v36, %v5876_v24  ;;  %v2985_v33 = vpop.f32.mrb[54].mxu0  ;;  %v4820_v50 = vpop.eup %4819  ;;  %4479 = vmatpush3.bf16.msra.mxu1 %v4737_v39  ;;  %v3934_v24 = vld [vmem:[%s6012_s12] ss:$0 sm:$0xff] }
 0xadf   : > { %v2993_v34 = vmul.f32 %v4816_v16, %v2989_v7  ;;  %v2990_v49 = vadd.f32 %v2985_v33, %v2932_v56  ;;  %v4437_v26 = vpop.f32.mrb[55].mxu0  ;;  %v4822_v53 = vpop.eup %4821  ;;  %v3191_v56 = vmul.f32 1.442695, %v3188_v32  ;;  %4480 = vmatprep.subr.bf16.mxu1 %v5071_v3 }
 0xae0   : > { %v4824_v9 = vpop.eup %4823 }
 0xae1   : > { %v2994_v28 = vmul.f32 %v4818_v25, %v2990_v49  ;;  %4825 = vpow2.f32 %v3191_v56  ;;  %v3199_v5 = vmul.f32 0.0, %v4824_v9 }
 0xae2   : > { %4481 = vmatpush3.bf16.msra.mxu1 %v4738_v43  ;;  %4827 = vpow2.f32 %v3323_v61 }
 0xae3   : > { %v2995_v0 = vpack.c.bf16 %v2994_v28, %v2993_v34  ;;  %4482 = vmatprep.subr.bf16.mxu1 %v5071_v3  ;;  %4829 = vpow2.f32 %v3325_v48  ;;  %v3207_v63 = vadd.f32 %v5864_v30, %v3199_v5  ;;  %v4742_v30 = vld [vmem:[%s6011_s11 + $0x38] sm:$0xff]  }
 0xae5   : > { %3408 = vrot.lane.b32.xlu0 %v2995_v0, %s5077_s15  ;;  %4831 = vrcp.f32 %v3207_v63 }
 0xae6   : > { %4483 = vmatpush3.bf16.msra.mxu1 %v4739_v41 }
 0xae7   : > { %4484 = vmatprep.subr.bf16.mxu1 %v5071_v3 }
 0xaea   : > { %v3116_v29 = vpop.f32.mrb[56].mxu0  ;;  %4485 = vmatpush3.bf16.msra.mxu1 %v4740_v2 }
 0xaeb   : > { %v3123_v21 = vadd.f32 %v3116_v29, %v3065_v23  ;;  %v4448_v35 = vpop.f32.mrb[57].mxu0  ;;  %4486 = vmatprep.subr.bf16.mxu1 %v5071_v3  ;;  %v4826_v4 = vpop.eup %4825 }
 0xaec   : > { %v3119_v58 = vpop.f32.mrb[58].mxu0  ;;  %v3200_v38 = vmul.f32 0.0, %v4826_v4  ;;  %v4828_v6 = vpop.eup %4827  ;;  %v3598_v4 = vld [vmem:[%s6016_s16] sm:$0xff] }
 0xaed   : > { %v3127_v59 = vmul.f32 %v4820_v50, %v3123_v21  ;;  %v3124_v52 = vadd.f32 %v3119_v58, %v3066_v18  ;;  %v4449_v17 = vpop.f32.mrb[59].mxu0  ;;  %v4830_v10 = vpop.eup %4829  ;;  %v3333_v15 = vmul.f32 0.0, %v4828_v6 }
 0xaee   : > { %v3208_v45 = vadd.f32 %v5857_v60, %v3200_v38  ;;  %v3334_v13 = vmul.f32 0.0, %v4830_v10  ;;  %4487 = vmatpush3.bf16.msra.mxu1 %v4741_v19 }
 0xaef   : > { %v3128_v57 = vmul.f32 %v4822_v53, %v3124_v52  ;;  %v3341_v37 = vadd.f32 %v5868_v47, %v3333_v15  ;;  %4488 = vmatprep.subr.bf16.mxu1 %v5071_v3  ;;  %v4832_v23 = vpop.eup %4831 }
 0xaf0   : > { %4833 = vrcp.f32 %v3208_v45  ;;  %v3342_v46 = vadd.f32 %v5861_v62, %v3334_v13 }
 0xaf1   : > { %v3129_v40 = vpack.c.bf16 %v3128_v57, %v3127_v59  ;;  %4835 = vrcp.f32 %v3341_v37 }
 0xaf2   : > { %4837 = vrcp.f32 %v3342_v46  ;;  %4489 = vmatpush3.bf16.msra.mxu1 %v4742_v30  ;;  %v3944_v30 = vld [vmem:[%s6061_s29] ss:$0 sm:$0xff] }
 0xaf3   : > { %3411 = vrot.lane.b32.xlu1 %v3129_v40, %s5076_s24 }
 0xafa   : > { %v4834_v20 = vpop.eup %4833 }
 0xafb   : > { %v4836_v3 = vpop.eup %4835 }
 0xafc   : > { %v4838_v25 = vpop.eup %4837 }
 0xb0d   : > { %v3250_v60 = vpop.f32.mrb[60].mxu0 }
 0xb0e   : > { %v3257_v22 = vadd.f32 %v3250_v60, %v3199_v5  ;;  %v4460_v11 = vpop.f32.mrb[61].mxu0 }
 0xb0f   : > { %v3253_v47 = vpop.f32.mrb[62].mxu0 }
 0xb10   : > { %v3261_v8 = vmul.f32 %v4832_v23, %v3257_v22  ;;  %v3258_v27 = vadd.f32 %v3253_v47, %v3200_v38  ;;  %v4461_v18 = vpop.f32.mrb[63].mxu0  ;;  %v4843_v47 = vld [vmem:[#allocation2 + $0x8] sm:$0xff] }
 0xb12   : > { %v3262_v62 = vmul.f32 %v4834_v20, %v3258_v27  ;;  %v4844_v27 = vld [vmem:[#allocation2 + $0x10] sm:$0xff] }
 0xb14   : > { %v3263_v7 = vpack.c.bf16 %v3262_v62, %v3261_v8  ;;  %v3596_v62 = vld [vmem:[%s6062_s4] sm:$0xf] }
 0xb15   : > { %v3384_v31 = vpop.f32.mrb[64].mxu0 }
 0xb16   : > { %v3391_v16 = vadd.f32 %v3384_v31, %v3333_v15  ;;  %3414 = vrot.lane.b32.xlu0 %v3263_v7, %s5074_s18  ;;  %v4472_v12 = vpop.f32.mrb[65].mxu0  ;;  %s3659_s18 = sshll.u32 %s614_s22, 4  ;;  %s5955_s18 = int_to_ptr.vmem [resolvable:$true] %s3659_s18 }
 0xb17   : > { %v3387_v33 = vpop.f32.mrb[66].mxu0  ;;  %s4985_s27 = scalar_lea.vmem %s5955_s18, 128 }
 0xb18   : > { %v3395_v34 = vmul.f32 %v4836_v3, %v3391_v16  ;;  %v3392_v49 = vadd.f32 %v3387_v33, %v3334_v13  ;;  %v4473_v26 = vpop.f32.mrb[67].mxu0  ;;  %v3943_v13 = vld [vmem:[%s6060_s23] ss:$0 sm:$0xff]  ;;  %p4986_p12 = scmp.ne.s32.totalorder %s5955_s18, %s4985_s27  ;;  %s5081_s23 = smov [#allocation12]  }
 0xb19   : > { %s4989_s15 = sshll.u32 %s5081_s23, 4  ;;  %s4990_s15 = int_to_ptr.vmem [resolvable:$false] %s4989_s15 }
 0xb1a   : > { %v3396_v28 = vmul.f32 %v4838_v25, %v3392_v49  ;;  %p4987_p2 = pnand %p4986_p12, %p6065_p0  ;;  %s4991_s26 = scalar_lea.vmem %s4990_s15, 256 }
 0xb1b   : > { %p4992_p9 = scmp.lt.s32.totalorder %s5955_s18, %s4990_s15  ;;  %p4993_p5 = scmp.lt.s32.totalorder %s4991_s26, %s4985_s27 }
 0xb1c   : > { %v3397_v0 = vpack.c.bf16 %v3396_v28, %v3395_v34  ;;  %p4988_p6 = pneg %p4987_p2 }
 0xb1d   : > { %p4994_p11 = por %p4993_p5, %p4992_p9 }
 0xb1e   : > { %3417 = vrot.lane.b32.xlu1 %v3397_v0, %s5075_s0 }
 0xb1f   : > { %p4995_p1 = pnand %p4994_p11, %p4988_p6 }
 0xb3f   : > { %v3400_v54 = vpop.permute.xlu0 %3399 }
 0xb40   : > { %v3421_v21 = vsel %vm2329_vm3, %v2456_v14, %v3400_v54 }
 0xb47   : > { %v3403_v51 = vpop.permute.xlu1 %3402 }
 0xb48   : > { %v3424_v35 = vsel %vm3422_vm4, %v3421_v21, %v3403_v51 }
 0xb4f   : > { %v3406_v29 = vpop.permute.xlu1 %3405 }
 0xb50   : > { %v3427_v58 = vsel %vm3425_vm5, %v3424_v35, %v3406_v29 }
 0xb57   : > { %v3409_v44 = vpop.permute.xlu0 %3408 }
 0xb58   : > { %v3430_v32 = vsel %vm3428_vm6, %v3427_v58, %v3409_v44 }
 0xb65   : > { %v3412_v50 = vpop.permute.xlu1 %3411 }
 0xb66   : > { %v3433_v59 = vsel %vm3431_vm7, %v3430_v32, %v3412_v50 }
 0xb88   : > { %v3415_v39 = vpop.permute.xlu0 %3414 }
 0xb89   : > { %v3436_v52 = vsel %vm3434_vm8, %v3433_v59, %v3415_v39 }
 0xb90   : > { %v3418_v17 = vpop.permute.xlu1 %3417 }
 0xb91   : > { %v3439_v53 = vsel %vm3437_vm9, %v3436_v52, %v3418_v17 }
 0xb92   : > { %4491 = vmatmul.mubr.bf16.vlgmr.msra.gmra.mrb[56].mxu1 %v3439_v53 }
 0xc65   : > { %v3546_v36 = vpop.f32.mrb[56].mxu1 }
 0xc66   : > { %v3547_v14 = vadd.f32 %v3934_v24, %v3546_v36  ;;  %v4492_v55 = vpop.f32.mrb[57].mxu1 }
 0xc67   : > { %v3549_v57 = vpop.f32.mrb[58].mxu1 }
 0xc68   : > { %v3550_v43 = vadd.f32 %v3934_v24, %v3549_v57  ;;  %3553 = vadd.xlane.f32.xlu0 %v3547_v14  ;;  %v4493_v56 = vpop.f32.mrb[59].mxu1 }
 0xc6a   : > { %3555 = vadd.xlane.f32.xlu1 %v3550_v43 }
 0xc7b   : > { %3601 = vperm.xlu1 %4605, %v3598_v4  }
 0xcf5   : > { %v3554_v40 = vpop.xlane.xlu0 %3553 }
 0xcf6   : > { %v3558_v42 = vmul.f32 0.0078125, %v3554_v40 }
 0xcf7   : > { %v3556_v41 = vpop.xlane.xlu1 %3555 }
 0xcf8   : > { %v3560_v1 = vsub.f32 %v3547_v14, %v3558_v42  ;;  %v3559_v61 = vmul.f32 0.0078125, %v3556_v41 }
 0xcfa   : > { %v3561_v2 = vsub.f32 %v3550_v43, %v3559_v61  ;;  %v3562_v48 = vmul.f32 %v3560_v1, %v3560_v1 }
 0xcfb   : > { %v3602_v7 = vpop.permute.xlu1 %3601 }
 0xcfc   : > { %3564 = vadd.xlane.f32.xlu0 %v3562_v48  ;;  %v3563_v9 = vmul.f32 %v3561_v2, %v3561_v2 }
 0xd00   : > { %3566 = vadd.xlane.f32.xlu0 %v3563_v9 }
 0xd89   : > { %v3565_v5 = vpop.xlane.xlu0 %3564 }
 0xd8a   : > { %v3568_v38 = vmul.f32 0.0078125, %v3565_v5 }
 0xd8c   : > { %v3570_v63 = vadd.f32 1e-05, %v3568_v38 }
 0xd8d   : > { %v3567_v45 = vpop.xlane.xlu0 %3566 }
 0xd8e   : > { %4839 = vrsqrt.f32 %v3570_v63  ;;  %v3569_v6 = vmul.f32 0.0078125, %v3567_v45 }
 0xd90   : > { %v3571_v10 = vadd.f32 1e-05, %v3569_v6 }
 0xd92   : > { %4841 = vrsqrt.f32 %v3571_v10 }
 0xd98   : > { %v4840_v15 = vpop.eup %4839 }
 0xd99   : > { %v3574_v37 = vmul.f32 %v4840_v15, %v3560_v1 }
 0xd9b   : > { %v3583_v19 = vmul.f32 %v3943_v13, %v3574_v37 }
 0xd9c   : > { %v4842_v46 = vpop.eup %4841 }
 0xd9d   : > { %v3575_v60 = vmul.f32 %v4842_v46, %v3561_v2  ;;  %v3592_v11 = vadd.f32 %v3944_v30, %v3583_v19 }
 0xd9f   : > { %v3584_v22 = vmul.f32 %v3943_v13, %v3575_v60  ;;  %v3594_v8 = vadd.f32 %v4843_v47, %v3592_v11 }
 0xda1   : > { %v3593_v23 = vadd.f32 %v3944_v30, %v3584_v22 }
 0xda3   : > { %v3595_v18 = vadd.f32 %v4844_v27, %v3593_v23 }
 0xda5   : > { %v3597_v20 = vpack.c.bf16 %v3595_v18, %v3594_v8 }
 0xda7   : > { %4495 = vmatpush3.bf16.xpose.msra.mxu0 %v3597_v20 }
 0xdae   : > { %4497 = vmatmul.mubr.bf16.vlgmr.msra.gmra.mrb[68].mxu0 %v3596_v62 }
 0xe81   : > { %v3638_v31 = vpop.f32.mrb[68].mxu0 }
 0xe82   : > { %v3639_v16 = vadd.f32 %v3638_v31, %v3602_v7  ;;  %v4498_v12 = vpop.f32.mrb[69].mxu0 }
 0xe83   : > { %v3641_v3 = vpop.f32.mrb[70].mxu0 }
 0xe84   : > { %3644 = vst.msk [vmem:[%s614_s22] sm:$0xff] %vm2329_vm3, %v3639_v16  ;;  %v4499_v33 = vpop.f32.mrb[71].mxu0 }
 0xe85   : > { %4998 = shalt.err (!%p4995_p1)
}
 0xe86   : > { %s4999_s17 = scalar_lea.hbm %s5953_s19, 128  ;;  %s5003_s29 = scalar_lea.hbm %s6064_s30, 256 }
 0xe87   : > { %p5000_p10 = scmp.ne.s32.totalorder %s5953_s19, %s4999_s17  ;;  %p5004_p13 = scmp.lt.u32.totalorder %s5953_s19, %s6064_s30 }
 0xe88   : > { %p5005_p7 = scmp.lt.u32.totalorder %s5003_s29, %s4999_s17  ;;  %p5007_p12 = scmp.lt.u32.totalorder %s4999_s17, %s5953_s19 }
 0xe89   : > { %p5001_p3 = pnand %p5000_p10, %p6065_p0 }
 0xe8a   : > { %p5006_p8 = por %p5005_p7, %p5004_p13 }
 0xe8b   : > { %p5002_p4 = pneg %p5001_p3 }
 0xe8c   : > { %p5008_p2 = por %p5007_p12, %p5006_p8 }
 0xe8e   : > { %p5009_p6 = pnand %p5008_p2, %p5002_p4 }
 0xe90   : > { %5012 = shalt.err (!%p5009_p6)
}
 0xe91   : > { %4520 = dma.vmem_to_hbm [thread:$0]  (%p6065_p0), %s5955_s18, 128, %s5953_s19, %s3646_s28  }
 0xe92 PF: > { %s6066_s4 = sld [smem:[#allocation19_spill]]  ;;  %s6067_s14 = sld [smem:[#allocation17_spill]] }
 0xe93   : > { %s6068_s0 = sld [smem:[#allocation23_spill]] }
 0xe98   : > { %p4552_p9 = scmp.ge.s32.totalorder %s6066_s4, 2  ;;  %s3671_s1 = sand.u32 1, %s6067_s14  }
 0xe99   : > { %p6069_p5 = scmp.ne.s32.totalorder %s6068_s0, 0  ;;  %s3672_s27 = scalar_lea.sflag [#allocation5], %s3671_s1 }
 0xe9b   : > { %p4539_p11 = pnand %p4552_p9, %p6069_p5 }
 0xe9d   : > { %5042 = dma.done.wait (!%p4539_p11), %s3672_s27, 128  }
 0xe9e   : > { %5044 = vsyncadd (!%p4539_p11), %s3672_s27, 4294967168  ;;  %s6070_s27 = sld [smem:[#allocation20_spill]]  ;;  %s6071_s23 = sld [smem:[#allocation18_spill]] }
 0xe9f   : > { %s6072_s26 = sld [smem:[#allocation21_spill]]  ;;  %s6073_s24 = smov %s5051_s25 }
 0xea4   : > { %p30_p1 = scmp.ge.s32.totalorder %s6070_s27, 4   ;;  %s6074_s25 = smov %s6071_s23 }
 0xea6   :  { %32 = sbr.rel (!%p30_p1) target bundleno = 14 (0xe), region = 160 }
 0xead   :  { %3677 = vsyncpa [#allocation4], 1 }
 0xeae   :  { %3679 = vsyncpa [#allocation4 + $0x1], 1 }
 0xeaf   :  { %3680 = vsyncpa [#allocation7], 1 }
 0xeb0   :  { %3681 = vsyncpa [#allocation10], 1 }
 0xeb1   :  { %3682 = vsyncpa [#allocation5], 1 }
 0xeb2   :  { %3684 = vsyncpa [#allocation5 + $0x1], 1 }

</bundles_post_ra>
